<compile_context>
chip_gen: v5e
topology: v5e:2x2
jax: 0.10.0
libtpu: 0.0.40
codegen_flags: <defaults>
</compile_context>

<pallas_src>
import functools

import jax
import jax.numpy as jnp
from jax.experimental import pallas as pl
from jax.experimental.pallas import tpu as pltpu

EPS = 1e-8       # SASRec uses eps=1e-8 layernorms
NEG_INF = -1e9


# ----------------------------------------------------------------------------
# in-kernel helpers
# ----------------------------------------------------------------------------
def _layernorm(x, g, b):
    """One-pass layernorm: var = E[x^2] - E[x]^2 (one fewer cross-lane reduce)."""
    mu = jnp.mean(x, axis=-1, keepdims=True)
    ms = jnp.mean(x * x, axis=-1, keepdims=True)
    var = jnp.maximum(ms - mu * mu, 0.0)
    return (x - mu) * jax.lax.rsqrt(var + EPS) * g + b


def _causal_bias(lq, lk):
    """Additive causal mask (lq, lk), generated in-kernel (no HBM traffic)."""
    row = jax.lax.broadcasted_iota(jnp.int32, (lq, lk), 0)
    col = jax.lax.broadcasted_iota(jnp.int32, (lq, lk), 1)
    return jnp.where(col <= row, 0.0, NEG_INF).astype(jnp.float32)


def _mha(q_in, kv_in, wqkv, bqkv, wo, bo, *, num_heads, tb, lq, lk, mask):
    """Multi-head attention (torch nn.MultiheadAttention semantics, eval mode).

    q_in:  (tb*lq, D) f32     query input (already layernormed, SASRec style)
    kv_in: (tb*lk, D) f32     key/value input
    wqkv:  (3H, D, dh) bf16   per-head projection slabs [q heads, k heads, v heads]
    bqkv:  (3H, dh)   f32     matching biases
    wo:    (D, D)     bf16    output projection
    bo:    (1, D)     f32     output bias
    mask:  (lq, lk)   f32     additive attention mask
    """
    H = num_heads
    dh = wqkv.shape[-1]
    scale = 1.0 / (dh ** 0.5)
    qb = q_in.astype(jnp.bfloat16)
    kvb = kv_in.astype(jnp.bfloat16)

    head_outs = []
    for h in range(H):                       # static unroll; H is small (1-4)
        q = (jnp.dot(qb, wqkv[h], preferred_element_type=jnp.float32)
             + bqkv[h:h + 1]).reshape(tb, lq, dh)
        k = (jnp.dot(kvb, wqkv[H + h], preferred_element_type=jnp.float32)
             + bqkv[H + h:H + h + 1]).reshape(tb, lk, dh)
        v = (jnp.dot(kvb, wqkv[2 * H + h], preferred_element_type=jnp.float32)
             + bqkv[2 * H + h:2 * H + h + 1]).reshape(tb, lk, dh)

        s = jnp.einsum('bqd,bkd->bqk', q.astype(jnp.bfloat16),
                       k.astype(jnp.bfloat16),
                       preferred_element_type=jnp.float32) * scale
        s = s + mask[None, :, :]
        s = s - jnp.max(s, axis=-1, keepdims=True)
        p = jnp.exp(s)
        p = p / jnp.sum(p, axis=-1, keepdims=True)   # exact softmax (parity)
        o = jnp.einsum('bqk,bkd->bqd', p.astype(jnp.bfloat16),
                       v.astype(jnp.bfloat16),
                       preferred_element_type=jnp.float32)     # (tb, lq, dh)
        head_outs.append(o.reshape(tb * lq, dh))

    # Re-merge heads once, then a single full-K (D x D) output projection.
    merged = head_outs[0] if H == 1 else jnp.concatenate(head_outs, axis=-1)
    return jnp.dot(merged.astype(jnp.bfloat16), wo,
                   preferred_element_type=jnp.float32) + bo


def _ffn(xn, fw, fb):
    """PointWiseFeedForward (Conv1d k=1 == dense): relu(xn@W1+b1)@W2+b2."""
    h = jnp.dot(xn.astype(jnp.bfloat16), fw[0],
                preferred_element_type=jnp.float32) + fb[0:1]
    h = jnp.maximum(h, 0.0)
    return jnp.dot(h.astype(jnp.bfloat16), fw[1],
                   preferred_element_type=jnp.float32) + fb[1:2]


# ----------------------------------------------------------------------------
# fused Pallas kernels (layer axis folded into the grid)
# ----------------------------------------------------------------------------
def enc_stack_kernel(x_ref, valid_ref, lng_ref, lnb_ref, wqkv_ref, bqkv_ref,
                     wo_ref, bo_ref, fw_ref, fb_ref,
                     tap_ref, out_ref, act_ref, *, num_heads):
    layer = pl.program_id(1)
    tb, L, d = act_ref.shape
    m = tb * L

    @pl.when(layer == 0)
    def _():
        act_ref[...] = x_ref[...].astype(jnp.float32)

    x3 = act_ref[...]                                    # (tb, L, D) f32
    tap_ref[0] = x3.astype(tap_ref.dtype)                # encoder_layer_input[layer]

    x = x3.reshape(m, d)
    g = lng_ref[0]                                       # (2, D)
    b = lnb_ref[0]
    mask = _causal_bias(L, L)

    xn = _layernorm(x, g[0:1], b[0:1])                   # Q = LN1(x)
    attn = _mha(xn, x, wqkv_ref[0], bqkv_ref[0], wo_ref[0], bo_ref[0],
                num_heads=num_heads, tb=tb, lq=L, lk=L, mask=mask)
    h = xn + attn                                        # residual (Q + MHA out)
    hn = _layernorm(h, g[1:2], b[1:2])                   # LN2
    y = _ffn(hn, fw_ref[0], fb_ref[0]) + hn              # FFN residual (on LN2 out)
    y3 = y.reshape(tb, L, d) * valid_ref[...]            # timeline mask
    act_ref[...] = y3

    @pl.when(layer == pl.num_programs(1) - 1)
    def _():
        out_ref[...] = y3.astype(out_ref.dtype)


def dec_stack_kernel(x_ref, enc_ref, valid_ref, lng_ref, lnb_ref,
                     s_wqkv_ref, s_bqkv_ref, s_wo_ref, s_bo_ref,
                     c_wqkv_ref, c_bqkv_ref, c_wo_ref, c_bo_ref,
                     fw_ref, fb_ref, tap_ref, act_ref, *, num_heads):
    layer = pl.program_id(1)
    tb, L, d = act_ref.shape
    lk = enc_ref.shape[1]
    m = tb * L

    @pl.when(layer == 0)
    def _():
        act_ref[...] = x_ref[...].astype(jnp.float32)

    x = act_ref[...].reshape(m, d)
    enc = enc_ref[...].astype(jnp.float32).reshape(tb * lk, d)
    g = lng_ref[0]                                       # (3, D)
    b = lnb_ref[0]
    self_mask = _causal_bias(L, L)
    cross_mask = _causal_bias(L, lk)                     # src_masks == causal (tl, tl)

    xn = _layernorm(x, g[0:1], b[0:1])
    h1 = xn + _mha(xn, x, s_wqkv_ref[0], s_bqkv_ref[0], s_wo_ref[0], s_bo_ref[0],
                   num_heads=num_heads, tb=tb, lq=L, lk=L, mask=self_mask)
    h1n = _layernorm(h1, g[1:2], b[1:2])
    h2 = h1n + _mha(h1n, enc, c_wqkv_ref[0], c_bqkv_ref[0], c_wo_ref[0], c_bo_ref[0],
                    num_heads=num_heads, tb=tb, lq=L, lk=lk, mask=cross_mask)
    h2n = _layernorm(h2, g[2:3], b[2:3])
    y = _ffn(h2n, fw_ref[0], fb_ref[0]) + h2n
    y3 = y.reshape(tb, L, d) * valid_ref[...]
    act_ref[...] = y3
    tap_ref[0] = y3.astype(tap_ref.dtype)                # decoder_layer_output[layer]


def final_kernel(x_ref, pos_ref, neg_ref, g_ref, b_ref,
                 feat_ref, pos_out_ref, neg_out_ref):
    tb, L, d = x_ref.shape
    x = x_ref[...].astype(jnp.float32).reshape(tb * L, d)
    feats = _layernorm(x, g_ref[...], b_ref[...]).reshape(tb, L, d)
    feat_ref[...] = feats.astype(feat_ref.dtype)
    pos_out_ref[...] = jnp.sum(feats * pos_ref[...].astype(jnp.float32),
                               axis=-1, keepdims=True)
    neg_out_ref[...] = jnp.sum(feats * neg_ref[...].astype(jnp.float32),
                               axis=-1, keepdims=True)


# ----------------------------------------------------------------------------
# VMEM-aware tiling
# ----------------------------------------------------------------------------
def _vmem_capacity_bytes():
    try:
        return int(pltpu.get_tpu_info().vmem_capacity_bytes)
    except Exception:
        return 64 * 1024 * 1024        # conservative fallback (v7x per-core VMEM)


def _stack_vmem_need(tb, L, D):
    """Rough upper bound on live VMEM (bytes) for one fused decoder-layer step."""
    m = tb * L
    blk = m * D * 2                                # one bf16 (tb, L, D) block
    blocks = 2 * (3 * blk + m * 4)                 # x, enc, tap blocks + valid (x2 buf)
    blocks += 2 * blk                              # encoder final-output block
    weights = 2 * (10 * D * D * 2 + 64 * D)        # double-buffered per-layer weights
    scratch = m * D * 4                            # f32 activation carry
    interm = 14 * m * D * 4 + 2 * tb * L * L * 4   # f32 temporaries + per-head scores
    return blocks + weights + scratch + interm


def _pick_batch_tile(B, L, D, budget):
    """Largest divisor of B whose fused-layer working set fits `budget`,
    preferring >= 2 (and even) steps on the parallel batch axis (megacore)."""
    cands = [t for t in range(min(B, 256), 0, -1)
             if B % t == 0 and _stack_vmem_need(t, L, D) <= budget]
    if not cands:
        return 1
    for pred in (lambda t: (B // t) >= 2 and (B // t) % 2 == 0,
                 lambda t: (B // t) >= 2):
        for t in cands:
            if pred(t):
                return t
    return cands[0]


# ----------------------------------------------------------------------------
# pallas_call wrappers
# ----------------------------------------------------------------------------
def _cp(vmem_limit, n_axes):
    sem = ("parallel",) + ("arbitrary",) * (n_axes - 1)
    return pltpu.CompilerParams(dimension_semantics=sem,
                                vmem_limit_bytes=vmem_limit)


def enc_stack(x, valid, p, num_heads, num_layers, tb, vmem_limit):
    B, L, D = x.shape
    H = num_heads
    dh = D // H
    bmap = lambda i, l: (i, 0, 0)
    w3 = lambda i, l: (l, 0, 0)
    w4 = lambda i, l: (l, 0, 0, 0)
    return pl.pallas_call(
        functools.partial(enc_stack_kernel, num_heads=num_heads),
        out_shape=(jax.ShapeDtypeStruct((num_layers, B, L, D), jnp.bfloat16),
                   jax.ShapeDtypeStruct((B, L, D), jnp.bfloat16)),
        grid=(B // tb, num_layers),
        in_specs=[
            pl.BlockSpec((tb, L, D), bmap),            # x (embeddings)
            pl.BlockSpec((tb, L, 1), bmap),            # timeline mask
            pl.BlockSpec((1, 2, D), w3),               # ln gamma
            pl.BlockSpec((1, 2, D), w3),               # ln beta
            pl.BlockSpec((1, 3 * H, D, dh), w4),       # per-head QKV weights
            pl.BlockSpec((1, 3 * H, dh), w3),          # per-head QKV biases
            pl.BlockSpec((1, D, D), w3),               # Wo
            pl.BlockSpec((1, 1, D), w3),               # bo
            pl.BlockSpec((1, 2, D, D), w4),            # FFN weights
            pl.BlockSpec((1, 2, D), w3),               # FFN biases
        ],
        out_specs=(pl.BlockSpec((1, tb, L, D), lambda i, l: (l, i, 0, 0)),
                   pl.BlockSpec((tb, L, D), bmap)),
        scratch_shapes=[pltpu.VMEM((tb, L, D), jnp.float32)],
        compiler_params=_cp(vmem_limit, 2),
    )(x, valid, p["ln_g"], p["ln_b"], p["qkv_w"], p["qkv_b"], p["wo"], p["bo"],
      p["ffn_w"], p["ffn_b"])


def dec_stack(x, enc_out, valid, p, num_heads, num_layers, tb, vmem_limit):
    B, L, D = x.shape
    H = num_heads
    dh = D // H
    Lk = enc_out.shape[1]
    bmap = lambda i, l: (i, 0, 0)
    w3 = lambda i, l: (l, 0, 0)
    w4 = lambda i, l: (l, 0, 0, 0)
    return pl.pallas_call(
        functools.partial(dec_stack_kernel, num_heads=num_heads),
        out_shape=jax.ShapeDtypeStruct((num_layers, B, L, D), jnp.bfloat16),
        grid=(B // tb, num_layers),
        in_specs=[
            pl.BlockSpec((tb, L, D), bmap),            # decoder embeddings
            pl.BlockSpec((tb, Lk, D), bmap),           # log_feats (encoder output)
            pl.BlockSpec((tb, L, 1), bmap),            # timeline mask
            pl.BlockSpec((1, 3, D), w3),               # ln gamma
            pl.BlockSpec((1, 3, D), w3),               # ln beta
            pl.BlockSpec((1, 3 * H, D, dh), w4),       # self-attn QKV weights
            pl.BlockSpec((1, 3 * H, dh), w3),          # self-attn QKV biases
            pl.BlockSpec((1, D, D), w3),               # self-attn Wo
            pl.BlockSpec((1, 1, D), w3),               # self-attn bo
            pl.BlockSpec((1, 3 * H, D, dh), w4),       # cross-attn QKV weights
            pl.BlockSpec((1, 3 * H, dh), w3),          # cross-attn QKV biases
            pl.BlockSpec((1, D, D), w3),               # cross-attn Wo
            pl.BlockSpec((1, 1, D), w3),               # cross-attn bo
            pl.BlockSpec((1, 2, D, D), w4),            # FFN weights
            pl.BlockSpec((1, 2, D), w3),               # FFN biases
        ],
        out_specs=pl.BlockSpec((1, tb, L, D), lambda i, l: (l, i, 0, 0)),
        scratch_shapes=[pltpu.VMEM((tb, L, D), jnp.float32)],
        compiler_params=_cp(vmem_limit, 2),
    )(x, enc_out, valid, p["ln_g"], p["ln_b"],
      p["sa_qkv_w"], p["sa_qkv_b"], p["sa_wo"], p["sa_bo"],
      p["ca_qkv_w"], p["ca_qkv_b"], p["ca_wo"], p["ca_bo"],
      p["ffn_w"], p["ffn_b"])


def final_ln_logits(x, pos_embs, neg_embs, ln, tb, vmem_limit):
    B, L, D = x.shape
    bmap3 = lambda i: (i, 0, 0)
    c2 = lambda i: (0, 0)
    return pl.pallas_call(
        final_kernel,
        out_shape=(jax.ShapeDtypeStruct((B, L, D), jnp.bfloat16),
                   jax.ShapeDtypeStruct((B, L, 1), jnp.float32),
                   jax.ShapeDtypeStruct((B, L, 1), jnp.float32)),
        grid=(B // tb,),
        in_specs=[
            pl.BlockSpec((tb, L, D), bmap3),
            pl.BlockSpec((tb, L, D), bmap3),
            pl.BlockSpec((tb, L, D), bmap3),
            pl.BlockSpec((1, D), c2), pl.BlockSpec((1, D), c2),
        ],
        out_specs=(pl.BlockSpec((tb, L, D), bmap3),
                   pl.BlockSpec((tb, L, 1), bmap3),
                   pl.BlockSpec((tb, L, 1), bmap3)),
        compiler_params=_cp(vmem_limit, 1),
    )(x, pos_embs, neg_embs, ln["g"], ln["b"])


# ----------------------------------------------------------------------------
# parameters + forward glue
# ----------------------------------------------------------------------------
def init_params(key, item_num, maxlen, hidden, num_heads, num_layers):
    assert hidden % num_heads == 0
    H, dh, NL = num_heads, hidden // num_heads, num_layers
    kiter = iter(jax.random.split(key, 32))
    nrm = lambda shape: 0.02 * jax.random.normal(next(kiter), shape, jnp.float32)

    def attn_pack(prefix=""):
        return {
            prefix + "qkv_w": nrm((NL, 3 * H, hidden, dh)).astype(jnp.bfloat16),
            prefix + "qkv_b": jnp.zeros((NL, 3 * H, dh), jnp.float32),
            prefix + "wo": nrm((NL, hidden, hidden)).astype(jnp.bfloat16),
            prefix + "bo": jnp.zeros((NL, 1, hidden), jnp.float32),
        }

    item_emb = nrm((item_num + 1, hidden)).at[0].set(0.0)        # padding_idx=0
    pos_emb = nrm((maxlen, hidden))

    enc = dict(
        ln_g=jnp.ones((NL, 2, hidden), jnp.float32),
        ln_b=jnp.zeros((NL, 2, hidden), jnp.float32),
        ffn_w=nrm((NL, 2, hidden, hidden)).astype(jnp.bfloat16),
        ffn_b=jnp.zeros((NL, 2, hidden), jnp.float32),
        **attn_pack())

    dec = dict(
        ln_g=jnp.ones((NL, 3, hidden), jnp.float32),
        ln_b=jnp.zeros((NL, 3, hidden), jnp.float32),
        ffn_w=nrm((NL, 2, hidden, hidden)).astype(jnp.bfloat16),
        ffn_b=jnp.zeros((NL, 2, hidden), jnp.float32),
        **attn_pack("sa_"), **attn_pack("ca_"))

    last_ln = dict(g=jnp.ones((1, hidden), jnp.float32),
                   b=jnp.zeros((1, hidden), jnp.float32))
    return dict(item_emb=item_emb, pos_emb=pos_emb, enc=enc, dec=dec,
                last_ln=last_ln)


def _embed(params, seqs, hidden):
    L = seqs.shape[1]
    x = params["item_emb"][seqs] * (hidden ** 0.5)
    x = x + params["pos_emb"][:L][None, :, :]
    # emb_dropout: identity (eval mode)
    valid = (seqs != 0).astype(jnp.float32)[..., None]            # (B, L, 1)
    return (x * valid).astype(jnp.bfloat16), valid


def sasrec_adt_forward(params, user_ids, log_seqs, dec_seqs, pos_seqs, neg_seqs,
                       *, num_heads, num_layers, hidden):
    del user_ids  # unused in the reference forward as well
    B, L = log_seqs.shape
    cap = _vmem_capacity_bytes()
    vmem_limit = int(cap * 0.9)
    tb = _pick_batch_tile(B, L, hidden, budget=int(cap * 0.55))

    # ---- encoder (log2feats), layer loop fused into the grid ----
    x_enc, valid_enc = _embed(params, log_seqs, hidden)
    enc_taps, enc_out = enc_stack(x_enc, valid_enc, params["enc"],
                                  num_heads, num_layers, tb, vmem_limit)
    encoder_layer_input = enc_taps.astype(jnp.float32)            # (layers,B,L,D)
    # TODO(synk): the ADT encoder samples a reconstruction layer index; fixed here.
    rec_layer_ind = jnp.int32(num_layers - 1)

    # ---- final layernorm fused with pos/neg logit reduction ----
    pos_embs = params["item_emb"][pos_seqs]
    neg_embs = params["item_emb"][neg_seqs]
    log_feats, pos3, neg3 = final_ln_logits(enc_out, pos_embs, neg_embs,
                                            params["last_ln"], tb, vmem_limit)
    pos_logits = pos3[..., 0]
    neg_logits = neg3[..., 0]

    # ---- decoder (cross-attends to log_feats; causal src mask built in-kernel) ----
    x_dec, valid_dec = _embed(params, dec_seqs, hidden)
    dec_taps = dec_stack(x_dec, log_feats, valid_dec, params["dec"],
                         num_heads, num_layers, tb, vmem_limit)
    decoder_layer_output = dec_taps.astype(jnp.float32)           # (layers,B,L,D)

    return (pos_logits, neg_logits, encoder_layer_input,
            decoder_layer_output, rec_layer_ind)


# ----------------------------------------------------------------------------
if __name__ == "__main__":
    # Small synthetic configuration.
    user_num, item_num = 5, 50
    batch, maxlen, hidden, num_heads, num_layers = 2, 8, 32, 2, 2

    key = jax.random.PRNGKey(0)
    kp, k1, k2, k3, k4 = jax.random.split(key, 5)
    params = init_params(kp, item_num, maxlen, hidden, num_heads, num_layers)

    user_ids = jnp.arange(batch, dtype=jnp.int32)
    log_seqs = jax.random.randint(k1, (batch, maxlen), 0, item_num + 1, jnp.int32)
    dec_seqs = jax.random.randint(k2, (batch, maxlen), 0, item_num + 1, jnp.int32)
    pos_seqs = jax.random.randint(k3, (batch, maxlen), 0, item_num + 1, jnp.int32)
    neg_seqs = jax.random.randint(k4, (batch, maxlen), 0, item_num + 1, jnp.int32)

    fwd = jax.jit(functools.partial(
        sasrec_adt_forward, num_heads=num_heads, num_layers=num_layers,
        hidden=hidden))
    outs = jax.block_until_ready(
        fwd(params, user_ids, log_seqs, dec_seqs, pos_seqs, neg_seqs))

    pos_logits, neg_logits, enc_li, dec_lo, rec_ind = outs
    assert pos_logits.shape == (batch, maxlen)
    assert neg_logits.shape == (batch, maxlen)
    assert enc_li.shape == (num_layers, batch, maxlen, hidden)
    assert dec_lo.shape == (num_layers, batch, maxlen, hidden)
    assert bool(jnp.all(jnp.isfinite(pos_logits)))
    assert bool(jnp.all(jnp.isfinite(neg_logits)))
    print("KERNEL_OK")
</pallas_src>

<mosaic_0001>
module attributes {stable_mosaic.version = 11 : i64} {
  func.func @final_kernel(%arg0: i32, %arg1: memref<1x8x32xbf16, #tpu.memory_space<vmem>>, %arg2: memref<1x8x32xf32, #tpu.memory_space<vmem>>, %arg3: memref<1x8x32xf32, #tpu.memory_space<vmem>>, %arg4: memref<1x32xf32, #tpu.memory_space<vmem>>, %arg5: memref<1x32xf32, #tpu.memory_space<vmem>>, %arg6: memref<1x8x32xbf16, #tpu.memory_space<vmem>>, %arg7: memref<1x8x1xf32, #tpu.memory_space<vmem>>, %arg8: memref<1x8x1xf32, #tpu.memory_space<vmem>>) attributes {dimension_semantics = [#tpu.dimension_semantics<parallel>], iteration_bounds = array<i64: 2>, scalar_prefetch = 0 : i64, scratch_operands = 0 : i64, tpu.core_type = #tpu.core_type<tc>, window_params = [{transform_indices = @transform_0, window_bounds = array<i64: 1, 8, 32>}, {transform_indices = @transform_1, window_bounds = array<i64: 1, 8, 32>}, {transform_indices = @transform_2, window_bounds = array<i64: 1, 8, 32>}, {pipeline_mode = #tpu.pipeline_mode<synchronous>, transform_indices = @transform_3, window_bounds = array<i64: 1, 32>}, {pipeline_mode = #tpu.pipeline_mode<synchronous>, transform_indices = @transform_4, window_bounds = array<i64: 1, 32>}, {transform_indices = @transform_5, window_bounds = array<i64: 1, 8, 32>}, {transform_indices = @transform_6, window_bounds = array<i64: 1, 8, 1>}, {transform_indices = @transform_7, window_bounds = array<i64: 1, 8, 1>}]} {
    %c0 = arith.constant 0 : index
    %c0_0 = arith.constant 0 : index
    %c0_1 = arith.constant 0 : index
    %0 = vector.load %arg1[%c0, %c0_0, %c0_1] : memref<1x8x32xbf16, #tpu.memory_space<vmem>>, vector<1x8x32xbf16>
    %1 = arith.extf %0 : vector<1x8x32xbf16> to vector<1x8x32xf32>
    %2 = vector.shape_cast %1 : vector<1x8x32xf32> to vector<8x32xf32>
    %c0_2 = arith.constant 0 : index
    %c0_3 = arith.constant 0 : index
    %3 = vector.load %arg4[%c0_2, %c0_3] : memref<1x32xf32, #tpu.memory_space<vmem>>, vector<1x32xf32>
    %c0_4 = arith.constant 0 : index
    %c0_5 = arith.constant 0 : index
    %4 = vector.load %arg5[%c0_4, %c0_5] : memref<1x32xf32, #tpu.memory_space<vmem>>, vector<1x32xf32>
    %cst = arith.constant dense<0.000000e+00> : vector<8xf32>
    %5 = vector.multi_reduction <add>, %2, %cst [1] : vector<8x32xf32> to vector<8xf32>
    %6 = vector.shape_cast %5 : vector<8xf32> to vector<8x1xf32>
    %cst_6 = arith.constant 3.200000e+01 : f32
    %7 = vector.broadcast %cst_6 : f32 to vector<8x1xf32>
    %8 = arith.divf %6, %7 : vector<8x1xf32>
    %9 = arith.mulf %2, %2 : vector<8x32xf32>
    %cst_7 = arith.constant dense<0.000000e+00> : vector<8xf32>
    %10 = vector.multi_reduction <add>, %9, %cst_7 [1] : vector<8x32xf32> to vector<8xf32>
    %11 = vector.shape_cast %10 : vector<8xf32> to vector<8x1xf32>
    %cst_8 = arith.constant 3.200000e+01 : f32
    %12 = vector.broadcast %cst_8 : f32 to vector<8x1xf32>
    %13 = arith.divf %11, %12 : vector<8x1xf32>
    %14 = arith.mulf %8, %8 : vector<8x1xf32>
    %15 = arith.subf %13, %14 : vector<8x1xf32>
    %cst_9 = arith.constant 0.000000e+00 : f32
    %16 = vector.broadcast %cst_9 : f32 to vector<8x1xf32>
    %17 = arith.maximumf %15, %16 : vector<8x1xf32>
    %18 = vector.broadcast %8 : vector<8x1xf32> to vector<8x32xf32>
    %19 = arith.subf %2, %18 : vector<8x32xf32>
    %cst_10 = arith.constant 9.99999993E-9 : f32
    %20 = vector.broadcast %cst_10 : f32 to vector<8x1xf32>
    %21 = arith.addf %17, %20 : vector<8x1xf32>
    %22 = math.rsqrt %21 : vector<8x1xf32>
    %23 = vector.broadcast %22 : vector<8x1xf32> to vector<8x32xf32>
    %24 = arith.mulf %19, %23 : vector<8x32xf32>
    %25 = vector.broadcast %3 : vector<1x32xf32> to vector<8x32xf32>
    %26 = arith.mulf %24, %25 : vector<8x32xf32>
    %27 = vector.broadcast %4 : vector<1x32xf32> to vector<8x32xf32>
    %28 = arith.addf %26, %27 : vector<8x32xf32>
    %29 = vector.shape_cast %28 : vector<8x32xf32> to vector<1x8x32xf32>
    %30 = arith.truncf %29 : vector<1x8x32xf32> to vector<1x8x32xbf16>
    %c0_11 = arith.constant 0 : index
    %c0_12 = arith.constant 0 : index
    %c0_13 = arith.constant 0 : index
    %31 = vector.load %arg6[%c0_11, %c0_12, %c0_13] : memref<1x8x32xbf16, #tpu.memory_space<vmem>>, vector<1x8x32xbf16>
    tpu.vector_store %arg6[%c0_11, %c0_12, %c0_13], %30 {strides = array<i32>} : memref<1x8x32xbf16, #tpu.memory_space<vmem>>, vector<1x8x32xbf16>,
    %c0_14 = arith.constant 0 : index
    %c0_15 = arith.constant 0 : index
    %c0_16 = arith.constant 0 : index
    %32 = vector.load %arg2[%c0_14, %c0_15, %c0_16] : memref<1x8x32xf32, #tpu.memory_space<vmem>>, vector<1x8x32xf32>
    %33 = arith.mulf %29, %32 : vector<1x8x32xf32>
    %cst_17 = arith.constant dense<0.000000e+00> : vector<1x8xf32>
    %34 = vector.multi_reduction <add>, %33, %cst_17 [2] : vector<1x8x32xf32> to vector<1x8xf32>
    %35 = vector.shape_cast %34 : vector<1x8xf32> to vector<1x8x1xf32>
    %c0_18 = arith.constant 0 : index
    %c0_19 = arith.constant 0 : index
    %c0_20 = arith.constant 0 : index
    %36 = vector.load %arg7[%c0_18, %c0_19, %c0_20] : memref<1x8x1xf32, #tpu.memory_space<vmem>>, vector<1x8x1xf32>
    tpu.vector_store %arg7[%c0_18, %c0_19, %c0_20], %35 {strides = array<i32>} : memref<1x8x1xf32, #tpu.memory_space<vmem>>, vector<1x8x1xf32>,
    %c0_21 = arith.constant 0 : index
    %c0_22 = arith.constant 0 : index
    %c0_23 = arith.constant 0 : index
    %37 = vector.load %arg3[%c0_21, %c0_22, %c0_23] : memref<1x8x32xf32, #tpu.memory_space<vmem>>, vector<1x8x32xf32>
    %38 = arith.mulf %29, %37 : vector<1x8x32xf32>
    %cst_24 = arith.constant dense<0.000000e+00> : vector<1x8xf32>
    %39 = vector.multi_reduction <add>, %38, %cst_24 [2] : vector<1x8x32xf32> to vector<1x8xf32>
    %40 = vector.shape_cast %39 : vector<1x8xf32> to vector<1x8x1xf32>
    %c0_25 = arith.constant 0 : index
    %c0_26 = arith.constant 0 : index
    %c0_27 = arith.constant 0 : index
    %41 = vector.load %arg8[%c0_25, %c0_26, %c0_27] : memref<1x8x1xf32, #tpu.memory_space<vmem>>, vector<1x8x1xf32>
    tpu.vector_store %arg8[%c0_25, %c0_26, %c0_27], %40 {strides = array<i32>} : memref<1x8x1xf32, #tpu.memory_space<vmem>>, vector<1x8x1xf32>,
    return
  }
  func.func @transform_0(%arg0: i32) -> (i32, i32, i32) {
    %c0_i32 = arith.constant 0 : i32
    %c0_i32_0 = arith.constant 0 : i32
    %c0_i32_1 = arith.constant 0 : i32
    return %arg0, %c0_i32, %c0_i32_0 : i32, i32, i32
  }
  func.func @transform_1(%arg0: i32) -> (i32, i32, i32) {
    %c0_i32 = arith.constant 0 : i32
    %c0_i32_0 = arith.constant 0 : i32
    %c0_i32_1 = arith.constant 0 : i32
    return %arg0, %c0_i32, %c0_i32_0 : i32, i32, i32
  }
  func.func @transform_2(%arg0: i32) -> (i32, i32, i32) {
    %c0_i32 = arith.constant 0 : i32
    %c0_i32_0 = arith.constant 0 : i32
    %c0_i32_1 = arith.constant 0 : i32
    return %arg0, %c0_i32, %c0_i32_0 : i32, i32, i32
  }
  func.func @transform_3(%arg0: i32) -> (i32, i32) {
    %c0_i32 = arith.constant 0 : i32
    %c0_i32_0 = arith.constant 0 : i32
    %c0_i32_1 = arith.constant 0 : i32
    return %c0_i32, %c0_i32_0 : i32, i32
  }
  func.func @transform_4(%arg0: i32) -> (i32, i32) {
    %c0_i32 = arith.constant 0 : i32
    %c0_i32_0 = arith.constant 0 : i32
    %c0_i32_1 = arith.constant 0 : i32
    return %c0_i32, %c0_i32_0 : i32, i32
  }
  func.func @transform_5(%arg0: i32) -> (i32, i32, i32) {
    %c0_i32 = arith.constant 0 : i32
    %c0_i32_0 = arith.constant 0 : i32
    %c0_i32_1 = arith.constant 0 : i32
    return %arg0, %c0_i32, %c0_i32_0 : i32, i32, i32
  }
  func.func @transform_6(%arg0: i32) -> (i32, i32, i32) {
    %c0_i32 = arith.constant 0 : i32
    %c0_i32_0 = arith.constant 0 : i32
    %c0_i32_1 = arith.constant 0 : i32
    return %arg0, %c0_i32, %c0_i32_0 : i32, i32, i32
  }
  func.func @transform_7(%arg0: i32) -> (i32, i32, i32) {
    %c0_i32 = arith.constant 0 : i32
    %c0_i32_0 = arith.constant 0 : i32
    %c0_i32_1 = arith.constant 0 : i32
    return %arg0, %c0_i32, %c0_i32_0 : i32, i32, i32
  }
}

module attributes {stable_mosaic.version = 11 : i64} {
  func.func @enc_stack_kernel(%arg0: i32, %arg1: i32, %arg2: memref<1x8x32xbf16, #tpu.memory_space<vmem>>, %arg3: memref<1x8x1xf32, #tpu.memory_space<vmem>>, %arg4: memref<1x2x32xf32, #tpu.memory_space<vmem>>, %arg5: memref<1x2x32xf32, #tpu.memory_space<vmem>>, %arg6: memref<1x6x32x16xbf16, #tpu.memory_space<vmem>>, %arg7: memref<1x6x16xf32, #tpu.memory_space<vmem>>, %arg8: memref<1x32x32xbf16, #tpu.memory_space<vmem>>, %arg9: memref<1x1x32xf32, #tpu.memory_space<vmem>>, %arg10: memref<1x2x32x32xbf16, #tpu.memory_space<vmem>>, %arg11: memref<1x2x32xf32, #tpu.memory_space<vmem>>, %arg12: memref<1x1x8x32xbf16, #tpu.memory_space<vmem>>, %arg13: memref<1x8x32xbf16, #tpu.memory_space<vmem>>, %arg14: memref<1x8x32xf32, #tpu.memory_space<vmem>>) attributes {dimension_semantics = [#tpu.dimension_semantics<parallel>, #tpu.dimension_semantics<arbitrary>], iteration_bounds = array<i64: 2, 2>, scalar_prefetch = 0 : i64, scratch_operands = 1 : i64, tpu.core_type = #tpu.core_type<tc>, window_params = [{transform_indices = @transform_0, window_bounds = array<i64: 1, 8, 32>}, {transform_indices = @transform_1, window_bounds = array<i64: 1, 8, 1>}, {transform_indices = @transform_2, window_bounds = array<i64: 1, 2, 32>}, {transform_indices = @transform_3, window_bounds = array<i64: 1, 2, 32>}, {transform_indices = @transform_4, window_bounds = array<i64: 1, 6, 32, 16>}, {transform_indices = @transform_5, window_bounds = array<i64: 1, 6, 16>}, {transform_indices = @transform_6, window_bounds = array<i64: 1, 32, 32>}, {transform_indices = @transform_7, window_bounds = array<i64: 1, 1, 32>}, {transform_indices = @transform_8, window_bounds = array<i64: 1, 2, 32, 32>}, {transform_indices = @transform_9, window_bounds = array<i64: 1, 2, 32>}, {transform_indices = @transform_10, window_bounds = array<i64: 1, 1, 8, 32>}, {transform_indices = @transform_11, window_bounds = array<i64: 1, 8, 32>}]} {
    %c0_i32 = arith.constant 0 : i32
    %0 = arith.cmpi eq, %arg1, %c0_i32 : i32
    %1 = arith.extui %0 : i1 to i32
    %c0_i32_0 = arith.constant 0 : i32
    %2 = arith.cmpi ne, %1, %c0_i32_0 : i32
    scf.if %2 {
      %c0_73 = arith.constant 0 : index
      %c0_74 = arith.constant 0 : index
      %c0_75 = arith.constant 0 : index
      %198 = vector.load %arg2[%c0_73, %c0_74, %c0_75] : memref<1x8x32xbf16, #tpu.memory_space<vmem>>, vector<1x8x32xbf16>
      %199 = arith.extf %198 : vector<1x8x32xbf16> to vector<1x8x32xf32>
      %c0_76 = arith.constant 0 : index
      %c0_77 = arith.constant 0 : index
      %c0_78 = arith.constant 0 : index
      %200 = vector.load %arg14[%c0_76, %c0_77, %c0_78] : memref<1x8x32xf32, #tpu.memory_space<vmem>>, vector<1x8x32xf32>
      tpu.vector_store %arg14[%c0_76, %c0_77, %c0_78], %199 {strides = array<i32>} : memref<1x8x32xf32, #tpu.memory_space<vmem>>, vector<1x8x32xf32>,
    } else {
    }
    %c0 = arith.constant 0 : index
    %c0_1 = arith.constant 0 : index
    %c0_2 = arith.constant 0 : index
    %3 = vector.load %arg14[%c0, %c0_1, %c0_2] : memref<1x8x32xf32, #tpu.memory_space<vmem>>, vector<1x8x32xf32>
    %4 = arith.truncf %3 : vector<1x8x32xf32> to vector<1x8x32xbf16>
    %c0_3 = arith.constant 0 : index
    %c0_4 = arith.constant 0 : index
    %c0_5 = arith.constant 0 : index
    %c0_6 = arith.constant 0 : index
    %5 = vector.load %arg12[%c0_3, %c0_4, %c0_5, %c0_6] : memref<1x1x8x32xbf16, #tpu.memory_space<vmem>>, vector<1x1x8x32xbf16>
    %6 = vector.shape_cast %5 : vector<1x1x8x32xbf16> to vector<1x8x32xbf16>
    %7 = vector.shape_cast %4 : vector<1x8x32xbf16> to vector<1x1x8x32xbf16>
    tpu.vector_store %arg12[%c0_3, %c0_4, %c0_5, %c0_6], %7 {strides = array<i32>} : memref<1x1x8x32xbf16, #tpu.memory_space<vmem>>, vector<1x1x8x32xbf16>,
    %8 = vector.shape_cast %3 : vector<1x8x32xf32> to vector<8x32xf32>
    %c0_7 = arith.constant 0 : index
    %c0_8 = arith.constant 0 : index
    %c0_9 = arith.constant 0 : index
    %9 = vector.load %arg4[%c0_7, %c0_8, %c0_9] : memref<1x2x32xf32, #tpu.memory_space<vmem>>, vector<1x2x32xf32>
    %10 = vector.shape_cast %9 : vector<1x2x32xf32> to vector<2x32xf32>
    %c0_10 = arith.constant 0 : index
    %c0_11 = arith.constant 0 : index
    %c0_12 = arith.constant 0 : index
    %11 = vector.load %arg5[%c0_10, %c0_11, %c0_12] : memref<1x2x32xf32, #tpu.memory_space<vmem>>, vector<1x2x32xf32>
    %12 = vector.shape_cast %11 : vector<1x2x32xf32> to vector<2x32xf32>
    %13 = tpu.iota {dimensions = array<i32: 0>} : vector<8x8xi32>
    %14 = tpu.iota {dimensions = array<i32: 1>} : vector<8x8xi32>
    %15 = arith.cmpi sle, %14, %13 : vector<8x8xi32>
    %cst = arith.constant 0.000000e+00 : f32
    %cst_13 = arith.constant -1.000000e+09 : f32
    %16 = vector.broadcast %cst : f32 to vector<8x8xf32>
    %17 = vector.broadcast %cst_13 : f32 to vector<8x8xf32>
    %18 = arith.select %15, %16, %17 : vector<8x8xi1>, vector<8x8xf32>
    %19 = vector.extract_strided_slice %10 {offsets = [0, 0], sizes = [1, 32], strides = [1, 1]} : vector<2x32xf32> to vector<1x32xf32>
    %20 = vector.extract_strided_slice %12 {offsets = [0, 0], sizes = [1, 32], strides = [1, 1]} : vector<2x32xf32> to vector<1x32xf32>
    %cst_14 = arith.constant dense<0.000000e+00> : vector<8xf32>
    %21 = vector.multi_reduction <add>, %8, %cst_14 [1] : vector<8x32xf32> to vector<8xf32>
    %22 = vector.shape_cast %21 : vector<8xf32> to vector<8x1xf32>
    %cst_15 = arith.constant 3.200000e+01 : f32
    %23 = vector.broadcast %cst_15 : f32 to vector<8x1xf32>
    %24 = arith.divf %22, %23 : vector<8x1xf32>
    %25 = arith.mulf %8, %8 : vector<8x32xf32>
    %cst_16 = arith.constant dense<0.000000e+00> : vector<8xf32>
    %26 = vector.multi_reduction <add>, %25, %cst_16 [1] : vector<8x32xf32> to vector<8xf32>
    %27 = vector.shape_cast %26 : vector<8xf32> to vector<8x1xf32>
    %cst_17 = arith.constant 3.200000e+01 : f32
    %28 = vector.broadcast %cst_17 : f32 to vector<8x1xf32>
    %29 = arith.divf %27, %28 : vector<8x1xf32>
    %30 = arith.mulf %24, %24 : vector<8x1xf32>
    %31 = arith.subf %29, %30 : vector<8x1xf32>
    %cst_18 = arith.constant 0.000000e+00 : f32
    %32 = vector.broadcast %cst_18 : f32 to vector<8x1xf32>
    %33 = arith.maximumf %31, %32 : vector<8x1xf32>
    %34 = vector.broadcast %24 : vector<8x1xf32> to vector<8x32xf32>
    %35 = arith.subf %8, %34 : vector<8x32xf32>
    %cst_19 = arith.constant 9.99999993E-9 : f32
    %36 = vector.broadcast %cst_19 : f32 to vector<8x1xf32>
    %37 = arith.addf %33, %36 : vector<8x1xf32>
    %38 = math.rsqrt %37 : vector<8x1xf32>
    %39 = vector.broadcast %38 : vector<8x1xf32> to vector<8x32xf32>
    %40 = arith.mulf %35, %39 : vector<8x32xf32>
    %41 = vector.broadcast %19 : vector<1x32xf32> to vector<8x32xf32>
    %42 = arith.mulf %40, %41 : vector<8x32xf32>
    %43 = vector.broadcast %20 : vector<1x32xf32> to vector<8x32xf32>
    %44 = arith.addf %42, %43 : vector<8x32xf32>
    %c0_20 = arith.constant 0 : index
    %c0_21 = arith.constant 0 : index
    %c0_22 = arith.constant 0 : index
    %c0_23 = arith.constant 0 : index
    %45 = vector.load %arg6[%c0_20, %c0_21, %c0_22, %c0_23] : memref<1x6x32x16xbf16, #tpu.memory_space<vmem>>, vector<1x6x32x16xbf16>
    %46 = vector.shape_cast %45 : vector<1x6x32x16xbf16> to vector<6x32x16xbf16>
    %c0_24 = arith.constant 0 : index
    %c0_25 = arith.constant 0 : index
    %c0_26 = arith.constant 0 : index
    %47 = vector.load %arg7[%c0_24, %c0_25, %c0_26] : memref<1x6x16xf32, #tpu.memory_space<vmem>>, vector<1x6x16xf32>
    %48 = vector.shape_cast %47 : vector<1x6x16xf32> to vector<6x16xf32>
    %c0_27 = arith.constant 0 : index
    %c0_28 = arith.constant 0 : index
    %c0_29 = arith.constant 0 : index
    %49 = vector.load %arg8[%c0_27, %c0_28, %c0_29] : memref<1x32x32xbf16, #tpu.memory_space<vmem>>, vector<1x32x32xbf16>
    %50 = vector.shape_cast %49 : vector<1x32x32xbf16> to vector<32x32xbf16>
    %c0_30 = arith.constant 0 : index
    %c0_31 = arith.constant 0 : index
    %c0_32 = arith.constant 0 : index
    %51 = vector.load %arg9[%c0_30, %c0_31, %c0_32] : memref<1x1x32xf32, #tpu.memory_space<vmem>>, vector<1x1x32xf32>
    %52 = vector.shape_cast %51 : vector<1x1x32xf32> to vector<1x32xf32>
    %53 = arith.truncf %44 : vector<8x32xf32> to vector<8x32xbf16>
    %54 = arith.truncf %8 : vector<8x32xf32> to vector<8x32xbf16>
    %55 = vector.extract_strided_slice %46 {offsets = [0, 0, 0], sizes = [1, 32, 16], strides = [1, 1, 1]} : vector<6x32x16xbf16> to vector<1x32x16xbf16>
    %56 = vector.shape_cast %55 : vector<1x32x16xbf16> to vector<32x16xbf16>
    %cst_33 = arith.constant dense<0.000000e+00> : vector<8x16xf32>
    %57 = tpu.matmul %53, %56, %cst_33 {dimension_numbers = #tpu.dot_dimension_numbers<[1], [0], [0], [1], [0, 0, 1, 1], [], []>} : vector<8x32xbf16>, vector<32x16xbf16>, vector<8x16xf32> -> vector<8x16xf32>
    %58 = vector.extract_strided_slice %48 {offsets = [0, 0], sizes = [1, 16], strides = [1, 1]} : vector<6x16xf32> to vector<1x16xf32>
    %59 = vector.broadcast %58 : vector<1x16xf32> to vector<8x16xf32>
    %60 = arith.addf %57, %59 : vector<8x16xf32>
    %61 = vector.shape_cast %60 : vector<8x16xf32> to vector<1x8x16xf32>
    %62 = vector.extract_strided_slice %46 {offsets = [2, 0, 0], sizes = [1, 32, 16], strides = [1, 1, 1]} : vector<6x32x16xbf16> to vector<1x32x16xbf16>
    %63 = vector.shape_cast %62 : vector<1x32x16xbf16> to vector<32x16xbf16>
    %cst_34 = arith.constant dense<0.000000e+00> : vector<8x16xf32>
    %64 = tpu.matmul %54, %63, %cst_34 {dimension_numbers = #tpu.dot_dimension_numbers<[1], [0], [0], [1], [0, 0, 1, 1], [], []>} : vector<8x32xbf16>, vector<32x16xbf16>, vector<8x16xf32> -> vector<8x16xf32>
    %65 = vector.extract_strided_slice %48 {offsets = [2, 0], sizes = [1, 16], strides = [1, 1]} : vector<6x16xf32> to vector<1x16xf32>
    %66 = vector.broadcast %65 : vector<1x16xf32> to vector<8x16xf32>
    %67 = arith.addf %64, %66 : vector<8x16xf32>
    %68 = vector.shape_cast %67 : vector<8x16xf32> to vector<1x8x16xf32>
    %69 = vector.extract_strided_slice %46 {offsets = [4, 0, 0], sizes = [1, 32, 16], strides = [1, 1, 1]} : vector<6x32x16xbf16> to vector<1x32x16xbf16>
    %70 = vector.shape_cast %69 : vector<1x32x16xbf16> to vector<32x16xbf16>
    %cst_35 = arith.constant dense<0.000000e+00> : vector<8x16xf32>
    %71 = tpu.matmul %54, %70, %cst_35 {dimension_numbers = #tpu.dot_dimension_numbers<[1], [0], [0], [1], [0, 0, 1, 1], [], []>} : vector<8x32xbf16>, vector<32x16xbf16>, vector<8x16xf32> -> vector<8x16xf32>
    %72 = vector.extract_strided_slice %48 {offsets = [4, 0], sizes = [1, 16], strides = [1, 1]} : vector<6x16xf32> to vector<1x16xf32>
    %73 = vector.broadcast %72 : vector<1x16xf32> to vector<8x16xf32>
    %74 = arith.addf %71, %73 : vector<8x16xf32>
    %75 = vector.shape_cast %74 : vector<8x16xf32> to vector<1x8x16xf32>
    %76 = arith.truncf %61 : vector<1x8x16xf32> to vector<1x8x16xbf16>
    %77 = arith.truncf %68 : vector<1x8x16xf32> to vector<1x8x16xbf16>
    "tpu.trace_start"() <{level = 10 : i32, message = "bqd,bkd->bqk"}> : () -> ()
    %cst_36 = arith.constant dense<0.000000e+00> : vector<1x8x8xf32>
    %78 = tpu.matmul %76, %77, %cst_36 {dimension_numbers = #tpu.dot_dimension_numbers<[2], [2], [1], [1], [0, 0, 0, 1, 1, 1], [0], [0]>} : vector<1x8x16xbf16>, vector<1x8x16xbf16>, vector<1x8x8xf32> -> vector<1x8x8xf32>
    "tpu.trace_stop"() : () -> ()
    %cst_37 = arith.constant 2.500000e-01 : f32
    %79 = vector.broadcast %cst_37 : f32 to vector<1x8x8xf32>
    %80 = arith.mulf %78, %79 : vector<1x8x8xf32>
    %81 = vector.shape_cast %18 : vector<8x8xf32> to vector<1x8x8xf32>
    %82 = arith.addf %80, %81 : vector<1x8x8xf32>
    %cst_38 = arith.constant dense<0xFF800000> : vector<1x8xf32>
    %83 = vector.multi_reduction <maximumf>, %82, %cst_38 [2] : vector<1x8x8xf32> to vector<1x8xf32>
    %84 = vector.shape_cast %83 : vector<1x8xf32> to vector<1x8x1xf32>
    %85 = vector.broadcast %84 : vector<1x8x1xf32> to vector<1x8x8xf32>
    %86 = arith.subf %82, %85 : vector<1x8x8xf32>
    %87 = math.exp %86 : vector<1x8x8xf32>
    %cst_39 = arith.constant dense<0.000000e+00> : vector<1x8xf32>
    %88 = vector.multi_reduction <add>, %87, %cst_39 [2] : vector<1x8x8xf32> to vector<1x8xf32>
    %89 = vector.shape_cast %88 : vector<1x8xf32> to vector<1x8x1xf32>
    %90 = vector.broadcast %89 : vector<1x8x1xf32> to vector<1x8x8xf32>
    %91 = arith.divf %87, %90 : vector<1x8x8xf32>
    %92 = arith.truncf %91 : vector<1x8x8xf32> to vector<1x8x8xbf16>
    %93 = arith.truncf %75 : vector<1x8x16xf32> to vector<1x8x16xbf16>
    "tpu.trace_start"() <{level = 10 : i32, message = "bqk,bkd->bqd"}> : () -> ()
    %cst_40 = arith.constant dense<0.000000e+00> : vector<1x8x16xf32>
    %94 = tpu.matmul %92, %93, %cst_40 {dimension_numbers = #tpu.dot_dimension_numbers<[2], [1], [1], [2], [0, 0, 0, 1, 1, 2], [0], [0]>} : vector<1x8x8xbf16>, vector<1x8x16xbf16>, vector<1x8x16xf32> -> vector<1x8x16xf32>
    "tpu.trace_stop"() : () -> ()
    %95 = vector.shape_cast %94 : vector<1x8x16xf32> to vector<8x16xf32>
    %96 = vector.extract_strided_slice %46 {offsets = [1, 0, 0], sizes = [1, 32, 16], strides = [1, 1, 1]} : vector<6x32x16xbf16> to vector<1x32x16xbf16>
    %97 = vector.shape_cast %96 : vector<1x32x16xbf16> to vector<32x16xbf16>
    %cst_41 = arith.constant dense<0.000000e+00> : vector<8x16xf32>
    %98 = tpu.matmul %53, %97, %cst_41 {dimension_numbers = #tpu.dot_dimension_numbers<[1], [0], [0], [1], [0, 0, 1, 1], [], []>} : vector<8x32xbf16>, vector<32x16xbf16>, vector<8x16xf32> -> vector<8x16xf32>
    %99 = vector.extract_strided_slice %48 {offsets = [1, 0], sizes = [1, 16], strides = [1, 1]} : vector<6x16xf32> to vector<1x16xf32>
    %100 = vector.broadcast %99 : vector<1x16xf32> to vector<8x16xf32>
    %101 = arith.addf %98, %100 : vector<8x16xf32>
    %102 = vector.shape_cast %101 : vector<8x16xf32> to vector<1x8x16xf32>
    %103 = vector.extract_strided_slice %46 {offsets = [3, 0, 0], sizes = [1, 32, 16], strides = [1, 1, 1]} : vector<6x32x16xbf16> to vector<1x32x16xbf16>
    %104 = vector.shape_cast %103 : vector<1x32x16xbf16> to vector<32x16xbf16>
    %cst_42 = arith.constant dense<0.000000e+00> : vector<8x16xf32>
    %105 = tpu.matmul %54, %104, %cst_42 {dimension_numbers = #tpu.dot_dimension_numbers<[1], [0], [0], [1], [0, 0, 1, 1], [], []>} : vector<8x32xbf16>, vector<32x16xbf16>, vector<8x16xf32> -> vector<8x16xf32>
    %106 = vector.extract_strided_slice %48 {offsets = [3, 0], sizes = [1, 16], strides = [1, 1]} : vector<6x16xf32> to vector<1x16xf32>
    %107 = vector.broadcast %106 : vector<1x16xf32> to vector<8x16xf32>
    %108 = arith.addf %105, %107 : vector<8x16xf32>
    %109 = vector.shape_cast %108 : vector<8x16xf32> to vector<1x8x16xf32>
    %110 = vector.extract_strided_slice %46 {offsets = [5, 0, 0], sizes = [1, 32, 16], strides = [1, 1, 1]} : vector<6x32x16xbf16> to vector<1x32x16xbf16>
    %111 = vector.shape_cast %110 : vector<1x32x16xbf16> to vector<32x16xbf16>
    %cst_43 = arith.constant dense<0.000000e+00> : vector<8x16xf32>
    %112 = tpu.matmul %54, %111, %cst_43 {dimension_numbers = #tpu.dot_dimension_numbers<[1], [0], [0], [1], [0, 0, 1, 1], [], []>} : vector<8x32xbf16>, vector<32x16xbf16>, vector<8x16xf32> -> vector<8x16xf32>
    %113 = vector.extract_strided_slice %48 {offsets = [5, 0], sizes = [1, 16], strides = [1, 1]} : vector<6x16xf32> to vector<1x16xf32>
    %114 = vector.broadcast %113 : vector<1x16xf32> to vector<8x16xf32>
    %115 = arith.addf %112, %114 : vector<8x16xf32>
    %116 = vector.shape_cast %115 : vector<8x16xf32> to vector<1x8x16xf32>
    %117 = arith.truncf %102 : vector<1x8x16xf32> to vector<1x8x16xbf16>
    %118 = arith.truncf %109 : vector<1x8x16xf32> to vector<1x8x16xbf16>
    "tpu.trace_start"() <{level = 10 : i32, message = "bqd,bkd->bqk"}> : () -> ()
    %cst_44 = arith.constant dense<0.000000e+00> : vector<1x8x8xf32>
    %119 = tpu.matmul %117, %118, %cst_44 {dimension_numbers = #tpu.dot_dimension_numbers<[2], [2], [1], [1], [0, 0, 0, 1, 1, 1], [0], [0]>} : vector<1x8x16xbf16>, vector<1x8x16xbf16>, vector<1x8x8xf32> -> vector<1x8x8xf32>
    "tpu.trace_stop"() : () -> ()
    %cst_45 = arith.constant 2.500000e-01 : f32
    %120 = vector.broadcast %cst_45 : f32 to vector<1x8x8xf32>
    %121 = arith.mulf %119, %120 : vector<1x8x8xf32>
    %122 = vector.shape_cast %18 : vector<8x8xf32> to vector<1x8x8xf32>
    %123 = arith.addf %121, %122 : vector<1x8x8xf32>
    %cst_46 = arith.constant dense<0xFF800000> : vector<1x8xf32>
    %124 = vector.multi_reduction <maximumf>, %123, %cst_46 [2] : vector<1x8x8xf32> to vector<1x8xf32>
    %125 = vector.shape_cast %124 : vector<1x8xf32> to vector<1x8x1xf32>
    %126 = vector.broadcast %125 : vector<1x8x1xf32> to vector<1x8x8xf32>
    %127 = arith.subf %123, %126 : vector<1x8x8xf32>
    %128 = math.exp %127 : vector<1x8x8xf32>
    %cst_47 = arith.constant dense<0.000000e+00> : vector<1x8xf32>
    %129 = vector.multi_reduction <add>, %128, %cst_47 [2] : vector<1x8x8xf32> to vector<1x8xf32>
    %130 = vector.shape_cast %129 : vector<1x8xf32> to vector<1x8x1xf32>
    %131 = vector.broadcast %130 : vector<1x8x1xf32> to vector<1x8x8xf32>
    %132 = arith.divf %128, %131 : vector<1x8x8xf32>
    %133 = arith.truncf %132 : vector<1x8x8xf32> to vector<1x8x8xbf16>
    %134 = arith.truncf %116 : vector<1x8x16xf32> to vector<1x8x16xbf16>
    "tpu.trace_start"() <{level = 10 : i32, message = "bqk,bkd->bqd"}> : () -> ()
    %cst_48 = arith.constant dense<0.000000e+00> : vector<1x8x16xf32>
    %135 = tpu.matmul %133, %134, %cst_48 {dimension_numbers = #tpu.dot_dimension_numbers<[2], [1], [1], [2], [0, 0, 0, 1, 1, 2], [0], [0]>} : vector<1x8x8xbf16>, vector<1x8x16xbf16>, vector<1x8x16xf32> -> vector<1x8x16xf32>
    "tpu.trace_stop"() : () -> ()
    %136 = vector.shape_cast %135 : vector<1x8x16xf32> to vector<8x16xf32>
    %137 = tpu.concatenate %95, %136 in 1 : vector<8x16xf32>, vector<8x16xf32> -> vector<8x32xf32>
    %138 = arith.truncf %137 : vector<8x32xf32> to vector<8x32xbf16>
    %cst_49 = arith.constant dense<0.000000e+00> : vector<8x32xf32>
    %139 = tpu.matmul %138, %50, %cst_49 {dimension_numbers = #tpu.dot_dimension_numbers<[1], [0], [0], [1], [0, 0, 1, 1], [], []>} : vector<8x32xbf16>, vector<32x32xbf16>, vector<8x32xf32> -> vector<8x32xf32>
    %140 = vector.broadcast %52 : vector<1x32xf32> to vector<8x32xf32>
    %141 = arith.addf %139, %140 : vector<8x32xf32>
    %142 = arith.addf %44, %141 : vector<8x32xf32>
    %143 = vector.extract_strided_slice %10 {offsets = [1, 0], sizes = [1, 32], strides = [1, 1]} : vector<2x32xf32> to vector<1x32xf32>
    %144 = vector.extract_strided_slice %12 {offsets = [1, 0], sizes = [1, 32], strides = [1, 1]} : vector<2x32xf32> to vector<1x32xf32>
    %cst_50 = arith.constant dense<0.000000e+00> : vector<8xf32>
    %145 = vector.multi_reduction <add>, %142, %cst_50 [1] : vector<8x32xf32> to vector<8xf32>
    %146 = vector.shape_cast %145 : vector<8xf32> to vector<8x1xf32>
    %cst_51 = arith.constant 3.200000e+01 : f32
    %147 = vector.broadcast %cst_51 : f32 to vector<8x1xf32>
    %148 = arith.divf %146, %147 : vector<8x1xf32>
    %149 = arith.mulf %142, %142 : vector<8x32xf32>
    %cst_52 = arith.constant dense<0.000000e+00> : vector<8xf32>
    %150 = vector.multi_reduction <add>, %149, %cst_52 [1] : vector<8x32xf32> to vector<8xf32>
    %151 = vector.shape_cast %150 : vector<8xf32> to vector<8x1xf32>
    %cst_53 = arith.constant 3.200000e+01 : f32
    %152 = vector.broadcast %cst_53 : f32 to vector<8x1xf32>
    %153 = arith.divf %151, %152 : vector<8x1xf32>
    %154 = arith.mulf %148, %148 : vector<8x1xf32>
    %155 = arith.subf %153, %154 : vector<8x1xf32>
    %cst_54 = arith.constant 0.000000e+00 : f32
    %156 = vector.broadcast %cst_54 : f32 to vector<8x1xf32>
    %157 = arith.maximumf %155, %156 : vector<8x1xf32>
    %158 = vector.broadcast %148 : vector<8x1xf32> to vector<8x32xf32>
    %159 = arith.subf %142, %158 : vector<8x32xf32>
    %cst_55 = arith.constant 9.99999993E-9 : f32
    %160 = vector.broadcast %cst_55 : f32 to vector<8x1xf32>
    %161 = arith.addf %157, %160 : vector<8x1xf32>
    %162 = math.rsqrt %161 : vector<8x1xf32>
    %163 = vector.broadcast %162 : vector<8x1xf32> to vector<8x32xf32>
    %164 = arith.mulf %159, %163 : vector<8x32xf32>
    %165 = vector.broadcast %143 : vector<1x32xf32> to vector<8x32xf32>
    %166 = arith.mulf %164, %165 : vector<8x32xf32>
    %167 = vector.broadcast %144 : vector<1x32xf32> to vector<8x32xf32>
    %168 = arith.addf %166, %167 : vector<8x32xf32>
    %c0_56 = arith.constant 0 : index
    %c0_57 = arith.constant 0 : index
    %c0_58 = arith.constant 0 : index
    %c0_59 = arith.constant 0 : index
    %169 = vector.load %arg10[%c0_56, %c0_57, %c0_58, %c0_59] : memref<1x2x32x32xbf16, #tpu.memory_space<vmem>>, vector<1x2x32x32xbf16>
    %170 = vector.shape_cast %169 : vector<1x2x32x32xbf16> to vector<2x32x32xbf16>
    %c0_60 = arith.constant 0 : index
    %c0_61 = arith.constant 0 : index
    %c0_62 = arith.constant 0 : index
    %171 = vector.load %arg11[%c0_60, %c0_61, %c0_62] : memref<1x2x32xf32, #tpu.memory_space<vmem>>, vector<1x2x32xf32>
    %172 = vector.shape_cast %171 : vector<1x2x32xf32> to vector<2x32xf32>
    %173 = arith.truncf %168 : vector<8x32xf32> to vector<8x32xbf16>
    %174 = vector.extract_strided_slice %170 {offsets = [0, 0, 0], sizes = [1, 32, 32], strides = [1, 1, 1]} : vector<2x32x32xbf16> to vector<1x32x32xbf16>
    %175 = vector.shape_cast %174 : vector<1x32x32xbf16> to vector<32x32xbf16>
    %cst_63 = arith.constant dense<0.000000e+00> : vector<8x32xf32>
    %176 = tpu.matmul %173, %175, %cst_63 {dimension_numbers = #tpu.dot_dimension_numbers<[1], [0], [0], [1], [0, 0, 1, 1], [], []>} : vector<8x32xbf16>, vector<32x32xbf16>, vector<8x32xf32> -> vector<8x32xf32>
    %177 = vector.extract_strided_slice %172 {offsets = [0, 0], sizes = [1, 32], strides = [1, 1]} : vector<2x32xf32> to vector<1x32xf32>
    %178 = vector.broadcast %177 : vector<1x32xf32> to vector<8x32xf32>
    %179 = arith.addf %176, %178 : vector<8x32xf32>
    %cst_64 = arith.constant 0.000000e+00 : f32
    %180 = vector.broadcast %cst_64 : f32 to vector<8x32xf32>
    %181 = arith.maximumf %179, %180 : vector<8x32xf32>
    %182 = arith.truncf %181 : vector<8x32xf32> to vector<8x32xbf16>
    %183 = vector.extract_strided_slice %170 {offsets = [1, 0, 0], sizes = [1, 32, 32], strides = [1, 1, 1]} : vector<2x32x32xbf16> to vector<1x32x32xbf16>
    %184 = vector.shape_cast %183 : vector<1x32x32xbf16> to vector<32x32xbf16>
    %cst_65 = arith.constant dense<0.000000e+00> : vector<8x32xf32>
    %185 = tpu.matmul %182, %184, %cst_65 {dimension_numbers = #tpu.dot_dimension_numbers<[1], [0], [0], [1], [0, 0, 1, 1], [], []>} : vector<8x32xbf16>, vector<32x32xbf16>, vector<8x32xf32> -> vector<8x32xf32>
    %186 = vector.extract_strided_slice %172 {offsets = [1, 0], sizes = [1, 32], strides = [1, 1]} : vector<2x32xf32> to vector<1x32xf32>
    %187 = vector.broadcast %186 : vector<1x32xf32> to vector<8x32xf32>
    %188 = arith.addf %185, %187 : vector<8x32xf32>
    %189 = arith.addf %188, %168 : vector<8x32xf32>
    %190 = vector.shape_cast %189 : vector<8x32xf32> to vector<1x8x32xf32>
    %c0_66 = arith.constant 0 : index
    %c0_67 = arith.constant 0 : index
    %c0_68 = arith.constant 0 : index
    %191 = vector.load %arg3[%c0_66, %c0_67, %c0_68] : memref<1x8x1xf32, #tpu.memory_space<vmem>>, vector<1x8x1xf32>
    %192 = vector.broadcast %191 : vector<1x8x1xf32> to vector<1x8x32xf32>
    %193 = arith.mulf %190, %192 : vector<1x8x32xf32>
    %c0_69 = arith.constant 0 : index
    %c0_70 = arith.constant 0 : index
    %c0_71 = arith.constant 0 : index
    %194 = vector.load %arg14[%c0_69, %c0_70, %c0_71] : memref<1x8x32xf32, #tpu.memory_space<vmem>>, vector<1x8x32xf32>
    tpu.vector_store %arg14[%c0_69, %c0_70, %c0_71], %193 {strides = array<i32>} : memref<1x8x32xf32, #tpu.memory_space<vmem>>, vector<1x8x32xf32>,
    %c1_i32 = arith.constant 1 : i32
    %195 = arith.cmpi eq, %arg1, %c1_i32 : i32
    %196 = arith.extui %195 : i1 to i32
    %c0_i32_72 = arith.constant 0 : i32
    %197 = arith.cmpi ne, %196, %c0_i32_72 : i32
    scf.if %197 {
      %198 = arith.truncf %193 : vector<1x8x32xf32> to vector<1x8x32xbf16>
      %c0_73 = arith.constant 0 : index
      %c0_74 = arith.constant 0 : index
      %c0_75 = arith.constant 0 : index
      %199 = vector.load %arg13[%c0_73, %c0_74, %c0_75] : memref<1x8x32xbf16, #tpu.memory_space<vmem>>, vector<1x8x32xbf16>
      tpu.vector_store %arg13[%c0_73, %c0_74, %c0_75], %198 {strides = array<i32>} : memref<1x8x32xbf16, #tpu.memory_space<vmem>>, vector<1x8x32xbf16>,
    } else {
    }
    return
  }
  func.func @transform_0(%arg0: i32, %arg1: i32) -> (i32, i32, i32) {
    %c0_i32 = arith.constant 0 : i32
    %c0_i32_0 = arith.constant 0 : i32
    %c0_i32_1 = arith.constant 0 : i32
    return %arg0, %c0_i32, %c0_i32_0 : i32, i32, i32
  }
  func.func @transform_1(%arg0: i32, %arg1: i32) -> (i32, i32, i32) {
    %c0_i32 = arith.constant 0 : i32
    %c0_i32_0 = arith.constant 0 : i32
    %c0_i32_1 = arith.constant 0 : i32
    return %arg0, %c0_i32, %c0_i32_0 : i32, i32, i32
  }
  func.func @transform_2(%arg0: i32, %arg1: i32) -> (i32, i32, i32) {
    %c0_i32 = arith.constant 0 : i32
    %c0_i32_0 = arith.constant 0 : i32
    %c0_i32_1 = arith.constant 0 : i32
    return %arg1, %c0_i32, %c0_i32_0 : i32, i32, i32
  }
  func.func @transform_3(%arg0: i32, %arg1: i32) -> (i32, i32, i32) {
    %c0_i32 = arith.constant 0 : i32
    %c0_i32_0 = arith.constant 0 : i32
    %c0_i32_1 = arith.constant 0 : i32
    return %arg1, %c0_i32, %c0_i32_0 : i32, i32, i32
  }
  func.func @transform_4(%arg0: i32, %arg1: i32) -> (i32, i32, i32, i32) {
    %c0_i32 = arith.constant 0 : i32
    %c0_i32_0 = arith.constant 0 : i32
    %c0_i32_1 = arith.constant 0 : i32
    %c0_i32_2 = arith.constant 0 : i32
    return %arg1, %c0_i32, %c0_i32_0, %c0_i32_1 : i32, i32, i32, i32
  }
  func.func @transform_5(%arg0: i32, %arg1: i32) -> (i32, i32, i32) {
    %c0_i32 = arith.constant 0 : i32
    %c0_i32_0 = arith.constant 0 : i32
    %c0_i32_1 = arith.constant 0 : i32
    return %arg1, %c0_i32, %c0_i32_0 : i32, i32, i32
  }
  func.func @transform_6(%arg0: i32, %arg1: i32) -> (i32, i32, i32) {
    %c0_i32 = arith.constant 0 : i32
    %c0_i32_0 = arith.constant 0 : i32
    %c0_i32_1 = arith.constant 0 : i32
    return %arg1, %c0_i32, %c0_i32_0 : i32, i32, i32
  }
  func.func @transform_7(%arg0: i32, %arg1: i32) -> (i32, i32, i32) {
    %c0_i32 = arith.constant 0 : i32
    %c0_i32_0 = arith.constant 0 : i32
    %c0_i32_1 = arith.constant 0 : i32
    return %arg1, %c0_i32, %c0_i32_0 : i32, i32, i32
  }
  func.func @transform_8(%arg0: i32, %arg1: i32) -> (i32, i32, i32, i32) {
    %c0_i32 = arith.constant 0 : i32
    %c0_i32_0 = arith.constant 0 : i32
    %c0_i32_1 = arith.constant 0 : i32
    %c0_i32_2 = arith.constant 0 : i32
    return %arg1, %c0_i32, %c0_i32_0, %c0_i32_1 : i32, i32, i32, i32
  }
  func.func @transform_9(%arg0: i32, %arg1: i32) -> (i32, i32, i32) {
    %c0_i32 = arith.constant 0 : i32
    %c0_i32_0 = arith.constant 0 : i32
    %c0_i32_1 = arith.constant 0 : i32
    return %arg1, %c0_i32, %c0_i32_0 : i32, i32, i32
  }
  func.func @transform_10(%arg0: i32, %arg1: i32) -> (i32, i32, i32, i32) {
    %c0_i32 = arith.constant 0 : i32
    %c0_i32_0 = arith.constant 0 : i32
    %c0_i32_1 = arith.constant 0 : i32
    return %arg1, %arg0, %c0_i32, %c0_i32_0 : i32, i32, i32, i32
  }
  func.func @transform_11(%arg0: i32, %arg1: i32) -> (i32, i32, i32) {
    %c0_i32 = arith.constant 0 : i32
    %c0_i32_0 = arith.constant 0 : i32
    %c0_i32_1 = arith.constant 0 : i32
    return %arg0, %c0_i32, %c0_i32_0 : i32, i32, i32
  }
}

module attributes {stable_mosaic.version = 11 : i64} {
  func.func @dec_stack_kernel(%arg0: i32, %arg1: i32, %arg2: memref<1x8x32xbf16, #tpu.memory_space<vmem>>, %arg3: memref<1x8x32xbf16, #tpu.memory_space<vmem>>, %arg4: memref<1x8x1xf32, #tpu.memory_space<vmem>>, %arg5: memref<1x3x32xf32, #tpu.memory_space<vmem>>, %arg6: memref<1x3x32xf32, #tpu.memory_space<vmem>>, %arg7: memref<1x6x32x16xbf16, #tpu.memory_space<vmem>>, %arg8: memref<1x6x16xf32, #tpu.memory_space<vmem>>, %arg9: memref<1x32x32xbf16, #tpu.memory_space<vmem>>, %arg10: memref<1x1x32xf32, #tpu.memory_space<vmem>>, %arg11: memref<1x6x32x16xbf16, #tpu.memory_space<vmem>>, %arg12: memref<1x6x16xf32, #tpu.memory_space<vmem>>, %arg13: memref<1x32x32xbf16, #tpu.memory_space<vmem>>, %arg14: memref<1x1x32xf32, #tpu.memory_space<vmem>>, %arg15: memref<1x2x32x32xbf16, #tpu.memory_space<vmem>>, %arg16: memref<1x2x32xf32, #tpu.memory_space<vmem>>, %arg17: memref<1x1x8x32xbf16, #tpu.memory_space<vmem>>, %arg18: memref<1x8x32xf32, #tpu.memory_space<vmem>>) attributes {dimension_semantics = [#tpu.dimension_semantics<parallel>, #tpu.dimension_semantics<arbitrary>], iteration_bounds = array<i64: 2, 2>, scalar_prefetch = 0 : i64, scratch_operands = 1 : i64, tpu.core_type = #tpu.core_type<tc>, window_params = [{transform_indices = @transform_0, window_bounds = array<i64: 1, 8, 32>}, {transform_indices = @transform_1, window_bounds = array<i64: 1, 8, 32>}, {transform_indices = @transform_2, window_bounds = array<i64: 1, 8, 1>}, {transform_indices = @transform_3, window_bounds = array<i64: 1, 3, 32>}, {transform_indices = @transform_4, window_bounds = array<i64: 1, 3, 32>}, {transform_indices = @transform_5, window_bounds = array<i64: 1, 6, 32, 16>}, {transform_indices = @transform_6, window_bounds = array<i64: 1, 6, 16>}, {transform_indices = @transform_7, window_bounds = array<i64: 1, 32, 32>}, {transform_indices = @transform_8, window_bounds = array<i64: 1, 1, 32>}, {transform_indices = @transform_9, window_bounds = array<i64: 1, 6, 32, 16>}, {transform_indices = @transform_10, window_bounds = array<i64: 1, 6, 16>}, {transform_indices = @transform_11, window_bounds = array<i64: 1, 32, 32>}, {transform_indices = @transform_12, window_bounds = array<i64: 1, 1, 32>}, {transform_indices = @transform_13, window_bounds = array<i64: 1, 2, 32, 32>}, {transform_indices = @transform_14, window_bounds = array<i64: 1, 2, 32>}, {transform_indices = @transform_15, window_bounds = array<i64: 1, 1, 8, 32>}]} {
    %c0_i32 = arith.constant 0 : i32
    %0 = arith.cmpi eq, %arg1, %c0_i32 : i32
    %1 = arith.extui %0 : i1 to i32
    %c0_i32_0 = arith.constant 0 : i32
    %2 = arith.cmpi ne, %1, %c0_i32_0 : i32
    scf.if %2 {
      %c0_113 = arith.constant 0 : index
      %c0_114 = arith.constant 0 : index
      %c0_115 = arith.constant 0 : index
      %328 = vector.load %arg2[%c0_113, %c0_114, %c0_115] : memref<1x8x32xbf16, #tpu.memory_space<vmem>>, vector<1x8x32xbf16>
      %329 = arith.extf %328 : vector<1x8x32xbf16> to vector<1x8x32xf32>
      %c0_116 = arith.constant 0 : index
      %c0_117 = arith.constant 0 : index
      %c0_118 = arith.constant 0 : index
      %330 = vector.load %arg18[%c0_116, %c0_117, %c0_118] : memref<1x8x32xf32, #tpu.memory_space<vmem>>, vector<1x8x32xf32>
      tpu.vector_store %arg18[%c0_116, %c0_117, %c0_118], %329 {strides = array<i32>} : memref<1x8x32xf32, #tpu.memory_space<vmem>>, vector<1x8x32xf32>,
    } else {
    }
    %c0 = arith.constant 0 : index
    %c0_1 = arith.constant 0 : index
    %c0_2 = arith.constant 0 : index
    %3 = vector.load %arg18[%c0, %c0_1, %c0_2] : memref<1x8x32xf32, #tpu.memory_space<vmem>>, vector<1x8x32xf32>
    %4 = vector.shape_cast %3 : vector<1x8x32xf32> to vector<8x32xf32>
    %c0_3 = arith.constant 0 : index
    %c0_4 = arith.constant 0 : index
    %c0_5 = arith.constant 0 : index
    %5 = vector.load %arg3[%c0_3, %c0_4, %c0_5] : memref<1x8x32xbf16, #tpu.memory_space<vmem>>, vector<1x8x32xbf16>
    %6 = arith.extf %5 : vector<1x8x32xbf16> to vector<1x8x32xf32>
    %7 = vector.shape_cast %6 : vector<1x8x32xf32> to vector<8x32xf32>
    %c0_6 = arith.constant 0 : index
    %c0_7 = arith.constant 0 : index
    %c0_8 = arith.constant 0 : index
    %8 = vector.load %arg5[%c0_6, %c0_7, %c0_8] : memref<1x3x32xf32, #tpu.memory_space<vmem>>, vector<1x3x32xf32>
    %9 = vector.shape_cast %8 : vector<1x3x32xf32> to vector<3x32xf32>
    %c0_9 = arith.constant 0 : index
    %c0_10 = arith.constant 0 : index
    %c0_11 = arith.constant 0 : index
    %10 = vector.load %arg6[%c0_9, %c0_10, %c0_11] : memref<1x3x32xf32, #tpu.memory_space<vmem>>, vector<1x3x32xf32>
    %11 = vector.shape_cast %10 : vector<1x3x32xf32> to vector<3x32xf32>
    %12 = tpu.iota {dimensions = array<i32: 0>} : vector<8x8xi32>
    %13 = tpu.iota {dimensions = array<i32: 1>} : vector<8x8xi32>
    %14 = arith.cmpi sle, %13, %12 : vector<8x8xi32>
    %cst = arith.constant 0.000000e+00 : f32
    %cst_12 = arith.constant -1.000000e+09 : f32
    %15 = vector.broadcast %cst : f32 to vector<8x8xf32>
    %16 = vector.broadcast %cst_12 : f32 to vector<8x8xf32>
    %17 = arith.select %14, %15, %16 : vector<8x8xi1>, vector<8x8xf32>
    %18 = tpu.iota {dimensions = array<i32: 0>} : vector<8x8xi32>
    %19 = tpu.iota {dimensions = array<i32: 1>} : vector<8x8xi32>
    %20 = arith.cmpi sle, %19, %18 : vector<8x8xi32>
    %cst_13 = arith.constant 0.000000e+00 : f32
    %cst_14 = arith.constant -1.000000e+09 : f32
    %21 = vector.broadcast %cst_13 : f32 to vector<8x8xf32>
    %22 = vector.broadcast %cst_14 : f32 to vector<8x8xf32>
    %23 = arith.select %20, %21, %22 : vector<8x8xi1>, vector<8x8xf32>
    %24 = vector.extract_strided_slice %9 {offsets = [0, 0], sizes = [1, 32], strides = [1, 1]} : vector<3x32xf32> to vector<1x32xf32>
    %25 = vector.extract_strided_slice %11 {offsets = [0, 0], sizes = [1, 32], strides = [1, 1]} : vector<3x32xf32> to vector<1x32xf32>
    %cst_15 = arith.constant dense<0.000000e+00> : vector<8xf32>
    %26 = vector.multi_reduction <add>, %4, %cst_15 [1] : vector<8x32xf32> to vector<8xf32>
    %27 = vector.shape_cast %26 : vector<8xf32> to vector<8x1xf32>
    %cst_16 = arith.constant 3.200000e+01 : f32
    %28 = vector.broadcast %cst_16 : f32 to vector<8x1xf32>
    %29 = arith.divf %27, %28 : vector<8x1xf32>
    %30 = arith.mulf %4, %4 : vector<8x32xf32>
    %cst_17 = arith.constant dense<0.000000e+00> : vector<8xf32>
    %31 = vector.multi_reduction <add>, %30, %cst_17 [1] : vector<8x32xf32> to vector<8xf32>
    %32 = vector.shape_cast %31 : vector<8xf32> to vector<8x1xf32>
    %cst_18 = arith.constant 3.200000e+01 : f32
    %33 = vector.broadcast %cst_18 : f32 to vector<8x1xf32>
    %34 = arith.divf %32, %33 : vector<8x1xf32>
    %35 = arith.mulf %29, %29 : vector<8x1xf32>
    %36 = arith.subf %34, %35 : vector<8x1xf32>
    %cst_19 = arith.constant 0.000000e+00 : f32
    %37 = vector.broadcast %cst_19 : f32 to vector<8x1xf32>
    %38 = arith.maximumf %36, %37 : vector<8x1xf32>
    %39 = vector.broadcast %29 : vector<8x1xf32> to vector<8x32xf32>
    %40 = arith.subf %4, %39 : vector<8x32xf32>
    %cst_20 = arith.constant 9.99999993E-9 : f32
    %41 = vector.broadcast %cst_20 : f32 to vector<8x1xf32>
    %42 = arith.addf %38, %41 : vector<8x1xf32>
    %43 = math.rsqrt %42 : vector<8x1xf32>
    %44 = vector.broadcast %43 : vector<8x1xf32> to vector<8x32xf32>
    %45 = arith.mulf %40, %44 : vector<8x32xf32>
    %46 = vector.broadcast %24 : vector<1x32xf32> to vector<8x32xf32>
    %47 = arith.mulf %45, %46 : vector<8x32xf32>
    %48 = vector.broadcast %25 : vector<1x32xf32> to vector<8x32xf32>
    %49 = arith.addf %47, %48 : vector<8x32xf32>
    %c0_21 = arith.constant 0 : index
    %c0_22 = arith.constant 0 : index
    %c0_23 = arith.constant 0 : index
    %c0_24 = arith.constant 0 : index
    %50 = vector.load %arg7[%c0_21, %c0_22, %c0_23, %c0_24] : memref<1x6x32x16xbf16, #tpu.memory_space<vmem>>, vector<1x6x32x16xbf16>
    %51 = vector.shape_cast %50 : vector<1x6x32x16xbf16> to vector<6x32x16xbf16>
    %c0_25 = arith.constant 0 : index
    %c0_26 = arith.constant 0 : index
    %c0_27 = arith.constant 0 : index
    %52 = vector.load %arg8[%c0_25, %c0_26, %c0_27] : memref<1x6x16xf32, #tpu.memory_space<vmem>>, vector<1x6x16xf32>
    %53 = vector.shape_cast %52 : vector<1x6x16xf32> to vector<6x16xf32>
    %c0_28 = arith.constant 0 : index
    %c0_29 = arith.constant 0 : index
    %c0_30 = arith.constant 0 : index
    %54 = vector.load %arg9[%c0_28, %c0_29, %c0_30] : memref<1x32x32xbf16, #tpu.memory_space<vmem>>, vector<1x32x32xbf16>
    %55 = vector.shape_cast %54 : vector<1x32x32xbf16> to vector<32x32xbf16>
    %c0_31 = arith.constant 0 : index
    %c0_32 = arith.constant 0 : index
    %c0_33 = arith.constant 0 : index
    %56 = vector.load %arg10[%c0_31, %c0_32, %c0_33] : memref<1x1x32xf32, #tpu.memory_space<vmem>>, vector<1x1x32xf32>
    %57 = vector.shape_cast %56 : vector<1x1x32xf32> to vector<1x32xf32>
    %58 = arith.truncf %49 : vector<8x32xf32> to vector<8x32xbf16>
    %59 = arith.truncf %4 : vector<8x32xf32> to vector<8x32xbf16>
    %60 = vector.extract_strided_slice %51 {offsets = [0, 0, 0], sizes = [1, 32, 16], strides = [1, 1, 1]} : vector<6x32x16xbf16> to vector<1x32x16xbf16>
    %61 = vector.shape_cast %60 : vector<1x32x16xbf16> to vector<32x16xbf16>
    %cst_34 = arith.constant dense<0.000000e+00> : vector<8x16xf32>
    %62 = tpu.matmul %58, %61, %cst_34 {dimension_numbers = #tpu.dot_dimension_numbers<[1], [0], [0], [1], [0, 0, 1, 1], [], []>} : vector<8x32xbf16>, vector<32x16xbf16>, vector<8x16xf32> -> vector<8x16xf32>
    %63 = vector.extract_strided_slice %53 {offsets = [0, 0], sizes = [1, 16], strides = [1, 1]} : vector<6x16xf32> to vector<1x16xf32>
    %64 = vector.broadcast %63 : vector<1x16xf32> to vector<8x16xf32>
    %65 = arith.addf %62, %64 : vector<8x16xf32>
    %66 = vector.shape_cast %65 : vector<8x16xf32> to vector<1x8x16xf32>
    %67 = vector.extract_strided_slice %51 {offsets = [2, 0, 0], sizes = [1, 32, 16], strides = [1, 1, 1]} : vector<6x32x16xbf16> to vector<1x32x16xbf16>
    %68 = vector.shape_cast %67 : vector<1x32x16xbf16> to vector<32x16xbf16>
    %cst_35 = arith.constant dense<0.000000e+00> : vector<8x16xf32>
    %69 = tpu.matmul %59, %68, %cst_35 {dimension_numbers = #tpu.dot_dimension_numbers<[1], [0], [0], [1], [0, 0, 1, 1], [], []>} : vector<8x32xbf16>, vector<32x16xbf16>, vector<8x16xf32> -> vector<8x16xf32>
    %70 = vector.extract_strided_slice %53 {offsets = [2, 0], sizes = [1, 16], strides = [1, 1]} : vector<6x16xf32> to vector<1x16xf32>
    %71 = vector.broadcast %70 : vector<1x16xf32> to vector<8x16xf32>
    %72 = arith.addf %69, %71 : vector<8x16xf32>
    %73 = vector.shape_cast %72 : vector<8x16xf32> to vector<1x8x16xf32>
    %74 = vector.extract_strided_slice %51 {offsets = [4, 0, 0], sizes = [1, 32, 16], strides = [1, 1, 1]} : vector<6x32x16xbf16> to vector<1x32x16xbf16>
    %75 = vector.shape_cast %74 : vector<1x32x16xbf16> to vector<32x16xbf16>
    %cst_36 = arith.constant dense<0.000000e+00> : vector<8x16xf32>
    %76 = tpu.matmul %59, %75, %cst_36 {dimension_numbers = #tpu.dot_dimension_numbers<[1], [0], [0], [1], [0, 0, 1, 1], [], []>} : vector<8x32xbf16>, vector<32x16xbf16>, vector<8x16xf32> -> vector<8x16xf32>
    %77 = vector.extract_strided_slice %53 {offsets = [4, 0], sizes = [1, 16], strides = [1, 1]} : vector<6x16xf32> to vector<1x16xf32>
    %78 = vector.broadcast %77 : vector<1x16xf32> to vector<8x16xf32>
    %79 = arith.addf %76, %78 : vector<8x16xf32>
    %80 = vector.shape_cast %79 : vector<8x16xf32> to vector<1x8x16xf32>
    %81 = arith.truncf %66 : vector<1x8x16xf32> to vector<1x8x16xbf16>
    %82 = arith.truncf %73 : vector<1x8x16xf32> to vector<1x8x16xbf16>
    "tpu.trace_start"() <{level = 10 : i32, message = "bqd,bkd->bqk"}> : () -> ()
    %cst_37 = arith.constant dense<0.000000e+00> : vector<1x8x8xf32>
    %83 = tpu.matmul %81, %82, %cst_37 {dimension_numbers = #tpu.dot_dimension_numbers<[2], [2], [1], [1], [0, 0, 0, 1, 1, 1], [0], [0]>} : vector<1x8x16xbf16>, vector<1x8x16xbf16>, vector<1x8x8xf32> -> vector<1x8x8xf32>
    "tpu.trace_stop"() : () -> ()
    %cst_38 = arith.constant 2.500000e-01 : f32
    %84 = vector.broadcast %cst_38 : f32 to vector<1x8x8xf32>
    %85 = arith.mulf %83, %84 : vector<1x8x8xf32>
    %86 = vector.shape_cast %17 : vector<8x8xf32> to vector<1x8x8xf32>
    %87 = arith.addf %85, %86 : vector<1x8x8xf32>
    %cst_39 = arith.constant dense<0xFF800000> : vector<1x8xf32>
    %88 = vector.multi_reduction <maximumf>, %87, %cst_39 [2] : vector<1x8x8xf32> to vector<1x8xf32>
    %89 = vector.shape_cast %88 : vector<1x8xf32> to vector<1x8x1xf32>
    %90 = vector.broadcast %89 : vector<1x8x1xf32> to vector<1x8x8xf32>
    %91 = arith.subf %87, %90 : vector<1x8x8xf32>
    %92 = math.exp %91 : vector<1x8x8xf32>
    %cst_40 = arith.constant dense<0.000000e+00> : vector<1x8xf32>
    %93 = vector.multi_reduction <add>, %92, %cst_40 [2] : vector<1x8x8xf32> to vector<1x8xf32>
    %94 = vector.shape_cast %93 : vector<1x8xf32> to vector<1x8x1xf32>
    %95 = vector.broadcast %94 : vector<1x8x1xf32> to vector<1x8x8xf32>
    %96 = arith.divf %92, %95 : vector<1x8x8xf32>
    %97 = arith.truncf %96 : vector<1x8x8xf32> to vector<1x8x8xbf16>
    %98 = arith.truncf %80 : vector<1x8x16xf32> to vector<1x8x16xbf16>
    "tpu.trace_start"() <{level = 10 : i32, message = "bqk,bkd->bqd"}> : () -> ()
    %cst_41 = arith.constant dense<0.000000e+00> : vector<1x8x16xf32>
    %99 = tpu.matmul %97, %98, %cst_41 {dimension_numbers = #tpu.dot_dimension_numbers<[2], [1], [1], [2], [0, 0, 0, 1, 1, 2], [0], [0]>} : vector<1x8x8xbf16>, vector<1x8x16xbf16>, vector<1x8x16xf32> -> vector<1x8x16xf32>
    "tpu.trace_stop"() : () -> ()
    %100 = vector.shape_cast %99 : vector<1x8x16xf32> to vector<8x16xf32>
    %101 = vector.extract_strided_slice %51 {offsets = [1, 0, 0], sizes = [1, 32, 16], strides = [1, 1, 1]} : vector<6x32x16xbf16> to vector<1x32x16xbf16>
    %102 = vector.shape_cast %101 : vector<1x32x16xbf16> to vector<32x16xbf16>
    %cst_42 = arith.constant dense<0.000000e+00> : vector<8x16xf32>
    %103 = tpu.matmul %58, %102, %cst_42 {dimension_numbers = #tpu.dot_dimension_numbers<[1], [0], [0], [1], [0, 0, 1, 1], [], []>} : vector<8x32xbf16>, vector<32x16xbf16>, vector<8x16xf32> -> vector<8x16xf32>
    %104 = vector.extract_strided_slice %53 {offsets = [1, 0], sizes = [1, 16], strides = [1, 1]} : vector<6x16xf32> to vector<1x16xf32>
    %105 = vector.broadcast %104 : vector<1x16xf32> to vector<8x16xf32>
    %106 = arith.addf %103, %105 : vector<8x16xf32>
    %107 = vector.shape_cast %106 : vector<8x16xf32> to vector<1x8x16xf32>
    %108 = vector.extract_strided_slice %51 {offsets = [3, 0, 0], sizes = [1, 32, 16], strides = [1, 1, 1]} : vector<6x32x16xbf16> to vector<1x32x16xbf16>
    %109 = vector.shape_cast %108 : vector<1x32x16xbf16> to vector<32x16xbf16>
    %cst_43 = arith.constant dense<0.000000e+00> : vector<8x16xf32>
    %110 = tpu.matmul %59, %109, %cst_43 {dimension_numbers = #tpu.dot_dimension_numbers<[1], [0], [0], [1], [0, 0, 1, 1], [], []>} : vector<8x32xbf16>, vector<32x16xbf16>, vector<8x16xf32> -> vector<8x16xf32>
    %111 = vector.extract_strided_slice %53 {offsets = [3, 0], sizes = [1, 16], strides = [1, 1]} : vector<6x16xf32> to vector<1x16xf32>
    %112 = vector.broadcast %111 : vector<1x16xf32> to vector<8x16xf32>
    %113 = arith.addf %110, %112 : vector<8x16xf32>
    %114 = vector.shape_cast %113 : vector<8x16xf32> to vector<1x8x16xf32>
    %115 = vector.extract_strided_slice %51 {offsets = [5, 0, 0], sizes = [1, 32, 16], strides = [1, 1, 1]} : vector<6x32x16xbf16> to vector<1x32x16xbf16>
    %116 = vector.shape_cast %115 : vector<1x32x16xbf16> to vector<32x16xbf16>
    %cst_44 = arith.constant dense<0.000000e+00> : vector<8x16xf32>
    %117 = tpu.matmul %59, %116, %cst_44 {dimension_numbers = #tpu.dot_dimension_numbers<[1], [0], [0], [1], [0, 0, 1, 1], [], []>} : vector<8x32xbf16>, vector<32x16xbf16>, vector<8x16xf32> -> vector<8x16xf32>
    %118 = vector.extract_strided_slice %53 {offsets = [5, 0], sizes = [1, 16], strides = [1, 1]} : vector<6x16xf32> to vector<1x16xf32>
    %119 = vector.broadcast %118 : vector<1x16xf32> to vector<8x16xf32>
    %120 = arith.addf %117, %119 : vector<8x16xf32>
    %121 = vector.shape_cast %120 : vector<8x16xf32> to vector<1x8x16xf32>
    %122 = arith.truncf %107 : vector<1x8x16xf32> to vector<1x8x16xbf16>
    %123 = arith.truncf %114 : vector<1x8x16xf32> to vector<1x8x16xbf16>
    "tpu.trace_start"() <{level = 10 : i32, message = "bqd,bkd->bqk"}> : () -> ()
    %cst_45 = arith.constant dense<0.000000e+00> : vector<1x8x8xf32>
    %124 = tpu.matmul %122, %123, %cst_45 {dimension_numbers = #tpu.dot_dimension_numbers<[2], [2], [1], [1], [0, 0, 0, 1, 1, 1], [0], [0]>} : vector<1x8x16xbf16>, vector<1x8x16xbf16>, vector<1x8x8xf32> -> vector<1x8x8xf32>
    "tpu.trace_stop"() : () -> ()
    %cst_46 = arith.constant 2.500000e-01 : f32
    %125 = vector.broadcast %cst_46 : f32 to vector<1x8x8xf32>
    %126 = arith.mulf %124, %125 : vector<1x8x8xf32>
    %127 = vector.shape_cast %17 : vector<8x8xf32> to vector<1x8x8xf32>
    %128 = arith.addf %126, %127 : vector<1x8x8xf32>
    %cst_47 = arith.constant dense<0xFF800000> : vector<1x8xf32>
    %129 = vector.multi_reduction <maximumf>, %128, %cst_47 [2] : vector<1x8x8xf32> to vector<1x8xf32>
    %130 = vector.shape_cast %129 : vector<1x8xf32> to vector<1x8x1xf32>
    %131 = vector.broadcast %130 : vector<1x8x1xf32> to vector<1x8x8xf32>
    %132 = arith.subf %128, %131 : vector<1x8x8xf32>
    %133 = math.exp %132 : vector<1x8x8xf32>
    %cst_48 = arith.constant dense<0.000000e+00> : vector<1x8xf32>
    %134 = vector.multi_reduction <add>, %133, %cst_48 [2] : vector<1x8x8xf32> to vector<1x8xf32>
    %135 = vector.shape_cast %134 : vector<1x8xf32> to vector<1x8x1xf32>
    %136 = vector.broadcast %135 : vector<1x8x1xf32> to vector<1x8x8xf32>
    %137 = arith.divf %133, %136 : vector<1x8x8xf32>
    %138 = arith.truncf %137 : vector<1x8x8xf32> to vector<1x8x8xbf16>
    %139 = arith.truncf %121 : vector<1x8x16xf32> to vector<1x8x16xbf16>
    "tpu.trace_start"() <{level = 10 : i32, message = "bqk,bkd->bqd"}> : () -> ()
    %cst_49 = arith.constant dense<0.000000e+00> : vector<1x8x16xf32>
    %140 = tpu.matmul %138, %139, %cst_49 {dimension_numbers = #tpu.dot_dimension_numbers<[2], [1], [1], [2], [0, 0, 0, 1, 1, 2], [0], [0]>} : vector<1x8x8xbf16>, vector<1x8x16xbf16>, vector<1x8x16xf32> -> vector<1x8x16xf32>
    "tpu.trace_stop"() : () -> ()
    %141 = vector.shape_cast %140 : vector<1x8x16xf32> to vector<8x16xf32>
    %142 = tpu.concatenate %100, %141 in 1 : vector<8x16xf32>, vector<8x16xf32> -> vector<8x32xf32>
    %143 = arith.truncf %142 : vector<8x32xf32> to vector<8x32xbf16>
    %cst_50 = arith.constant dense<0.000000e+00> : vector<8x32xf32>
    %144 = tpu.matmul %143, %55, %cst_50 {dimension_numbers = #tpu.dot_dimension_numbers<[1], [0], [0], [1], [0, 0, 1, 1], [], []>} : vector<8x32xbf16>, vector<32x32xbf16>, vector<8x32xf32> -> vector<8x32xf32>
    %145 = vector.broadcast %57 : vector<1x32xf32> to vector<8x32xf32>
    %146 = arith.addf %144, %145 : vector<8x32xf32>
    %147 = arith.addf %49, %146 : vector<8x32xf32>
    %148 = vector.extract_strided_slice %9 {offsets = [1, 0], sizes = [1, 32], strides = [1, 1]} : vector<3x32xf32> to vector<1x32xf32>
    %149 = vector.extract_strided_slice %11 {offsets = [1, 0], sizes = [1, 32], strides = [1, 1]} : vector<3x32xf32> to vector<1x32xf32>
    %cst_51 = arith.constant dense<0.000000e+00> : vector<8xf32>
    %150 = vector.multi_reduction <add>, %147, %cst_51 [1] : vector<8x32xf32> to vector<8xf32>
    %151 = vector.shape_cast %150 : vector<8xf32> to vector<8x1xf32>
    %cst_52 = arith.constant 3.200000e+01 : f32
    %152 = vector.broadcast %cst_52 : f32 to vector<8x1xf32>
    %153 = arith.divf %151, %152 : vector<8x1xf32>
    %154 = arith.mulf %147, %147 : vector<8x32xf32>
    %cst_53 = arith.constant dense<0.000000e+00> : vector<8xf32>
    %155 = vector.multi_reduction <add>, %154, %cst_53 [1] : vector<8x32xf32> to vector<8xf32>
    %156 = vector.shape_cast %155 : vector<8xf32> to vector<8x1xf32>
    %cst_54 = arith.constant 3.200000e+01 : f32
    %157 = vector.broadcast %cst_54 : f32 to vector<8x1xf32>
    %158 = arith.divf %156, %157 : vector<8x1xf32>
    %159 = arith.mulf %153, %153 : vector<8x1xf32>
    %160 = arith.subf %158, %159 : vector<8x1xf32>
    %cst_55 = arith.constant 0.000000e+00 : f32
    %161 = vector.broadcast %cst_55 : f32 to vector<8x1xf32>
    %162 = arith.maximumf %160, %161 : vector<8x1xf32>
    %163 = vector.broadcast %153 : vector<8x1xf32> to vector<8x32xf32>
    %164 = arith.subf %147, %163 : vector<8x32xf32>
    %cst_56 = arith.constant 9.99999993E-9 : f32
    %165 = vector.broadcast %cst_56 : f32 to vector<8x1xf32>
    %166 = arith.addf %162, %165 : vector<8x1xf32>
    %167 = math.rsqrt %166 : vector<8x1xf32>
    %168 = vector.broadcast %167 : vector<8x1xf32> to vector<8x32xf32>
    %169 = arith.mulf %164, %168 : vector<8x32xf32>
    %170 = vector.broadcast %148 : vector<1x32xf32> to vector<8x32xf32>
    %171 = arith.mulf %169, %170 : vector<8x32xf32>
    %172 = vector.broadcast %149 : vector<1x32xf32> to vector<8x32xf32>
    %173 = arith.addf %171, %172 : vector<8x32xf32>
    %c0_57 = arith.constant 0 : index
    %c0_58 = arith.constant 0 : index
    %c0_59 = arith.constant 0 : index
    %c0_60 = arith.constant 0 : index
    %174 = vector.load %arg11[%c0_57, %c0_58, %c0_59, %c0_60] : memref<1x6x32x16xbf16, #tpu.memory_space<vmem>>, vector<1x6x32x16xbf16>
    %175 = vector.shape_cast %174 : vector<1x6x32x16xbf16> to vector<6x32x16xbf16>
    %c0_61 = arith.constant 0 : index
    %c0_62 = arith.constant 0 : index
    %c0_63 = arith.constant 0 : index
    %176 = vector.load %arg12[%c0_61, %c0_62, %c0_63] : memref<1x6x16xf32, #tpu.memory_space<vmem>>, vector<1x6x16xf32>
    %177 = vector.shape_cast %176 : vector<1x6x16xf32> to vector<6x16xf32>
    %c0_64 = arith.constant 0 : index
    %c0_65 = arith.constant 0 : index
    %c0_66 = arith.constant 0 : index
    %178 = vector.load %arg13[%c0_64, %c0_65, %c0_66] : memref<1x32x32xbf16, #tpu.memory_space<vmem>>, vector<1x32x32xbf16>
    %179 = vector.shape_cast %178 : vector<1x32x32xbf16> to vector<32x32xbf16>
    %c0_67 = arith.constant 0 : index
    %c0_68 = arith.constant 0 : index
    %c0_69 = arith.constant 0 : index
    %180 = vector.load %arg14[%c0_67, %c0_68, %c0_69] : memref<1x1x32xf32, #tpu.memory_space<vmem>>, vector<1x1x32xf32>
    %181 = vector.shape_cast %180 : vector<1x1x32xf32> to vector<1x32xf32>
    %182 = arith.truncf %173 : vector<8x32xf32> to vector<8x32xbf16>
    %183 = arith.truncf %7 : vector<8x32xf32> to vector<8x32xbf16>
    %184 = vector.extract_strided_slice %175 {offsets = [0, 0, 0], sizes = [1, 32, 16], strides = [1, 1, 1]} : vector<6x32x16xbf16> to vector<1x32x16xbf16>
    %185 = vector.shape_cast %184 : vector<1x32x16xbf16> to vector<32x16xbf16>
    %cst_70 = arith.constant dense<0.000000e+00> : vector<8x16xf32>
    %186 = tpu.matmul %182, %185, %cst_70 {dimension_numbers = #tpu.dot_dimension_numbers<[1], [0], [0], [1], [0, 0, 1, 1], [], []>} : vector<8x32xbf16>, vector<32x16xbf16>, vector<8x16xf32> -> vector<8x16xf32>
    %187 = vector.extract_strided_slice %177 {offsets = [0, 0], sizes = [1, 16], strides = [1, 1]} : vector<6x16xf32> to vector<1x16xf32>
    %188 = vector.broadcast %187 : vector<1x16xf32> to vector<8x16xf32>
    %189 = arith.addf %186, %188 : vector<8x16xf32>
    %190 = vector.shape_cast %189 : vector<8x16xf32> to vector<1x8x16xf32>
    %191 = vector.extract_strided_slice %175 {offsets = [2, 0, 0], sizes = [1, 32, 16], strides = [1, 1, 1]} : vector<6x32x16xbf16> to vector<1x32x16xbf16>
    %192 = vector.shape_cast %191 : vector<1x32x16xbf16> to vector<32x16xbf16>
    %cst_71 = arith.constant dense<0.000000e+00> : vector<8x16xf32>
    %193 = tpu.matmul %183, %192, %cst_71 {dimension_numbers = #tpu.dot_dimension_numbers<[1], [0], [0], [1], [0, 0, 1, 1], [], []>} : vector<8x32xbf16>, vector<32x16xbf16>, vector<8x16xf32> -> vector<8x16xf32>
    %194 = vector.extract_strided_slice %177 {offsets = [2, 0], sizes = [1, 16], strides = [1, 1]} : vector<6x16xf32> to vector<1x16xf32>
    %195 = vector.broadcast %194 : vector<1x16xf32> to vector<8x16xf32>
    %196 = arith.addf %193, %195 : vector<8x16xf32>
    %197 = vector.shape_cast %196 : vector<8x16xf32> to vector<1x8x16xf32>
    %198 = vector.extract_strided_slice %175 {offsets = [4, 0, 0], sizes = [1, 32, 16], strides = [1, 1, 1]} : vector<6x32x16xbf16> to vector<1x32x16xbf16>
    %199 = vector.shape_cast %198 : vector<1x32x16xbf16> to vector<32x16xbf16>
    %cst_72 = arith.constant dense<0.000000e+00> : vector<8x16xf32>
    %200 = tpu.matmul %183, %199, %cst_72 {dimension_numbers = #tpu.dot_dimension_numbers<[1], [0], [0], [1], [0, 0, 1, 1], [], []>} : vector<8x32xbf16>, vector<32x16xbf16>, vector<8x16xf32> -> vector<8x16xf32>
    %201 = vector.extract_strided_slice %177 {offsets = [4, 0], sizes = [1, 16], strides = [1, 1]} : vector<6x16xf32> to vector<1x16xf32>
    %202 = vector.broadcast %201 : vector<1x16xf32> to vector<8x16xf32>
    %203 = arith.addf %200, %202 : vector<8x16xf32>
    %204 = vector.shape_cast %203 : vector<8x16xf32> to vector<1x8x16xf32>
    %205 = arith.truncf %190 : vector<1x8x16xf32> to vector<1x8x16xbf16>
    %206 = arith.truncf %197 : vector<1x8x16xf32> to vector<1x8x16xbf16>
    "tpu.trace_start"() <{level = 10 : i32, message = "bqd,bkd->bqk"}> : () -> ()
    %cst_73 = arith.constant dense<0.000000e+00> : vector<1x8x8xf32>
    %207 = tpu.matmul %205, %206, %cst_73 {dimension_numbers = #tpu.dot_dimension_numbers<[2], [2], [1], [1], [0, 0, 0, 1, 1, 1], [0], [0]>} : vector<1x8x16xbf16>, vector<1x8x16xbf16>, vector<1x8x8xf32> -> vector<1x8x8xf32>
    "tpu.trace_stop"() : () -> ()
    %cst_74 = arith.constant 2.500000e-01 : f32
    %208 = vector.broadcast %cst_74 : f32 to vector<1x8x8xf32>
    %209 = arith.mulf %207, %208 : vector<1x8x8xf32>
    %210 = vector.shape_cast %23 : vector<8x8xf32> to vector<1x8x8xf32>
    %211 = arith.addf %209, %210 : vector<1x8x8xf32>
    %cst_75 = arith.constant dense<0xFF800000> : vector<1x8xf32>
    %212 = vector.multi_reduction <maximumf>, %211, %cst_75 [2] : vector<1x8x8xf32> to vector<1x8xf32>
    %213 = vector.shape_cast %212 : vector<1x8xf32> to vector<1x8x1xf32>
    %214 = vector.broadcast %213 : vector<1x8x1xf32> to vector<1x8x8xf32>
    %215 = arith.subf %211, %214 : vector<1x8x8xf32>
    %216 = math.exp %215 : vector<1x8x8xf32>
    %cst_76 = arith.constant dense<0.000000e+00> : vector<1x8xf32>
    %217 = vector.multi_reduction <add>, %216, %cst_76 [2] : vector<1x8x8xf32> to vector<1x8xf32>
    %218 = vector.shape_cast %217 : vector<1x8xf32> to vector<1x8x1xf32>
    %219 = vector.broadcast %218 : vector<1x8x1xf32> to vector<1x8x8xf32>
    %220 = arith.divf %216, %219 : vector<1x8x8xf32>
    %221 = arith.truncf %220 : vector<1x8x8xf32> to vector<1x8x8xbf16>
    %222 = arith.truncf %204 : vector<1x8x16xf32> to vector<1x8x16xbf16>
    "tpu.trace_start"() <{level = 10 : i32, message = "bqk,bkd->bqd"}> : () -> ()
    %cst_77 = arith.constant dense<0.000000e+00> : vector<1x8x16xf32>
    %223 = tpu.matmul %221, %222, %cst_77 {dimension_numbers = #tpu.dot_dimension_numbers<[2], [1], [1], [2], [0, 0, 0, 1, 1, 2], [0], [0]>} : vector<1x8x8xbf16>, vector<1x8x16xbf16>, vector<1x8x16xf32> -> vector<1x8x16xf32>
    "tpu.trace_stop"() : () -> ()
    %224 = vector.shape_cast %223 : vector<1x8x16xf32> to vector<8x16xf32>
    %225 = vector.extract_strided_slice %175 {offsets = [1, 0, 0], sizes = [1, 32, 16], strides = [1, 1, 1]} : vector<6x32x16xbf16> to vector<1x32x16xbf16>
    %226 = vector.shape_cast %225 : vector<1x32x16xbf16> to vector<32x16xbf16>
    %cst_78 = arith.constant dense<0.000000e+00> : vector<8x16xf32>
    %227 = tpu.matmul %182, %226, %cst_78 {dimension_numbers = #tpu.dot_dimension_numbers<[1], [0], [0], [1], [0, 0, 1, 1], [], []>} : vector<8x32xbf16>, vector<32x16xbf16>, vector<8x16xf32> -> vector<8x16xf32>
    %228 = vector.extract_strided_slice %177 {offsets = [1, 0], sizes = [1, 16], strides = [1, 1]} : vector<6x16xf32> to vector<1x16xf32>
    %229 = vector.broadcast %228 : vector<1x16xf32> to vector<8x16xf32>
    %230 = arith.addf %227, %229 : vector<8x16xf32>
    %231 = vector.shape_cast %230 : vector<8x16xf32> to vector<1x8x16xf32>
    %232 = vector.extract_strided_slice %175 {offsets = [3, 0, 0], sizes = [1, 32, 16], strides = [1, 1, 1]} : vector<6x32x16xbf16> to vector<1x32x16xbf16>
    %233 = vector.shape_cast %232 : vector<1x32x16xbf16> to vector<32x16xbf16>
    %cst_79 = arith.constant dense<0.000000e+00> : vector<8x16xf32>
    %234 = tpu.matmul %183, %233, %cst_79 {dimension_numbers = #tpu.dot_dimension_numbers<[1], [0], [0], [1], [0, 0, 1, 1], [], []>} : vector<8x32xbf16>, vector<32x16xbf16>, vector<8x16xf32> -> vector<8x16xf32>
    %235 = vector.extract_strided_slice %177 {offsets = [3, 0], sizes = [1, 16], strides = [1, 1]} : vector<6x16xf32> to vector<1x16xf32>
    %236 = vector.broadcast %235 : vector<1x16xf32> to vector<8x16xf32>
    %237 = arith.addf %234, %236 : vector<8x16xf32>
    %238 = vector.shape_cast %237 : vector<8x16xf32> to vector<1x8x16xf32>
    %239 = vector.extract_strided_slice %175 {offsets = [5, 0, 0], sizes = [1, 32, 16], strides = [1, 1, 1]} : vector<6x32x16xbf16> to vector<1x32x16xbf16>
    %240 = vector.shape_cast %239 : vector<1x32x16xbf16> to vector<32x16xbf16>
    %cst_80 = arith.constant dense<0.000000e+00> : vector<8x16xf32>
    %241 = tpu.matmul %183, %240, %cst_80 {dimension_numbers = #tpu.dot_dimension_numbers<[1], [0], [0], [1], [0, 0, 1, 1], [], []>} : vector<8x32xbf16>, vector<32x16xbf16>, vector<8x16xf32> -> vector<8x16xf32>
    %242 = vector.extract_strided_slice %177 {offsets = [5, 0], sizes = [1, 16], strides = [1, 1]} : vector<6x16xf32> to vector<1x16xf32>
    %243 = vector.broadcast %242 : vector<1x16xf32> to vector<8x16xf32>
    %244 = arith.addf %241, %243 : vector<8x16xf32>
    %245 = vector.shape_cast %244 : vector<8x16xf32> to vector<1x8x16xf32>
    %246 = arith.truncf %231 : vector<1x8x16xf32> to vector<1x8x16xbf16>
    %247 = arith.truncf %238 : vector<1x8x16xf32> to vector<1x8x16xbf16>
    "tpu.trace_start"() <{level = 10 : i32, message = "bqd,bkd->bqk"}> : () -> ()
    %cst_81 = arith.constant dense<0.000000e+00> : vector<1x8x8xf32>
    %248 = tpu.matmul %246, %247, %cst_81 {dimension_numbers = #tpu.dot_dimension_numbers<[2], [2], [1], [1], [0, 0, 0, 1, 1, 1], [0], [0]>} : vector<1x8x16xbf16>, vector<1x8x16xbf16>, vector<1x8x8xf32> -> vector<1x8x8xf32>
    "tpu.trace_stop"() : () -> ()
    %cst_82 = arith.constant 2.500000e-01 : f32
    %249 = vector.broadcast %cst_82 : f32 to vector<1x8x8xf32>
    %250 = arith.mulf %248, %249 : vector<1x8x8xf32>
    %251 = vector.shape_cast %23 : vector<8x8xf32> to vector<1x8x8xf32>
    %252 = arith.addf %250, %251 : vector<1x8x8xf32>
    %cst_83 = arith.constant dense<0xFF800000> : vector<1x8xf32>
    %253 = vector.multi_reduction <maximumf>, %252, %cst_83 [2] : vector<1x8x8xf32> to vector<1x8xf32>
    %254 = vector.shape_cast %253 : vector<1x8xf32> to vector<1x8x1xf32>
    %255 = vector.broadcast %254 : vector<1x8x1xf32> to vector<1x8x8xf32>
    %256 = arith.subf %252, %255 : vector<1x8x8xf32>
    %257 = math.exp %256 : vector<1x8x8xf32>
    %cst_84 = arith.constant dense<0.000000e+00> : vector<1x8xf32>
    %258 = vector.multi_reduction <add>, %257, %cst_84 [2] : vector<1x8x8xf32> to vector<1x8xf32>
    %259 = vector.shape_cast %258 : vector<1x8xf32> to vector<1x8x1xf32>
    %260 = vector.broadcast %259 : vector<1x8x1xf32> to vector<1x8x8xf32>
    %261 = arith.divf %257, %260 : vector<1x8x8xf32>
    %262 = arith.truncf %261 : vector<1x8x8xf32> to vector<1x8x8xbf16>
    %263 = arith.truncf %245 : vector<1x8x16xf32> to vector<1x8x16xbf16>
    "tpu.trace_start"() <{level = 10 : i32, message = "bqk,bkd->bqd"}> : () -> ()
    %cst_85 = arith.constant dense<0.000000e+00> : vector<1x8x16xf32>
    %264 = tpu.matmul %262, %263, %cst_85 {dimension_numbers = #tpu.dot_dimension_numbers<[2], [1], [1], [2], [0, 0, 0, 1, 1, 2], [0], [0]>} : vector<1x8x8xbf16>, vector<1x8x16xbf16>, vector<1x8x16xf32> -> vector<1x8x16xf32>
    "tpu.trace_stop"() : () -> ()
    %265 = vector.shape_cast %264 : vector<1x8x16xf32> to vector<8x16xf32>
    %266 = tpu.concatenate %224, %265 in 1 : vector<8x16xf32>, vector<8x16xf32> -> vector<8x32xf32>
    %267 = arith.truncf %266 : vector<8x32xf32> to vector<8x32xbf16>
    %cst_86 = arith.constant dense<0.000000e+00> : vector<8x32xf32>
    %268 = tpu.matmul %267, %179, %cst_86 {dimension_numbers = #tpu.dot_dimension_numbers<[1], [0], [0], [1], [0, 0, 1, 1], [], []>} : vector<8x32xbf16>, vector<32x32xbf16>, vector<8x32xf32> -> vector<8x32xf32>
    %269 = vector.broadcast %181 : vector<1x32xf32> to vector<8x32xf32>
    %270 = arith.addf %268, %269 : vector<8x32xf32>
    %271 = arith.addf %173, %270 : vector<8x32xf32>
    %272 = vector.extract_strided_slice %9 {offsets = [2, 0], sizes = [1, 32], strides = [1, 1]} : vector<3x32xf32> to vector<1x32xf32>
    %273 = vector.extract_strided_slice %11 {offsets = [2, 0], sizes = [1, 32], strides = [1, 1]} : vector<3x32xf32> to vector<1x32xf32>
    %cst_87 = arith.constant dense<0.000000e+00> : vector<8xf32>
    %274 = vector.multi_reduction <add>, %271, %cst_87 [1] : vector<8x32xf32> to vector<8xf32>
    %275 = vector.shape_cast %274 : vector<8xf32> to vector<8x1xf32>
    %cst_88 = arith.constant 3.200000e+01 : f32
    %276 = vector.broadcast %cst_88 : f32 to vector<8x1xf32>
    %277 = arith.divf %275, %276 : vector<8x1xf32>
    %278 = arith.mulf %271, %271 : vector<8x32xf32>
    %cst_89 = arith.constant dense<0.000000e+00> : vector<8xf32>
    %279 = vector.multi_reduction <add>, %278, %cst_89 [1] : vector<8x32xf32> to vector<8xf32>
    %280 = vector.shape_cast %279 : vector<8xf32> to vector<8x1xf32>
    %cst_90 = arith.constant 3.200000e+01 : f32
    %281 = vector.broadcast %cst_90 : f32 to vector<8x1xf32>
    %282 = arith.divf %280, %281 : vector<8x1xf32>
    %283 = arith.mulf %277, %277 : vector<8x1xf32>
    %284 = arith.subf %282, %283 : vector<8x1xf32>
    %cst_91 = arith.constant 0.000000e+00 : f32
    %285 = vector.broadcast %cst_91 : f32 to vector<8x1xf32>
    %286 = arith.maximumf %284, %285 : vector<8x1xf32>
    %287 = vector.broadcast %277 : vector<8x1xf32> to vector<8x32xf32>
    %288 = arith.subf %271, %287 : vector<8x32xf32>
    %cst_92 = arith.constant 9.99999993E-9 : f32
    %289 = vector.broadcast %cst_92 : f32 to vector<8x1xf32>
    %290 = arith.addf %286, %289 : vector<8x1xf32>
    %291 = math.rsqrt %290 : vector<8x1xf32>
    %292 = vector.broadcast %291 : vector<8x1xf32> to vector<8x32xf32>
    %293 = arith.mulf %288, %292 : vector<8x32xf32>
    %294 = vector.broadcast %272 : vector<1x32xf32> to vector<8x32xf32>
    %295 = arith.mulf %293, %294 : vector<8x32xf32>
    %296 = vector.broadcast %273 : vector<1x32xf32> to vector<8x32xf32>
    %297 = arith.addf %295, %296 : vector<8x32xf32>
    %c0_93 = arith.constant 0 : index
    %c0_94 = arith.constant 0 : index
    %c0_95 = arith.constant 0 : index
    %c0_96 = arith.constant 0 : index
    %298 = vector.load %arg15[%c0_93, %c0_94, %c0_95, %c0_96] : memref<1x2x32x32xbf16, #tpu.memory_space<vmem>>, vector<1x2x32x32xbf16>
    %299 = vector.shape_cast %298 : vector<1x2x32x32xbf16> to vector<2x32x32xbf16>
    %c0_97 = arith.constant 0 : index
    %c0_98 = arith.constant 0 : index
    %c0_99 = arith.constant 0 : index
    %300 = vector.load %arg16[%c0_97, %c0_98, %c0_99] : memref<1x2x32xf32, #tpu.memory_space<vmem>>, vector<1x2x32xf32>
    %301 = vector.shape_cast %300 : vector<1x2x32xf32> to vector<2x32xf32>
    %302 = arith.truncf %297 : vector<8x32xf32> to vector<8x32xbf16>
    %303 = vector.extract_strided_slice %299 {offsets = [0, 0, 0], sizes = [1, 32, 32], strides = [1, 1, 1]} : vector<2x32x32xbf16> to vector<1x32x32xbf16>
    %304 = vector.shape_cast %303 : vector<1x32x32xbf16> to vector<32x32xbf16>
    %cst_100 = arith.constant dense<0.000000e+00> : vector<8x32xf32>
    %305 = tpu.matmul %302, %304, %cst_100 {dimension_numbers = #tpu.dot_dimension_numbers<[1], [0], [0], [1], [0, 0, 1, 1], [], []>} : vector<8x32xbf16>, vector<32x32xbf16>, vector<8x32xf32> -> vector<8x32xf32>
    %306 = vector.extract_strided_slice %301 {offsets = [0, 0], sizes = [1, 32], strides = [1, 1]} : vector<2x32xf32> to vector<1x32xf32>
    %307 = vector.broadcast %306 : vector<1x32xf32> to vector<8x32xf32>
    %308 = arith.addf %305, %307 : vector<8x32xf32>
    %cst_101 = arith.constant 0.000000e+00 : f32
    %309 = vector.broadcast %cst_101 : f32 to vector<8x32xf32>
    %310 = arith.maximumf %308, %309 : vector<8x32xf32>
    %311 = arith.truncf %310 : vector<8x32xf32> to vector<8x32xbf16>
    %312 = vector.extract_strided_slice %299 {offsets = [1, 0, 0], sizes = [1, 32, 32], strides = [1, 1, 1]} : vector<2x32x32xbf16> to vector<1x32x32xbf16>
    %313 = vector.shape_cast %312 : vector<1x32x32xbf16> to vector<32x32xbf16>
    %cst_102 = arith.constant dense<0.000000e+00> : vector<8x32xf32>
    %314 = tpu.matmul %311, %313, %cst_102 {dimension_numbers = #tpu.dot_dimension_numbers<[1], [0], [0], [1], [0, 0, 1, 1], [], []>} : vector<8x32xbf16>, vector<32x32xbf16>, vector<8x32xf32> -> vector<8x32xf32>
    %315 = vector.extract_strided_slice %301 {offsets = [1, 0], sizes = [1, 32], strides = [1, 1]} : vector<2x32xf32> to vector<1x32xf32>
    %316 = vector.broadcast %315 : vector<1x32xf32> to vector<8x32xf32>
    %317 = arith.addf %314, %316 : vector<8x32xf32>
    %318 = arith.addf %317, %297 : vector<8x32xf32>
    %319 = vector.shape_cast %318 : vector<8x32xf32> to vector<1x8x32xf32>
    %c0_103 = arith.constant 0 : index
    %c0_104 = arith.constant 0 : index
    %c0_105 = arith.constant 0 : index
    %320 = vector.load %arg4[%c0_103, %c0_104, %c0_105] : memref<1x8x1xf32, #tpu.memory_space<vmem>>, vector<1x8x1xf32>
    %321 = vector.broadcast %320 : vector<1x8x1xf32> to vector<1x8x32xf32>
    %322 = arith.mulf %319, %321 : vector<1x8x32xf32>
    %c0_106 = arith.constant 0 : index
    %c0_107 = arith.constant 0 : index
    %c0_108 = arith.constant 0 : index
    %323 = vector.load %arg18[%c0_106, %c0_107, %c0_108] : memref<1x8x32xf32, #tpu.memory_space<vmem>>, vector<1x8x32xf32>
    tpu.vector_store %arg18[%c0_106, %c0_107, %c0_108], %322 {strides = array<i32>} : memref<1x8x32xf32, #tpu.memory_space<vmem>>, vector<1x8x32xf32>,
    %324 = arith.truncf %322 : vector<1x8x32xf32> to vector<1x8x32xbf16>
    %c0_109 = arith.constant 0 : index
    %c0_110 = arith.constant 0 : index
    %c0_111 = arith.constant 0 : index
    %c0_112 = arith.constant 0 : index
    %325 = vector.load %arg17[%c0_109, %c0_110, %c0_111, %c0_112] : memref<1x1x8x32xbf16, #tpu.memory_space<vmem>>, vector<1x1x8x32xbf16>
    %326 = vector.shape_cast %325 : vector<1x1x8x32xbf16> to vector<1x8x32xbf16>
    %327 = vector.shape_cast %324 : vector<1x8x32xbf16> to vector<1x1x8x32xbf16>
    tpu.vector_store %arg17[%c0_109, %c0_110, %c0_111, %c0_112], %327 {strides = array<i32>} : memref<1x1x8x32xbf16, #tpu.memory_space<vmem>>, vector<1x1x8x32xbf16>,
    return
  }
  func.func @transform_0(%arg0: i32, %arg1: i32) -> (i32, i32, i32) {
    %c0_i32 = arith.constant 0 : i32
    %c0_i32_0 = arith.constant 0 : i32
    %c0_i32_1 = arith.constant 0 : i32
    return %arg0, %c0_i32, %c0_i32_0 : i32, i32, i32
  }
  func.func @transform_1(%arg0: i32, %arg1: i32) -> (i32, i32, i32) {
    %c0_i32 = arith.constant 0 : i32
    %c0_i32_0 = arith.constant 0 : i32
    %c0_i32_1 = arith.constant 0 : i32
    return %arg0, %c0_i32, %c0_i32_0 : i32, i32, i32
  }
  func.func @transform_2(%arg0: i32, %arg1: i32) -> (i32, i32, i32) {
    %c0_i32 = arith.constant 0 : i32
    %c0_i32_0 = arith.constant 0 : i32
    %c0_i32_1 = arith.constant 0 : i32
    return %arg0, %c0_i32, %c0_i32_0 : i32, i32, i32
  }
  func.func @transform_3(%arg0: i32, %arg1: i32) -> (i32, i32, i32) {
    %c0_i32 = arith.constant 0 : i32
    %c0_i32_0 = arith.constant 0 : i32
    %c0_i32_1 = arith.constant 0 : i32
    return %arg1, %c0_i32, %c0_i32_0 : i32, i32, i32
  }
  func.func @transform_4(%arg0: i32, %arg1: i32) -> (i32, i32, i32) {
    %c0_i32 = arith.constant 0 : i32
    %c0_i32_0 = arith.constant 0 : i32
    %c0_i32_1 = arith.constant 0 : i32
    return %arg1, %c0_i32, %c0_i32_0 : i32, i32, i32
  }
  func.func @transform_5(%arg0: i32, %arg1: i32) -> (i32, i32, i32, i32) {
    %c0_i32 = arith.constant 0 : i32
    %c0_i32_0 = arith.constant 0 : i32
    %c0_i32_1 = arith.constant 0 : i32
    %c0_i32_2 = arith.constant 0 : i32
    return %arg1, %c0_i32, %c0_i32_0, %c0_i32_1 : i32, i32, i32, i32
  }
  func.func @transform_6(%arg0: i32, %arg1: i32) -> (i32, i32, i32) {
    %c0_i32 = arith.constant 0 : i32
    %c0_i32_0 = arith.constant 0 : i32
    %c0_i32_1 = arith.constant 0 : i32
    return %arg1, %c0_i32, %c0_i32_0 : i32, i32, i32
  }
  func.func @transform_7(%arg0: i32, %arg1: i32) -> (i32, i32, i32) {
    %c0_i32 = arith.constant 0 : i32
    %c0_i32_0 = arith.constant 0 : i32
    %c0_i32_1 = arith.constant 0 : i32
    return %arg1, %c0_i32, %c0_i32_0 : i32, i32, i32
  }
  func.func @transform_8(%arg0: i32, %arg1: i32) -> (i32, i32, i32) {
    %c0_i32 = arith.constant 0 : i32
    %c0_i32_0 = arith.constant 0 : i32
    %c0_i32_1 = arith.constant 0 : i32
    return %arg1, %c0_i32, %c0_i32_0 : i32, i32, i32
  }
  func.func @transform_9(%arg0: i32, %arg1: i32) -> (i32, i32, i32, i32) {
    %c0_i32 = arith.constant 0 : i32
    %c0_i32_0 = arith.constant 0 : i32
    %c0_i32_1 = arith.constant 0 : i32
    %c0_i32_2 = arith.constant 0 : i32
    return %arg1, %c0_i32, %c0_i32_0, %c0_i32_1 : i32, i32, i32, i32
  }
  func.func @transform_10(%arg0: i32, %arg1: i32) -> (i32, i32, i32) {
    %c0_i32 = arith.constant 0 : i32
    %c0_i32_0 = arith.constant 0 : i32
    %c0_i32_1 = arith.constant 0 : i32
    return %arg1, %c0_i32, %c0_i32_0 : i32, i32, i32
  }
  func.func @transform_11(%arg0: i32, %arg1: i32) -> (i32, i32, i32) {
    %c0_i32 = arith.constant 0 : i32
    %c0_i32_0 = arith.constant 0 : i32
    %c0_i32_1 = arith.constant 0 : i32
    return %arg1, %c0_i32, %c0_i32_0 : i32, i32, i32
  }
  func.func @transform_12(%arg0: i32, %arg1: i32) -> (i32, i32, i32) {
    %c0_i32 = arith.constant 0 : i32
    %c0_i32_0 = arith.constant 0 : i32
    %c0_i32_1 = arith.constant 0 : i32
    return %arg1, %c0_i32, %c0_i32_0 : i32, i32, i32
  }
  func.func @transform_13(%arg0: i32, %arg1: i32) -> (i32, i32, i32, i32) {
    %c0_i32 = arith.constant 0 : i32
    %c0_i32_0 = arith.constant 0 : i32
    %c0_i32_1 = arith.constant 0 : i32
    %c0_i32_2 = arith.constant 0 : i32
    return %arg1, %c0_i32, %c0_i32_0, %c0_i32_1 : i32, i32, i32, i32
  }
  func.func @transform_14(%arg0: i32, %arg1: i32) -> (i32, i32, i32) {
    %c0_i32 = arith.constant 0 : i32
    %c0_i32_0 = arith.constant 0 : i32
    %c0_i32_1 = arith.constant 0 : i32
    return %arg1, %c0_i32, %c0_i32_0 : i32, i32, i32
  }
  func.func @transform_15(%arg0: i32, %arg1: i32) -> (i32, i32, i32, i32) {
    %c0_i32 = arith.constant 0 : i32
    %c0_i32_0 = arith.constant 0 : i32
    %c0_i32_1 = arith.constant 0 : i32
    return %arg1, %arg0, %c0_i32, %c0_i32_0 : i32, i32, i32, i32
  }
}

</mosaic_0001>

<bundles_post_ra>
// kernel: sasrec_adt_forward.4
= control target key start
LH: loop header
LB: loop body
LE: loop exit
PB: predicated region body
PF: predicated region fallthrough
CT: control target
= control target key end

     0   :  { %s606_s24 = smov 0   ;;  %s659_s0 = inlined_call_operand.vmem [shape: bf16[2,8,32], index: 0, kind: input, shape index: {}]   ;;  %s660_s1 = inlined_call_operand.vmem [shape: f32[2,8,32], index: 1, kind: input, shape index: {}]   ;;  %s661_s2 = inlined_call_operand.vmem [shape: f32[2,8,32], index: 2, kind: input, shape index: {}]   ;;  %s662_s3 = inlined_call_operand.vmem [shape: f32[1,32], index: 3, kind: input, shape index: {}]   ;;  %s663_s4 = inlined_call_operand.vmem [shape: f32[1,32], index: 4, kind: input, shape index: {}]   ;;  %s664_s5 = inlined_call_operand.vmem [shape: bf16[2,8,32], index: 5, kind: output, shape index: {0}]   ;;  %s665_s6 = inlined_call_operand.vmem [shape: f32[2,8,1], index: 6, kind: output, shape index: {1}]   ;;  %s666_s7 = inlined_call_operand.vmem [shape: f32[2,8,1], index: 7, kind: output, shape index: {2}]  }
   0x1 LB: > { %s529_s25 = sadd.s32 4294967295, %s563_s24   ;;  %p533_p0 = scmp.ge.s32.totalorder %s563_s24, 1  ;;  %s563_s24 = sphi %s606_s24, %s18_s24  }
   0x2   : > { %p259_p1 = scmp.lt.s32.totalorder %s563_s24, 3 }
   0x4   : > { %p260_p2 = pnand %p533_p0, %p259_p1 }
   0x5   : > { %p305_p3 = scmp.lt.s32.totalorder (!%p260_p2), %s529_s25, 1 }
   0x6   : > { %263 = sbr.rel (%p260_p2) target bundleno = 302 (0x12e), region = 40 }
   0xb   : > { %s668_s25 = smov (!%p305_p3, %s529_s25), 1  ;;  %vm333_vm0 = vcmask 261120   ;;  %v565_v5 = vmov 32.0   ;;  %v551_v27 = vld [vmem:[%s662_s3] ss:$0 sm:$0xff]  ;;  %vm375_vm5 = vcmask 257024  }
   0xc   : > { %s534_s26 = sshll.u32 %s668_s25, 2  ;;  %553 = vrcp.f32 %v565_v5  ;;  %s625_s30 = sshll.u32 %s668_s25, 3  ;;  %v552_v30 = vld [vmem:[%s663_s4] ss:$0 sm:$0xff]  ;;  %vm382_vm6 = vcmask 7168  }
   0xd   : > { %s308_s29 = scalar_lea.vmem %s659_s0, %s534_s26  ;;  %s312_s12 = scalar_lea.vmem %s660_s1, %s625_s30 }
   0xe   : > { %v329_v0 = vld [vmem:[%s308_s29] sm:$0xf]  ;;  %s320_s17 = scalar_lea.vmem %s664_s5, %s534_s26  ;;  %s316_s20 = scalar_lea.vmem %s661_s2, %s625_s30 }
   0xf   : > { %v330_v1 = vunpack.c.l.bf16 %v329_v0  ;;  %v377_v32 = vld [vmem:[%s312_s12] sm:$0xff]  ;;  %s324_s23 = scalar_lea.vmem %s665_s6, %s625_s30  ;;  %s328_s27 = scalar_lea.vmem %s666_s7, %s625_s30 }
  0x10   : > { %v384_v37 = vld [vmem:[%s316_s20] sm:$0xff] }
  0x11   : > { %v334_v2 = vsel %vm333_vm0, %v330_v1, 0.0  ;;  %v345_v3 = vmul.f32 %v330_v1, %v330_v1 }
  0x12   : > { %335 = vadd.xlane.f32.xlu0 %v334_v2  ;;  %v554_v6 = vpop.eup %553 }
  0x13   : > { %v346_v4 = vsel %vm333_vm0, %v345_v3, 0.0  ;;  %v338_v7 = vmul.f32 32.0, %v554_v6  ;;  %vm342_vm1 = vweird.f32 %v554_v6 }
  0x15   : > { %v339_v8 = vsub.f32 1.0, %v338_v7 }
  0x17   : > { %v340_v9 = vmul.f32 %v554_v6, %v339_v8 }
  0x19   : > { %v341_v10 = vadd.f32 %v554_v6, %v340_v9 }
  0x1a   : > { %347 = vadd.xlane.f32.xlu0 %v346_v4 }
  0x1b   : > { %v343_v12 = vsel %vm342_vm1, %v554_v6, %v341_v10 }
  0x85   : > { %v336_v11 = vpop.xlane.xlu0 %335 }
  0x86   : > { %v344_v13 = vmul.f32 %v343_v12, %v336_v11 }
  0x88   : > { %v350_v15 = vmul.f32 %v344_v13, %v344_v13  ;;  %v353_v26 = vsub.f32 %v330_v1, %v344_v13 }
  0x8d   : > { %v348_v14 = vpop.xlane.xlu0 %347 }
  0x8e   : > { %v349_v16 = vmul.f32 %v348_v14, %v343_v12 }
  0x90   : > { %v351_v17 = vsub.f32 %v349_v16, %v350_v15 }
  0x92   : > { %v352_v18 = vmax.f32 %v351_v17, 0.0 }
  0x94   : > { %v354_v19 = vadd.f32 1e-08, %v352_v18 }
  0x96   : > { %555 = vrsqrt.f32 %v354_v19  ;;  %vm361_vm3 = vweird.f32 %v354_v19 }
  0x9c   : > { %v556_v20 = vpop.eup %555 }
  0x9d   : > { %v356_v21 = vmul.f32 %v556_v20, %v354_v19  ;;  %vm362_vm2 = vweird.f32 %v556_v20 }
  0x9e   : > { %vm363_vm4 = vmor %vm361_vm3, %vm362_vm2 }
  0x9f   : > { %v357_v22 = vmul.f32 %v556_v20, %v356_v21 }
  0xa1   : > { %v358_v23 = vmul.f32 0.5, %v357_v22 }
  0xa3   : > { %v359_v24 = vsub.f32 1.5, %v358_v23 }
  0xa5   : > { %v360_v25 = vmul.f32 %v556_v20, %v359_v24 }
  0xa7   : > { %v364_v28 = vsel %vm363_vm4, %v556_v20, %v360_v25 }
  0xa8   : > { %v365_v29 = vmul.f32 %v364_v28, %v353_v26 }
  0xaa   : > { %v369_v31 = vmul.f32 %v551_v27, %v365_v29 }
  0xac   : > { %v373_v33 = vadd.f32 %v552_v30, %v369_v31 }
  0xae   : > { %v378_v34 = vmul.f32 %v377_v32, %v373_v33  ;;  %v374_v35 = vpack.c.bf16 %v373_v33, %v373_v33  ;;  %v385_v38 = vmul.f32 %v384_v37, %v373_v33 }
  0xb0   : > { %v379_v36 = vsel %vm333_vm0, %v378_v34, 0.0  ;;  %376 = vst.msk [vmem:[%s320_s17] sm:$0xf] %vm375_vm5, %v374_v35  ;;  %v386_v39 = vsel %vm333_vm0, %v385_v38, 0.0 }
  0xb1   : > { %380 = vadd.xlane.f32.xlu1 %v379_v36 }
  0xb9   : > { %387 = vadd.xlane.f32.xlu1 %v386_v39 }
 0x124   : > { %v381_v40 = vpop.xlane.xlu1 %380 }
 0x125   : > { %383 = vst.msk [vmem:[%s324_s23] sm:$0xff] %vm382_vm6, %v381_v40 }
 0x12c   : > { %v388_v41 = vpop.xlane.xlu1 %387 }
 0x12d   : > { %389 = vst.msk [vmem:[%s328_s27] sm:$0xff] %vm382_vm6, %v388_v41 }
 0x12e PF: > { %s18_s24 = sadd.s32 1, %s563_s24  }
 0x12f   : > { %p15_p4 = scmp.ge.s32.totalorder %s18_s24, 4  }
 0x131   :  { %17 = sbr.rel (!%p15_p4) target bundleno = 1 (0x1), region = 100 }

// kernel: sasrec_adt_forward.3
= control target key start
LH: loop header
LB: loop body
LE: loop exit
PB: predicated region body
PF: predicated region fallthrough
CT: control target
= control target key end

     0   :  { %s1626_s17 = smov 0   ;;  %s1628_s18 = smov 0   ;;  %s1858_s0 = inlined_call_operand.vmem [shape: bf16[2,8,32], index: 0, kind: input, shape index: {}]   ;;  %s1859_s1 = inlined_call_operand.vmem [shape: f32[2,8,1], index: 1, kind: input, shape index: {}]   ;;  %s1860_s2 = inlined_call_operand.vmem [shape: f32[2,2,32], index: 2, kind: input, shape index: {}]   ;;  %s1861_s3 = inlined_call_operand.vmem [shape: f32[2,2,32], index: 3, kind: input, shape index: {}]   ;;  %s1862_s4 = inlined_call_operand.vmem [shape: bf16[2,6,32,16], index: 4, kind: input, shape index: {}]   ;;  %s1863_s5 = inlined_call_operand.vmem [shape: f32[2,6,16], index: 5, kind: input, shape index: {}]   ;;  %s1864_s6 = inlined_call_operand.vmem [shape: bf16[2,32,32], index: 6, kind: input, shape index: {}]   ;;  %s1865_s7 = inlined_call_operand.vmem [shape: f32[2,1,32], index: 7, kind: input, shape index: {}]   ;;  %s1866_s8 = inlined_call_operand.vmem [shape: bf16[2,2,32,32], index: 8, kind: input, shape index: {}]   ;;  %s1867_s9 = inlined_call_operand.vmem [shape: f32[2,2,32], index: 9, kind: input, shape index: {}]   ;;  %s1868_s10 = inlined_call_operand.vmem [shape: bf16[2,2,8,32], index: 10, kind: output, shape index: {0}]   ;;  %s1869_s11 = inlined_call_operand.vmem [shape: bf16[2,8,32], index: 11, kind: output, shape index: {1}]  }
   0x1   :  { %1874 = sst [smem:[#allocation10_spill]] %s1858_s0  ;;  %s1630_s19 = smov 0  }
   0x2   :  { %1875 = sst [smem:[#allocation11_spill]] %s1859_s1  ;;  %s1632_s20 = smov 0  }
   0x3   :  { %1876 = sst [smem:[#allocation12_spill]] %s1862_s4  ;;  %s1634_s21 = smov 0  }
   0x4   :  { %1877 = sst [smem:[#allocation13_spill]] %s1863_s5 }
   0x5   :  { %1878 = sst [smem:[#allocation14_spill]] %s1868_s10 }
   0x6 LB: > { %1879 = sst [smem:[#allocation3_spill]] %s1544_s17  ;;  %s31_s22 = sadd.s32 1, %s1552_s19  ;;  %s1560_s21 = sphi %s1634_s21, %s22_s21   ;;  %s1556_s20 = sphi %s1632_s20, %s1902_s20   ;;  %s1552_s19 = sphi %s1630_s19, %s1901_s19   ;;  %s1548_s18 = sphi %s1628_s18, %s1900_s18   ;;  %s1544_s17 = sphi %s1626_s17, %s1899_s17  }
   0x7   : > { %1880 = sst [smem:[#allocation4_spill]] %s1552_s19  ;;  %s34_s23 = sadd.s32 1, %s1556_s20 }
   0x8   : > { %1881 = sst [smem:[#allocation5_spill]] %s1556_s20  ;;  %p32_p0 = scmp.ge.s32.totalorder %s31_s22, 2 }
   0x9   : > { %1882 = sst [smem:[#allocation6_spill]] %s1560_s21  ;;  %p1336_p1 = scmp.ge.s32.totalorder %s1560_s21, 1 }
   0xa   : > { %p436_p2 = scmp.lt.s32.totalorder %s1560_s21, 5  ;;  %s1904_s22 = smov (%p32_p0, %s31_s22), 0 }
   0xb   : > { %1883 = sst [smem:[#allocation7_spill]] %s1904_s22  ;;  %s1906_s23 = smov (!%p32_p0, %s34_s23), %s1556_s20 }
   0xc   : > { %p437_p3 = pnand %p1336_p1, %p436_p2  ;;  %p36_p4 = scmp.ge.s32.totalorder %s1906_s23, 2 }
   0xe   : > { %s1908_s23 = smov (%p36_p4, %s1906_s23), 0  ;;  %440 = sbr.rel (%p437_p3) target bundleno = 1968 (0x7b0), region = 60 }
   0xf   : > { %1884 = sst [smem:[#allocation8_spill]] %s1908_s23 }
  0x13   : > { %p520_p5 = scmp.lt.s32.totalorder %s1548_s18, 1  ;;  %p528_p6 = scmp.lt.s32.totalorder %s1544_s17, 1 }
  0x14   : > { %s1885_s0 = sld [smem:[#allocation10_spill]] }
  0x15   : > { %s1910_s18 = smov (!%p520_p5, %s1548_s18), 1  ;;  %s1886_s1 = sld [smem:[#allocation11_spill]] }
  0x16   : > { %s1660_s24 = scalar_select %p528_p6, %s1544_s17, 1 }
  0x17   : > { %s1337_s25 = sshll.u32 %s1910_s18, 2  ;;  %s1338_s26 = sshll.u32 %s1910_s18, 3 }
  0x18   : > { %s1671_s14 = sshll.u32 %s1660_s24, 1  ;;  %s1460_s15 = smul.u32 96, %s1660_s24 }
  0x19   : > { %s1888_s4 = sld [smem:[#allocation12_spill]]  ;;  %s1342_s30 = sshll.u32 %s1660_s24, 3 }
  0x1a   : > { %s523_s29 = scalar_lea.vmem %s1885_s0, %s1337_s25  ;;  %s1889_s5 = sld [smem:[#allocation13_spill]] }
  0x1b   : > { %s1668_s13 = scalar_lea.vmem %s1886_s1, %s1338_s26  ;;  %s1441_s27 = sshll.u32 %s1660_s24, 5 }
  0x1c   : > { %1887 = sst [smem:[#allocation9_spill]] %s1668_s13  ;;  %s1440_s13 = sshll.u32 %s1660_s24, 4 }
  0x1d   : > { %s1697_s23 = scalar_lea.vmem %s1864_s6, %s1440_s13  ;;  %s561_s28 = scalar_lea.vmem %s1867_s9, %s1671_s14 }
  0x1e   : > { %s1711_s1 = scalar_lea.vmem %s1866_s8, %s1441_s27  ;;  %s1719_s13 = scalar_lea.vmem %s1869_s11, %s1337_s25 }
  0x1f   : > { %s1685_s26 = scalar_lea.vmem %s1888_s4, %s1460_s15  ;;  %s1890_s20 = sld [smem:[#allocation14_spill]] }
  0x20   : > { %s1691_s21 = scalar_lea.vmem %s1889_s5, %s1342_s30  ;;  %s567_s30 = sadd.s32 %s1671_s14, %s1910_s18 }
  0x21   : > { %s1714_s12 = sshll.u32 %s567_s30, 2  ;;  %s1891_s0 = sld [smem:[#allocation3_spill]] }
  0x25   : > { %s569_s5 = scalar_lea.vmem %s1890_s20, %s1714_s12 }
  0x27   : > { %p1351_p7 = scmp.ne.s32.totalorder %s1891_s0, 0 }
  0x29   : > { %578 = sbr.rel (%p1351_p7) target bundleno = 50 (0x32), region = 64 }
  0x2e   : > { %v579_v0 = vld [vmem:[%s523_s29] sm:$0xf]  ;;  %vm581_vm0 = vcmask 261120  }
  0x2f   : > { %v580_v1 = vunpack.c.l.bf16 %v579_v0 }
  0x31   : > { %582 = vst.msk [vmem:[#allocation2] sm:$0xff] %vm581_vm0, %v580_v1 }
  0x32 PF: > { %vm595_vm1 = vcmask 261120   ;;  %v1562_v6 = vmov 32.0   ;;  %v1447_v9 = vld [vmem:[%s1685_s26 + $0x28] sm:$0xff]  ;;  %v1446_v11 = vld [vmem:[%s1685_s26 + $0x20] sm:$0xff]  ;;  %vm585_vm3 = vcmask 257024   ;;  %v1445_v17 = vld [vmem:[%s1685_s26 + $0x18] sm:$0xff]  ;;  %s1893_s29 = scalar_lea.vmem %s1860_s2, %s1671_s14  ;;  %s1894_s15 = scalar_lea.vmem %s1861_s3, %s1671_s14  ;;  %v589_v61 = vlaneseq }
  0x33   : > { %1508 = vrcp.f32 %v1562_v6  ;;  %714 = vmatpush.bf16.msra.mxu1 %v1447_v9  ;;  %v1443_v16 = vld [vmem:[%s1685_s26 + $0x8] sm:$0xff]  ;;  %v1442_v19 = vld [vmem:[%s1685_s26] sm:$0xff]  ;;  %v1444_v20 = vld [vmem:[%s1685_s26 + $0x10] sm:$0xff]  ;;  %vm749_vm7 = vcmask 130048   ;;  %v1563_v1 = vmov -1e+09   ;;  %s1895_s12 = scalar_lea.vmem %s1865_s7, %s1660_s24 }
  0x34   : > { %685 = vmatpush.bf16.msra.mxu0 %v1443_v16  ;;  %v1754_v33 = vld [vmem:[%s1893_s29] sm:$0x3]  ;;  %v1451_v58 = vld [vmem:[%s1685_s26 + $0x48] sm:$0xff]  ;;  %v1449_v60 = vld [vmem:[%s1685_s26 + $0x38] sm:$0xff]  ;;  %v590_v62 = vshrl.u32 %v589_v61, 7  ;;  %v592_v63 = vand.u32 127, %v589_v61 }
  0x35   : > { %v1761_v35 = vld [vmem:[%s1894_s15] sm:$0x3]  ;;  %v628_v37 = vperm.slane %v1754_v33, 0  ;;  %740 = vmatpush.bf16.msra.mxu2 %v1451_v58  ;;  %vm771_vm9 = vcmask 64512   ;;  %vm801_vm10 = vcmask 1043456   ;;  %s1896_s24 = sld [smem:[#allocation9_spill]] }
  0x36   : > { %v630_v40 = vperm.slane %v1761_v35, 0  ;;  %v1772_v44 = vld [vmem:[%s1691_s21] sm:$0x3f]  ;;  %vm593_vm8 = vcmp.le.s32.totalorder %v592_v63, %v590_v62  ;;  %s1564_s21 = smov 16   ;;  %s1897_s10 = sld [smem:[#allocation3_spill]] }
  0x37   : > { %715 = vmatpush.bf16.msra.mxu1 %v1446_v11  ;;  %v692_v45 = vperm.slane %v1772_v44, 2  ;;  %v663_v51 = vperm.slane %v1772_v44, 0  ;;  %v1450_v59 = vld [vmem:[%s1685_s26 + $0x40] sm:$0xff]  ;;  %v721_v16 = vperm.slane %v1772_v44, 4 }
  0x38   : > { %v583_v2 = vld [vmem:[#allocation2] sm:$0xff]  ;;  %686 = vmatpush.bf16.msra.mxu0 %v1442_v19 }
  0x39   : > { %v596_v3 = vsel %vm595_vm1, %v583_v2, 0.0  ;;  %v607_v4 = vmul.f32 %v583_v2, %v583_v2  ;;  %v1509_v7 = vpop.eup %1508  ;;  %v1730_v12 = vpack.c.bf16 %v583_v2, %v583_v2  ;;  %741 = vmatpush.bf16.msra.mxu2 %v1450_v59 }
  0x3a   : > { %597 = vadd.xlane.f32.xlu0 %v596_v3  ;;  %v600_v8 = vmul.f32 32.0, %v1509_v7  ;;  %vm604_vm2 = vweird.f32 %v1509_v7 }
  0x3b   : > { %v608_v5 = vsel %vm595_vm1, %v607_v4, 0.0  ;;  %1369 = vmatmul.msk.bf16.vlgmr.msra.gmra.mxu1 %vm595_vm1, %v1730_v12  ;;  %586 = vst.msk [vmem:[%s569_s5] sm:$0xf] %vm585_vm3, %v1730_v12 }
  0x3c   : > { %v601_v10 = vsub.f32 1.0, %v600_v8  ;;  %837 = vmatpush.bf16.msrb.mxu1 %v1445_v17  ;;  %1378 = vmatmul.msk.bf16.vlgmr.msra.gmra.mxu2 %vm595_vm1, %v1730_v12  ;;  %p1437_p8 = scmp.ne.s32.totalorder %s1897_s10, 1 }
  0x3d   : > { %863 = vmatpush.bf16.msrb.mxu2 %v1449_v60 }
  0x3e   : > { %v602_v13 = vmul.f32 %v1509_v7, %v601_v10 }
  0x40   : > { %v603_v14 = vadd.f32 %v1509_v7, %v602_v13  ;;  %838 = vmatpush.bf16.msrb.mxu1 %v1444_v20 }
  0x42   : > { %609 = vadd.xlane.f32.xlu0 %v608_v5  ;;  %v1743_v18 = vsel %vm604_vm2, %v1509_v7, %v603_v14  ;;  %v1448_v7 = vld [vmem:[%s1685_s26 + $0x30] sm:$0xff] }
  0x43   : > { %864 = vmatpush.bf16.msrb.mxu2 %v1448_v7 }
  0x4c   : > { %1398 = vmatmul.msk.bf16.vlgmr.msrb.gmra.mxu2 %vm595_vm1, %v1730_v12 }
  0xad   : > { %v598_v15 = vpop.xlane.xlu0 %597 }
  0xae   : > { %v606_v21 = vmul.f32 %v1743_v18, %v598_v15 }
  0xb0   : > { %v612_v23 = vmul.f32 %v606_v21, %v606_v21  ;;  %v615_v36 = vsub.f32 %v583_v2, %v606_v21  ;;  %v1785_v2 = vsel %vm593_vm8, 0.0, %v1563_v1  ;;  %v844_v21 = vperm.slane %v1772_v44, 3 }
  0xb5   : > { %v610_v22 = vpop.xlane.xlu0 %609 }
  0xb6   : > { %v611_v24 = vmul.f32 %v610_v22, %v1743_v18 }
  0xb8   : > { %v613_v25 = vsub.f32 %v611_v24, %v612_v23  ;;  %v717_v46 = vpop.f32.mrf.mxu1 }
  0xb9   : > { %v718_v47 = vadd.f32 %v717_v46, %v692_v45 }
  0xba   : > { %v614_v26 = vmax.f32 %v613_v25, 0.0 }
  0xbb   : > { %v748_v48 = vpack.c.bf16 %v718_v47, %v718_v47  ;;  %v1453_v47 = vld [vmem:[%s1685_s26 + $0x58] sm:$0xff] }
  0xbc   : > { %v616_v27 = vadd.f32 1e-08, %v614_v26 }
  0xbd   : > { %v754_v49 = vsel %vm749_vm7, %v748_v48, 0  ;;  %v1452_v48 = vld [vmem:[%s1685_s26 + $0x50] sm:$0xff] }
  0xbe   : > { %1510 = vrsqrt.f32 %v616_v27  ;;  %vm623_vm5 = vweird.f32 %v616_v27  ;;  %763 = vmatpush.bf16.xpose.msra.mxu3 %v754_v49 }
  0xbf   : > { %v743_v8 = vpop.f32.mrf.mxu2 }
  0xc0   : > { %v719_v50 = vpop.f32.mrf.mxu1  ;;  %v744_v17 = vadd.f32 %v743_v8, %v721_v16  ;;  %v1454_v16 = vld [vmem:[%s1697_s23] sm:$0xff] }
  0xc2   : > { %v797_v19 = vpack.c.bf16 %v744_v17, %v744_v17 }
  0xc4   : > { %v1511_v28 = vpop.eup %1510  ;;  %v803_v20 = vsel %vm801_vm10, %v797_v19, 0 }
  0xc5   : > { %v618_v29 = vmul.f32 %v1511_v28, %v616_v27  ;;  %vm624_vm4 = vweird.f32 %v1511_v28  ;;  %812 = vmatpush.bf16.msrb.mxu0 %v803_v20 }
  0xc6   : > { %vm625_vm6 = vmor %vm623_vm5, %vm624_vm4  ;;  %889 = vmatpush.bf16.msrb.mxu3 %v1453_v47 }
  0xc7   : > { %v619_v30 = vmul.f32 %v1511_v28, %v618_v29  ;;  %v745_v13 = vpop.f32.mrf.mxu2 }
  0xc9   : > { %v620_v31 = vmul.f32 0.5, %v619_v30 }
  0xca   : > { %890 = vmatpush.bf16.msrb.mxu3 %v1452_v48 }
  0xcb   : > { %v621_v32 = vsub.f32 1.5, %v620_v31 }
  0xcd   : > { %v622_v34 = vmul.f32 %v1511_v28, %v621_v32 }
  0xcf   : > { %v626_v38 = vsel %vm625_vm6, %v1511_v28, %v622_v34  ;;  %v866_v22 = vpop.f32.mrf.mxu2 }
  0xd0   : > { %v627_v39 = vmul.f32 %v626_v38, %v615_v36  ;;  %v867_v23 = vadd.f32 %v866_v22, %v844_v21 }
  0xd2   : > { %v629_v41 = vmul.f32 %v628_v37, %v627_v39  ;;  %v897_v24 = vpack.c.bf16 %v867_v23, %v867_v23  ;;  %v1507_v23 = vld [vmem:[%s1895_s12] ss:$0 sm:$0xff] }
  0xd4   : > { %v1765_v42 = vadd.f32 %v630_v40, %v629_v41  ;;  %v902_v25 = vsel %vm749_vm7, %v897_v24, 0 }
  0xd6   : > { %v662_v43 = vpack.c.bf16 %v1765_v42, %v1765_v42 }
  0xd7   : > { %v868_v26 = vpop.f32.mrf.mxu2 }
  0xd8   : > { %1360 = vmatmul.msk.bf16.vlgmr.msra.gmra.mxu0 %vm595_vm1, %v662_v43  ;;  %1389 = vmatmul.msk.bf16.vlgmr.msrb.gmra.mxu1 %vm595_vm1, %v662_v43  ;;  %v818_v43 = vperm.slane %v1772_v44, 1 }
  0xd9   : > { %911 = vmatpush.bf16.xpose.msra.mxu0 %v902_v25 }
 0x155   : > { %v688_v52 = vpop.f32.mrf.mxu0  ;;  %v1777_v53 = vpop.f32.mrf.mxu1 }
 0x156   : > { %v689_v54 = vadd.f32 %v688_v52, %v663_v51  ;;  %v841_v45 = vadd.f32 %v1777_v53, %v818_v43  ;;  %v1458_v43 = vld [vmem:[%s1711_s1 + $0x10] sm:$0xff] }
 0x158   : > { %v747_v55 = vpack.c.bf16 %v689_v54, %v689_v54  ;;  %v896_v46 = vpack.c.bf16 %v841_v45, %v841_v45 }
 0x15a   : > { %1379 = vmatmul.msk.bf16.vlgmr.msra.gmra.mxu3 %vm749_vm7, %v747_v55 }
 0x15d   : > { %v690_v56 = vpop.f32.mrf.mxu0  ;;  %v842_v57 = vpop.f32.mrf.mxu1 }
 0x15e   : > { %v870_v56 = vperm.slane %v1772_v44, 5 }
 0x16a   : > { %1407 = vmatmul.msk.bf16.vlgmr.msrb.gmra.mxu3 %vm595_vm1, %v1730_v12 }
 0x1dd   : > { %v765_v0 = vpop.f32.mrf.mxu3 }
 0x1de   : > { %v769_v3 = vmul.f32 0.25, %v765_v0 }
 0x1e0   : > { %v770_v4 = vadd.f32 %v769_v3, %v1785_v2 }
 0x1e2   : > { %v772_v5 = vsel %vm771_vm9, %v770_v4, -inf }
 0x1e3   : > { %773 = vmax.xlane.f32.xlu1 %v772_v5 }
 0x1e5   : > { %v767_v6 = vpop.f32.mrf.mxu3 }
 0x1ed   : > { %v892_v57 = vpop.f32.mrf.mxu3 }
 0x1ee   : > { %v893_v58 = vadd.f32 %v892_v57, %v870_v56 }
 0x1f0   : > { %v944_v59 = vpack.c.bf16 %v893_v58, %v893_v58 }
 0x1f2   : > { %v949_v61 = vsel %vm801_vm10, %v944_v59, 0  ;;  %v1102_v59 = vld [vmem:[%s1896_s24] sm:$0xff] }
 0x1f3   : > { %958 = vmatpush.bf16.msra.mxu1 %v949_v61 }
 0x1f5   : > { %v894_v63 = vpop.f32.mrf.mxu3 }
 0x256   : > { %v774_v9 = vpop.xlane.xlu1 %773 }
 0x257   : > { %v775_v10 = vsub.f32 %v770_v4, %v774_v9 }
 0x259   : > { %v776_v11 = vmul.f32 1.442695, %v775_v10 }
 0x25b   : > { %1512 = vpow2.f32 %v776_v11 }
 0x261   : > { %v1513_v14 = vpop.eup %1512 }
 0x262   : > { %v778_v15 = vsel %vm771_vm9, %v1513_v14, 0.0 }
 0x263   : > { %779 = vadd.xlane.f32.xlu1 %v778_v15  ;;  %v1455_v15 = vld [vmem:[%s1697_s23 + $0x8] sm:$0xff] }
 0x264   : > { %994 = vmatpush.bf16.msra.mxu2 %v1455_v15 }
 0x268   : > { %995 = vmatpush.bf16.msra.mxu2 %v1454_v16 }
 0x2d6   : > { %v780_v27 = vpop.xlane.xlu1 %779 }
 0x2d7   : > { %1514 = vrcp.f32 %v780_v27  ;;  %v792_v31 = vand.u32 2147483648, %v780_v27  ;;  %v790_v34 = vand.u32 2147483647, %v780_v27  ;;  %vm786_vm12 = vweird.f32 %v780_v27 }
 0x2d9   : > { %v793_v37 = vor.u32 1.1754944e-38, %v792_v31  ;;  %vm791_vm14 = vcmp.eq.f32.partialorder %v790_v34, 8.507059e+37  ;;  %v1457_v31 = vld [vmem:[%s1711_s1 + $0x8] sm:$0xff] }
 0x2da   : > { %1063 = vmatpush.bf16.msra.mxu3 %v1457_v31 }
 0x2dd   : > { %v1515_v28 = vpop.eup %1514 }
 0x2de   : > { %v782_v29 = vmul.f32 %v1515_v28, %v780_v27  ;;  %vm787_vm11 = vweird.f32 %v1515_v28 }
 0x2df   : > { %vm788_vm13 = vmor %vm786_vm12, %vm787_vm11 }
 0x2e0   : > { %v783_v30 = vsub.f32 1.0, %v782_v29 }
 0x2e2   : > { %v784_v32 = vmul.f32 %v1515_v28, %v783_v30 }
 0x2e4   : > { %v785_v36 = vadd.f32 %v1515_v28, %v784_v32  ;;  %v1456_v32 = vld [vmem:[%s1711_s1] sm:$0xff] }
 0x2e5   : > { %1064 = vmatpush.bf16.msra.mxu3 %v1456_v32 }
 0x2e6   : > { %v789_v38 = vsel %vm788_vm13, %v1515_v28, %v785_v36 }
 0x2e7   : > { %v794_v39 = vsel %vm791_vm14, %v793_v37, %v789_v38 }
 0x2e8   : > { %v795_v40 = vmul.f32 %v1513_v14, %v794_v39 }
 0x2ea   : > { %v796_v41 = vpack.c.bf16 %v795_v40, %v795_v40  ;;  %v1459_v40 = vld [vmem:[%s1711_s1 + $0x18] sm:$0xff] }
 0x2ec   : > { %1380 = vmatmul.msk.bf16.vlgmr.msrb.gmra.mxu0 %vm771_vm9, %v796_v41 }
 0x2ed   : > { %1094 = vmatpush.bf16.msrb.mxu0 %v1459_v40 }
 0x2f1   : > { %1095 = vmatpush.bf16.msrb.mxu0 %v1458_v43 }
 0x2fc   : > { %1408 = vmatmul.msk.bf16.vlgmr.msra.gmra.mxu0 %vm749_vm7, %v896_v46 }
 0x369   : > { %v814_v49 = vpop.f32.mrf.mxu0 }
 0x371   : > { %v816_v50 = vpop.f32.mrf.mxu0 }
 0x379   : > { %v913_v51 = vpop.f32.mrf.mxu0 }
 0x37a   : > { %v917_v52 = vmul.f32 0.25, %v913_v51 }
 0x37c   : > { %v918_v54 = vadd.f32 %v917_v52, %v1785_v2 }
 0x37e   : > { %v919_v55 = vsel %vm771_vm9, %v918_v54, -inf }
 0x37f   : > { %920 = vmax.xlane.f32.xlu2 %v919_v55  ;;  %v1029_v55 = vperm.slane %v1761_v35, 1 }
 0x381   : > { %v915_v53 = vpop.f32.mrf.mxu0 }
 0x3f2   : > { %v921_v60 = vpop.xlane.xlu2 %920 }
 0x3f3   : > { %v922_v62 = vsub.f32 %v918_v54, %v921_v60  ;;  %v1565_v60 = vmov 0  }
 0x3f4   : > { %1505 = vset.pattern.permute.xlu1 %v1565_v60  ;;  %1506 = vset.pattern.permute.xlu0 %v1565_v60 }
 0x3f5   : > { %v923_v12 = vmul.f32 1.442695, %v922_v62 }
 0x3f7   : > { %1516 = vpow2.f32 %v923_v12 }
 0x3fd   : > { %v1517_v0 = vpop.eup %1516 }
 0x3fe   : > { %v925_v1 = vsel %vm771_vm9, %v1517_v0, 0.0 }
 0x3ff   : > { %926 = vadd.xlane.f32.xlu2 %v925_v1 }
 0x472   : > { %v927_v2 = vpop.xlane.xlu2 %926 }
 0x473   : > { %1518 = vrcp.f32 %v927_v2  ;;  %v939_v5 = vand.u32 2147483648, %v927_v2  ;;  %v937_v7 = vand.u32 2147483647, %v927_v2  ;;  %vm933_vm0 = vweird.f32 %v927_v2 }
 0x475   : > { %v940_v9 = vor.u32 1.1754944e-38, %v939_v5  ;;  %vm938_vm4 = vcmp.eq.f32.partialorder %v937_v7, 8.507059e+37 }
 0x479   : > { %v1519_v3 = vpop.eup %1518 }
 0x47a   : > { %v929_v4 = vmul.f32 %v1519_v3, %v927_v2  ;;  %vm934_vm15 = vweird.f32 %v1519_v3 }
 0x47b   : > { %vm935_vm2 = vmor %vm933_vm0, %vm934_vm15 }
 0x47c   : > { %v930_v44 = vsub.f32 1.0, %v929_v4 }
 0x47e   : > { %v931_v6 = vmul.f32 %v1519_v3, %v930_v44 }
 0x480   : > { %v932_v8 = vadd.f32 %v1519_v3, %v931_v6 }
 0x482   : > { %v936_v10 = vsel %vm935_vm2, %v1519_v3, %v932_v8 }
 0x483   : > { %v941_v11 = vsel %vm938_vm4, %v940_v9, %v936_v10 }
 0x484   : > { %v942_v13 = vmul.f32 %v1517_v0, %v941_v11 }
 0x486   : > { %v943_v14 = vpack.c.bf16 %v942_v13, %v942_v13 }
 0x488   : > { %1409 = vmatmul.msk.bf16.vlgmr.msra.gmra.mxu1 %vm771_vm9, %v943_v14 }
 0x505   : > { %v960_v17 = vpop.f32.mrf.mxu1 }
 0x506   : > { %965 = vrot.lane.b32.xlu0 %v960_v17, %s1564_s21 }
 0x50d   : > { %v962_v19 = vpop.f32.mrf.mxu1 }
 0x578   : > { %v966_v20 = vpop.permute.xlu0 %965 }
 0x579   : > { %v968_v21 = vsel %vm749_vm7, %v814_v49, %v966_v20 }
 0x57a   : > { %v969_v22 = vpack.c.bf16 %v968_v21, %v968_v21 }
 0x57c   : > { %1418 = vmatmul.msk.bf16.vlgmr.msra.gmra.mxu2 %vm595_vm1, %v969_v22 }
 0x5ff   : > { %v997_v24 = vpop.f32.mrf.mxu2 }
 0x600   : > { %v998_v25 = vadd.f32 %v1507_v23, %v997_v24 }
 0x602   : > { %v1001_v26 = vadd.f32 %v998_v25, %v1765_v42 }
 0x604   : > { %v1002_v27 = vsel %vm595_vm1, %v1001_v26, 0.0  ;;  %v1006_v28 = vmul.f32 %v1001_v26, %v1001_v26 }
 0x605   : > { %1003 = vadd.xlane.f32.xlu1 %v1002_v27 }
 0x606   : > { %v1007_v29 = vsel %vm595_vm1, %v1006_v28, 0.0 }
 0x607   : > { %v999_v30 = vpop.f32.mrf.mxu2  ;;  %1008 = vadd.xlane.f32.xlu2 %v1007_v29 }
 0x61e   : > { %1105 = vperm.xlu1 %1505, %v1102_v59  }
 0x678   : > { %v1004_v34 = vpop.xlane.xlu1 %1003 }
 0x679   : > { %v1005_v36 = vmul.f32 %v1004_v34, %v1743_v18 }
 0x67a   : > { %v1009_v37 = vpop.xlane.xlu2 %1008 }
 0x67b   : > { %v1011_v38 = vmul.f32 %v1005_v36, %v1005_v36  ;;  %v1010_v42 = vmul.f32 %v1009_v37, %v1743_v18  ;;  %v1027_v18 = vperm.slane %v1754_v33, 1  ;;  %v1014_v52 = vsub.f32 %v1001_v26, %v1005_v36  ;;  %v1039_v33 = vld [vmem:[%s561_s28] sm:$0x3] }
 0x67c   : > { %v1041_v61 = vperm.slane %v1039_v33, 0  ;;  %v1072_v1 = vperm.slane %v1039_v33, 1 }
 0x67d   : > { %v1012_v39 = vsub.f32 %v1010_v42, %v1011_v38 }
 0x67f   : > { %v1013_v41 = vmax.f32 %v1012_v39, 0.0 }
 0x681   : > { %v1015_v45 = vadd.f32 1e-08, %v1013_v41 }
 0x683   : > { %1520 = vrsqrt.f32 %v1015_v45  ;;  %vm1022_vm6 = vweird.f32 %v1015_v45 }
 0x689   : > { %v1521_v46 = vpop.eup %1520 }
 0x68a   : > { %v1017_v47 = vmul.f32 %v1521_v46, %v1015_v45  ;;  %vm1023_vm5 = vweird.f32 %v1521_v46 }
 0x68b   : > { %vm1024_vm7 = vmor %vm1022_vm6, %vm1023_vm5 }
 0x68c   : > { %v1018_v48 = vmul.f32 %v1521_v46, %v1017_v47 }
 0x68e   : > { %v1019_v49 = vmul.f32 0.5, %v1018_v48 }
 0x690   : > { %v1020_v50 = vsub.f32 1.5, %v1019_v49  ;;  %v1106_v4 = vpop.permute.xlu1 %1105 }
 0x692   : > { %v1021_v51 = vmul.f32 %v1521_v46, %v1020_v50 }
 0x694   : > { %v1025_v54 = vsel %vm1024_vm7, %v1521_v46, %v1021_v51 }
 0x695   : > { %v1026_v53 = vmul.f32 %v1025_v54, %v1014_v52 }
 0x697   : > { %v1028_v56 = vmul.f32 %v1027_v18, %v1026_v53 }
 0x699   : > { %v1030_v57 = vadd.f32 %v1029_v55, %v1028_v56 }
 0x69b   : > { %v1040_v58 = vpack.c.bf16 %v1030_v57, %v1030_v57 }
 0x69d   : > { %1427 = vmatmul.msk.bf16.vlgmr.msra.gmra.mxu3 %vm595_vm1, %v1040_v58 }
 0x720   : > { %v1066_v62 = vpop.f32.mrf.mxu3 }
 0x721   : > { %v1067_v12 = vadd.f32 %v1066_v62, %v1041_v61 }
 0x723   : > { %v1070_v35 = vmax.f32 %v1067_v12, 0.0 }
 0x725   : > { %v1071_v63 = vpack.c.bf16 %v1070_v35, %v1070_v35 }
 0x727   : > { %1436 = vmatmul.msk.bf16.vlgmr.msrb.gmra.mxu0 %vm595_vm1, %v1071_v63 }
 0x728   : > { %v1068_v0 = vpop.f32.mrf.mxu3 }
 0x7a4   : > { %v1097_v2 = vpop.f32.mrf.mxu0 }
 0x7a5   : > { %v1098_v3 = vadd.f32 %v1097_v2, %v1072_v1 }
 0x7a7   : > { %v1101_v44 = vadd.f32 %v1098_v3, %v1030_v57 }
 0x7a8   : > { %1113 = sbr.rel (%p1437_p8) target bundleno = 1968 (0x7b0), region = 68 }
 0x7a9   : > { %v1108_v5 = vmul.f32 %v1106_v4, %v1101_v44 }
 0x7ab   : > { %1109 = vst.msk [vmem:[#allocation2] sm:$0xff] %vm595_vm1, %v1108_v5 }
 0x7ac   : > { %v1099_v6 = vpop.f32.mrf.mxu0 }
 0x7ad   : > { %v1114_v7 = vpack.c.bf16 %v1108_v5, %v1108_v5 }
 0x7af   : > { %1115 = vst.msk [vmem:[%s1719_s13] sm:$0xf] %vm585_vm3, %v1114_v7 }
 0x7b0 PF: > { %s1898_s14 = sld [smem:[#allocation6_spill]] }
 0x7b1   : > { %s1899_s17 = sld [smem:[#allocation4_spill]] }
 0x7b2   : > { %s1900_s18 = sld [smem:[#allocation5_spill]] }
 0x7b3   : > { %s1901_s19 = sld [smem:[#allocation7_spill]] }
 0x7b4   : > { %s1902_s20 = sld [smem:[#allocation8_spill]] }
 0x7b6   : > { %s22_s21 = sadd.s32 1, %s1898_s14  }
 0x7b7   : > { %p19_p9 = scmp.ge.s32.totalorder %s22_s21, 6  }
 0x7b9   :  { %21 = sbr.rel (!%p19_p9) target bundleno = 6 (0x6), region = 137 }

// kernel: sasrec_adt_forward.5
= control target key start
LH: loop header
LB: loop body
LE: loop exit
PB: predicated region body
PF: predicated region fallthrough
CT: control target
= control target key end

     0   :  { %s2346_s18 = smov 0   ;;  %s2348_s19 = smov 0   ;;  %s2649_s0 = inlined_call_operand.vmem [shape: bf16[2,8,32], index: 0, kind: input, shape index: {}]   ;;  %s2650_s1 = inlined_call_operand.vmem [shape: bf16[2,8,32], index: 1, kind: input, shape index: {}]   ;;  %s2651_s2 = inlined_call_operand.vmem [shape: f32[2,8,1], index: 2, kind: input, shape index: {}]   ;;  %s2652_s3 = inlined_call_operand.vmem [shape: f32[2,3,32], index: 3, kind: input, shape index: {}]   ;;  %s2653_s4 = inlined_call_operand.vmem [shape: f32[2,3,32], index: 4, kind: input, shape index: {}]   ;;  %s2654_s5 = inlined_call_operand.vmem [shape: bf16[2,6,32,16], index: 5, kind: input, shape index: {}]   ;;  %s2655_s6 = inlined_call_operand.vmem [shape: f32[2,6,16], index: 6, kind: input, shape index: {}]   ;;  %s2656_s7 = inlined_call_operand.vmem [shape: bf16[2,32,32], index: 7, kind: input, shape index: {}]   ;;  %s2657_s8 = inlined_call_operand.vmem [shape: f32[2,1,32], index: 8, kind: input, shape index: {}]   ;;  %s2658_s9 = inlined_call_operand.vmem [shape: bf16[2,6,32,16], index: 9, kind: input, shape index: {}]   ;;  %s2659_s10 = inlined_call_operand.vmem [shape: f32[2,6,16], index: 10, kind: input, shape index: {}]   ;;  %s2660_s11 = inlined_call_operand.vmem [shape: bf16[2,32,32], index: 11, kind: input, shape index: {}]   ;;  %s2661_s12 = inlined_call_operand.vmem [shape: f32[2,1,32], index: 12, kind: input, shape index: {}]   ;;  %s2662_s13 = inlined_call_operand.vmem [shape: bf16[2,2,32,32], index: 13, kind: input, shape index: {}]   ;;  %s2663_s14 = inlined_call_operand.vmem [shape: f32[2,2,32], index: 14, kind: input, shape index: {}]   ;;  %s2664_s15 = inlined_call_operand.vmem [shape: bf16[2,2,8,32], index: 15, kind: output, shape index: {}]  }
   0x1   :  { %2669 = sst [smem:[#allocation11_spill]] %s2649_s0  ;;  %s2350_s20 = smov 0  }
   0x2   :  { %2670 = sst [smem:[#allocation12_spill]] %s2650_s1  ;;  %s2352_s21 = smov 0  }
   0x3   :  { %2671 = sst [smem:[#allocation13_spill]] %s2651_s2  ;;  %s2354_s22 = smov 0  }
   0x4   :  { %2672 = sst [smem:[#allocation14_spill]] %s2652_s3 }
   0x5   :  { %2673 = sst [smem:[#allocation15_spill]] %s2653_s4 }
   0x6   :  { %2674 = sst [smem:[#allocation16_spill]] %s2654_s5 }
   0x7   :  { %2675 = sst [smem:[#allocation17_spill]] %s2655_s6 }
   0x8   :  { %2676 = sst [smem:[#allocation18_spill]] %s2656_s7 }
   0x9   :  { %2677 = sst [smem:[#allocation19_spill]] %s2657_s8 }
   0xa   :  { %2678 = sst [smem:[#allocation20_spill]] %s2658_s9 }
   0xb   :  { %2679 = sst [smem:[#allocation21_spill]] %s2659_s10 }
   0xc   :  { %2680 = sst [smem:[#allocation22_spill]] %s2660_s11 }
   0xd   :  { %2681 = sst [smem:[#allocation23_spill]] %s2663_s14 }
   0xe   :  { %2682 = sst [smem:[#allocation24_spill]] %s2664_s15 }
   0xf LB: > { %2683 = sst [smem:[#allocation3_spill]] %s2244_s18  ;;  %s34_s23 = sadd.s32 1, %s2252_s20  ;;  %s2260_s22 = sphi %s2354_s22, %s25_s22   ;;  %s2256_s21 = sphi %s2352_s21, %s2714_s21   ;;  %s2252_s20 = sphi %s2350_s20, %s2713_s20   ;;  %s2248_s19 = sphi %s2348_s19, %s2712_s19   ;;  %s2244_s18 = sphi %s2346_s18, %s2711_s18  }
  0x10   : > { %2684 = sst [smem:[#allocation4_spill]] %s2252_s20  ;;  %s37_s24 = sadd.s32 1, %s2256_s21 }
  0x11   : > { %2685 = sst [smem:[#allocation5_spill]] %s2256_s21  ;;  %p35_p0 = scmp.ge.s32.totalorder %s34_s23, 2 }
  0x12   : > { %2686 = sst [smem:[#allocation6_spill]] %s2260_s22  ;;  %p1941_p1 = scmp.ge.s32.totalorder %s2260_s22, 1 }
  0x13   : > { %p579_p2 = scmp.lt.s32.totalorder %s2260_s22, 5  ;;  %s2716_s23 = smov (%p35_p0, %s34_s23), 0 }
  0x14   : > { %2687 = sst [smem:[#allocation7_spill]] %s2716_s23  ;;  %s2718_s24 = smov (!%p35_p0, %s37_s24), %s2256_s21 }
  0x15   : > { %p580_p3 = pnand %p1941_p1, %p579_p2  ;;  %p39_p4 = scmp.ge.s32.totalorder %s2718_s24, 2 }
  0x17   : > { %s2720_s24 = smov (%p39_p4, %s2718_s24), 0  ;;  %583 = sbr.rel (%p580_p3) target bundleno = 3469 (0xd8d), region = 80 }
  0x18   : > { %2688 = sst [smem:[#allocation8_spill]] %s2720_s24 }
  0x1c   : > { %p688_p5 = scmp.lt.s32.totalorder %s2248_s19, 1  ;;  %p700_p6 = scmp.lt.s32.totalorder %s2244_s18, 1 }
  0x1d   : > { %s2689_s0 = sld [smem:[#allocation11_spill]] }
  0x1e   : > { %s2722_s19 = smov (!%p688_p5, %s2248_s19), 1  ;;  %s2690_s1 = sld [smem:[#allocation12_spill]] }
  0x1f   : > { %s2380_s25 = scalar_select %p700_p6, %s2244_s18, 1 }
  0x20   : > { %s1942_s26 = sshll.u32 %s2722_s19, 2  ;;  %s1944_s27 = sshll.u32 %s2722_s19, 3 }
  0x21   : > { %s2692_s2 = sld [smem:[#allocation13_spill]]  ;;  %s1945_s22 = sshll.u32 %s2380_s25, 2 }
  0x22   : > { %s2694_s3 = sld [smem:[#allocation14_spill]]  ;;  %s1948_s17 = sshll.u32 %s2380_s25, 3 }
  0x23   : > { %s691_s30 = scalar_lea.vmem %s2689_s0, %s1942_s26  ;;  %s2695_s4 = sld [smem:[#allocation15_spill]] }
  0x24   : > { %s2388_s24 = scalar_lea.vmem %s2690_s1, %s1942_s26  ;;  %s2150_s26 = smul.u32 96, %s2380_s25 }
  0x25   : > { %2691 = sst [smem:[#allocation9_spill]] %s2388_s24  ;;  %s2115_s23 = sshll.u32 %s2380_s25, 4 }
  0x26   : > { %s2696_s6 = sld [smem:[#allocation17_spill]]  ;;  %s2117_s28 = sshll.u32 %s2380_s25, 5 }
  0x27   : > { %s2393_s20 = scalar_lea.vmem %s2692_s2, %s1944_s27  ;;  %s2697_s5 = sld [smem:[#allocation16_spill]] }
  0x28   : > { %2693 = sst [smem:[#allocation10_spill]] %s2393_s20  ;;  %s2399_s14 = scalar_lea.vmem %s2694_s3, %s1945_s22 }
  0x29   : > { %s2404_s16 = scalar_lea.vmem %s2695_s4, %s1945_s22  ;;  %s2698_s7 = sld [smem:[#allocation18_spill]] }
  0x2a   : > { %s2700_s9 = sld [smem:[#allocation20_spill]]  ;;  %s741_s22 = scalar_lea.vmem %s2661_s12, %s2380_s25 }
  0x2b   : > { %s2701_s10 = sld [smem:[#allocation21_spill]]  ;;  %s2451_s4 = scalar_lea.vmem %s2662_s13, %s2117_s28 }
  0x2c   : > { %s2411_s21 = scalar_lea.vmem %s2696_s6, %s1948_s17  ;;  %s2702_s11 = sld [smem:[#allocation22_spill]] }
  0x2d   : > { %s2417_s15 = scalar_lea.vmem %s2697_s5, %s2150_s26  ;;  %s1957_s24 = sshll.u32 %s2380_s25, 1 }
  0x2f   : > { %s2422_s20 = scalar_lea.vmem %s2698_s7, %s2115_s23  ;;  %s2705_s7 = sld [smem:[#allocation3_spill]] }
  0x30   : > { %s2431_s0 = scalar_lea.vmem %s2700_s9, %s2150_s26  ;;  %s756_s9 = sadd.s32 %s1957_s24, %s2722_s19 }
  0x31   : > { %s2436_s2 = scalar_lea.vmem %s2701_s10, %s1948_s17  ;;  %s2703_s17 = sld [smem:[#allocation23_spill]] }
  0x32   : > { %s2441_s3 = scalar_lea.vmem %s2702_s11, %s2115_s23  ;;  %s1959_s5 = sshll.u32 %s756_s9, 2 }
  0x33   : > { %s2704_s10 = sld [smem:[#allocation24_spill]] }
  0x35   : > { %p1960_p7 = scmp.ne.s32.totalorder %s2705_s7, 0 }
  0x37   : > { %s2457_s1 = scalar_lea.vmem %s2703_s17, %s1957_s24  ;;  %763 = sbr.rel (%p1960_p7) target bundleno = 64 (0x40), region = 84 }
  0x39   : > { %s2462_s11 = scalar_lea.vmem %s2704_s10, %s1959_s5 }
  0x3c   : > { %v764_v0 = vld [vmem:[%s691_s30] sm:$0xf]  ;;  %vm766_vm0 = vcmask 261120  }
  0x3d   : > { %v765_v1 = vunpack.c.l.bf16 %v764_v0 }
  0x3f   : > { %767 = vst.msk [vmem:[#allocation2] sm:$0xff] %vm766_vm0, %v765_v1 }
  0x40 PF: > { %vm779_vm1 = vcmask 261120   ;;  %v2262_v6 = vmov 32.0   ;;  %v2123_v9 = vld [vmem:[%s2417_s15 + $0x28] sm:$0xff]  ;;  %v2122_v11 = vld [vmem:[%s2417_s15 + $0x20] sm:$0xff]  ;;  %v2121_v17 = vld [vmem:[%s2417_s15 + $0x18] sm:$0xff]  ;;  %vm934_vm6 = vcmask 130048   ;;  %v773_v61 = vlaneseq }
  0x41   : > { %2198 = vrcp.f32 %v2262_v6  ;;  %899 = vmatpush.bf16.msra.mxu1 %v2123_v9  ;;  %v2119_v16 = vld [vmem:[%s2417_s15 + $0x8] sm:$0xff]  ;;  %v2118_v19 = vld [vmem:[%s2417_s15] sm:$0xff]  ;;  %v2120_v20 = vld [vmem:[%s2417_s15 + $0x10] sm:$0xff]  ;;  %v2263_v1 = vmov -1e+09   ;;  %vm956_vm8 = vcmask 64512  }
  0x42   : > { %870 = vmatpush.bf16.msra.mxu0 %v2119_v16  ;;  %v2482_v33 = vld [vmem:[%s2399_s14] sm:$0x7]  ;;  %v2127_v58 = vld [vmem:[%s2417_s15 + $0x48] sm:$0xff]  ;;  %v2125_v60 = vld [vmem:[%s2417_s15 + $0x38] sm:$0xff]  ;;  %v774_v62 = vshrl.u32 %v773_v61, 7  ;;  %v776_v63 = vand.u32 127, %v773_v61 }
  0x43   : > { %v2485_v35 = vld [vmem:[%s2404_s16] sm:$0x7]  ;;  %v812_v37 = vperm.slane %v2482_v33, 0  ;;  %925 = vmatpush.bf16.msra.mxu2 %v2127_v58  ;;  %vm986_vm9 = vcmask 1043456   ;;  %s2264_s8 = smov 16   ;;  %s2706_s9 = sld [smem:[#allocation9_spill]] }
  0x44   : > { %v814_v40 = vperm.slane %v2485_v35, 0  ;;  %v2496_v44 = vld [vmem:[%s2411_s21] sm:$0x3f]  ;;  %vm777_vm7 = vcmp.le.s32.totalorder %v776_v63, %v774_v62  ;;  %s2707_s19 = sld [smem:[#allocation19_spill]] }
  0x45   : > { %900 = vmatpush.bf16.msra.mxu1 %v2122_v11  ;;  %v877_v45 = vperm.slane %v2496_v44, 2  ;;  %v848_v51 = vperm.slane %v2496_v44, 0  ;;  %v2126_v59 = vld [vmem:[%s2417_s15 + $0x40] sm:$0xff]  ;;  %v906_v16 = vperm.slane %v2496_v44, 4 }
  0x46   : > { %v768_v2 = vld [vmem:[#allocation2] sm:$0xff]  ;;  %871 = vmatpush.bf16.msra.mxu0 %v2118_v19 }
  0x47   : > { %v780_v3 = vsel %vm779_vm1, %v768_v2, 0.0  ;;  %v791_v4 = vmul.f32 %v768_v2, %v768_v2  ;;  %v2199_v7 = vpop.eup %2198  ;;  %v2469_v12 = vpack.c.bf16 %v768_v2, %v768_v2  ;;  %926 = vmatpush.bf16.msra.mxu2 %v2126_v59 }
  0x48   : > { %781 = vadd.xlane.f32.xlu0 %v780_v3  ;;  %v784_v8 = vmul.f32 32.0, %v2199_v7  ;;  %vm788_vm2 = vweird.f32 %v2199_v7 }
  0x49   : > { %v792_v5 = vsel %vm779_vm1, %v791_v4, 0.0  ;;  %1978 = vmatmul.msk.bf16.vlgmr.msra.gmra.mxu1 %vm779_vm1, %v2469_v12 }
  0x4a   : > { %v785_v10 = vsub.f32 1.0, %v784_v8  ;;  %1022 = vmatpush.bf16.msrb.mxu1 %v2121_v17  ;;  %1987 = vmatmul.msk.bf16.vlgmr.msra.gmra.mxu2 %vm779_vm1, %v2469_v12  ;;  %s2708_s30 = scalar_lea.vmem %s2707_s19, %s2380_s25  ;;  %s2709_s25 = sld [smem:[#allocation10_spill]] }
  0x4b   : > { %1048 = vmatpush.bf16.msrb.mxu2 %v2125_v60 }
  0x4c   : > { %v786_v13 = vmul.f32 %v2199_v7, %v785_v10 }
  0x4e   : > { %v787_v14 = vadd.f32 %v2199_v7, %v786_v13  ;;  %1023 = vmatpush.bf16.msrb.mxu1 %v2120_v20 }
  0x50   : > { %793 = vadd.xlane.f32.xlu0 %v792_v5  ;;  %v2475_v18 = vsel %vm788_vm2, %v2199_v7, %v787_v14  ;;  %v2124_v7 = vld [vmem:[%s2417_s15 + $0x30] sm:$0xff] }
  0x51   : > { %1049 = vmatpush.bf16.msrb.mxu2 %v2124_v7 }
  0x5a   : > { %2007 = vmatmul.msk.bf16.vlgmr.msrb.gmra.mxu2 %vm779_vm1, %v2469_v12 }
  0xbb   : > { %v782_v15 = vpop.xlane.xlu0 %781 }
  0xbc   : > { %v790_v21 = vmul.f32 %v2475_v18, %v782_v15 }
  0xbe   : > { %v796_v23 = vmul.f32 %v790_v21, %v790_v21  ;;  %v799_v36 = vsub.f32 %v768_v2, %v790_v21  ;;  %v2509_v2 = vsel %vm777_vm7, 0.0, %v2263_v1  ;;  %v1029_v21 = vperm.slane %v2496_v44, 3 }
  0xc3   : > { %v794_v22 = vpop.xlane.xlu0 %793 }
  0xc4   : > { %v795_v24 = vmul.f32 %v794_v22, %v2475_v18 }
  0xc6   : > { %v797_v25 = vsub.f32 %v795_v24, %v796_v23  ;;  %v902_v46 = vpop.f32.mrf.mxu1 }
  0xc7   : > { %v903_v47 = vadd.f32 %v902_v46, %v877_v45 }
  0xc8   : > { %v798_v26 = vmax.f32 %v797_v25, 0.0 }
  0xc9   : > { %v933_v48 = vpack.c.bf16 %v903_v47, %v903_v47  ;;  %v2129_v47 = vld [vmem:[%s2417_s15 + $0x58] sm:$0xff] }
  0xca   : > { %v800_v27 = vadd.f32 1e-08, %v798_v26 }
  0xcb   : > { %v939_v49 = vsel %vm934_vm6, %v933_v48, 0  ;;  %v2128_v48 = vld [vmem:[%s2417_s15 + $0x50] sm:$0xff] }
  0xcc   : > { %2200 = vrsqrt.f32 %v800_v27  ;;  %vm807_vm4 = vweird.f32 %v800_v27  ;;  %948 = vmatpush.bf16.xpose.msra.mxu3 %v939_v49 }
  0xcd   : > { %v928_v8 = vpop.f32.mrf.mxu2 }
  0xce   : > { %v904_v50 = vpop.f32.mrf.mxu1  ;;  %v929_v17 = vadd.f32 %v928_v8, %v906_v16  ;;  %v2131_v16 = vld [vmem:[%s2422_s20 + $0x8] sm:$0xff] }
  0xcf   : > { %1179 = vmatpush.bf16.msra.mxu2 %v2131_v16  ;;  %v2141_v16 = vld [vmem:[%s2431_s0 + $0x48] sm:$0xff] }
  0xd0   : > { %v982_v19 = vpack.c.bf16 %v929_v17, %v929_v17  ;;  %v2130_v17 = vld [vmem:[%s2422_s20] sm:$0xff] }
  0xd2   : > { %v2201_v28 = vpop.eup %2200  ;;  %v988_v20 = vsel %vm986_vm9, %v982_v19, 0 }
  0xd3   : > { %v802_v29 = vmul.f32 %v2201_v28, %v800_v27  ;;  %vm808_vm3 = vweird.f32 %v2201_v28  ;;  %997 = vmatpush.bf16.msrb.mxu0 %v988_v20  ;;  %1180 = vmatpush.bf16.msra.mxu2 %v2130_v17  ;;  %v2140_v17 = vld [vmem:[%s2431_s0 + $0x40] sm:$0xff] }
  0xd4   : > { %vm809_vm5 = vmor %vm807_vm4, %vm808_vm3  ;;  %1074 = vmatpush.bf16.msrb.mxu3 %v2129_v47 }
  0xd5   : > { %v803_v30 = vmul.f32 %v2201_v28, %v802_v29  ;;  %v930_v13 = vpop.f32.mrf.mxu2 }
  0xd7   : > { %v804_v31 = vmul.f32 0.5, %v803_v30 }
  0xd8   : > { %1075 = vmatpush.bf16.msrb.mxu3 %v2128_v48 }
  0xd9   : > { %v805_v32 = vsub.f32 1.5, %v804_v31 }
  0xdb   : > { %v806_v34 = vmul.f32 %v2201_v28, %v805_v32 }
  0xdd   : > { %v810_v38 = vsel %vm809_vm5, %v2201_v28, %v806_v34  ;;  %v1051_v22 = vpop.f32.mrf.mxu2 }
  0xde   : > { %v811_v39 = vmul.f32 %v810_v38, %v799_v36  ;;  %v1052_v23 = vadd.f32 %v1051_v22, %v1029_v21 }
  0xe0   : > { %v813_v41 = vmul.f32 %v812_v37, %v811_v39  ;;  %v1082_v24 = vpack.c.bf16 %v1052_v23, %v1052_v23 }
  0xe2   : > { %v2489_v42 = vadd.f32 %v814_v40, %v813_v41  ;;  %v1087_v25 = vsel %vm934_vm6, %v1082_v24, 0  ;;  %v2196_v24 = vld [vmem:[%s2708_s30] ss:$0 sm:$0xff] }
  0xe4   : > { %v846_v43 = vpack.c.bf16 %v2489_v42, %v2489_v42 }
  0xe5   : > { %v1053_v26 = vpop.f32.mrf.mxu2 }
  0xe6   : > { %1969 = vmatmul.msk.bf16.vlgmr.msra.gmra.mxu0 %vm779_vm1, %v846_v43  ;;  %1998 = vmatmul.msk.bf16.vlgmr.msrb.gmra.mxu1 %vm779_vm1, %v846_v43  ;;  %v1003_v43 = vperm.slane %v2496_v44, 1 }
  0xe7   : > { %1096 = vmatpush.bf16.xpose.msra.mxu0 %v1087_v25 }
 0x163   : > { %v873_v52 = vpop.f32.mrf.mxu0  ;;  %v2501_v53 = vpop.f32.mrf.mxu1 }
 0x164   : > { %v874_v54 = vadd.f32 %v873_v52, %v848_v51  ;;  %v1026_v45 = vadd.f32 %v2501_v53, %v1003_v43 }
 0x166   : > { %v932_v55 = vpack.c.bf16 %v874_v54, %v874_v54  ;;  %v1081_v46 = vpack.c.bf16 %v1026_v45, %v1026_v45 }
 0x168   : > { %1988 = vmatmul.msk.bf16.vlgmr.msra.gmra.mxu3 %vm934_vm6, %v932_v55 }
 0x16b   : > { %v875_v56 = vpop.f32.mrf.mxu0  ;;  %v1027_v57 = vpop.f32.mrf.mxu1 }
 0x16c   : > { %v1055_v56 = vperm.slane %v2496_v44, 5 }
 0x178   : > { %2016 = vmatmul.msk.bf16.vlgmr.msrb.gmra.mxu3 %vm779_vm1, %v2469_v12 }
 0x1eb   : > { %v950_v0 = vpop.f32.mrf.mxu3 }
 0x1ec   : > { %v954_v3 = vmul.f32 0.25, %v950_v0 }
 0x1ee   : > { %v955_v4 = vadd.f32 %v954_v3, %v2509_v2 }
 0x1f0   : > { %v957_v5 = vsel %vm956_vm8, %v955_v4, -inf }
 0x1f1   : > { %958 = vmax.xlane.f32.xlu1 %v957_v5 }
 0x1f3   : > { %v952_v6 = vpop.f32.mrf.mxu3 }
 0x1fb   : > { %v1077_v57 = vpop.f32.mrf.mxu3 }
 0x1fc   : > { %v1078_v58 = vadd.f32 %v1077_v57, %v1055_v56 }
 0x1fe   : > { %v1129_v59 = vpack.c.bf16 %v1078_v58, %v1078_v58  ;;  %v1212_v58 = vperm.slane %v2482_v33, 1 }
 0x200   : > { %v1134_v61 = vsel %vm986_vm9, %v1129_v59, 0 }
 0x201   : > { %1143 = vmatpush.bf16.msra.mxu1 %v1134_v61  ;;  %v1214_v61 = vperm.slane %v2485_v35, 1 }
 0x203   : > { %v1079_v63 = vpop.f32.mrf.mxu3 }
 0x205   : > { %1325 = vmatpush.bf16.msrb.mxu1 %v2141_v16 }
 0x209   : > { %1326 = vmatpush.bf16.msrb.mxu1 %v2140_v17 }
 0x264   : > { %v959_v9 = vpop.xlane.xlu1 %958 }
 0x265   : > { %v960_v10 = vsub.f32 %v955_v4, %v959_v9 }
 0x267   : > { %v961_v11 = vmul.f32 1.442695, %v960_v10 }
 0x269   : > { %2202 = vpow2.f32 %v961_v11 }
 0x26f   : > { %v2203_v14 = vpop.eup %2202 }
 0x270   : > { %v963_v15 = vsel %vm956_vm8, %v2203_v14, 0.0 }
 0x271   : > { %964 = vadd.xlane.f32.xlu1 %v963_v15 }
 0x2e4   : > { %v965_v27 = vpop.xlane.xlu1 %964 }
 0x2e5   : > { %2204 = vrcp.f32 %v965_v27  ;;  %v977_v31 = vand.u32 2147483648, %v965_v27  ;;  %v975_v34 = vand.u32 2147483647, %v965_v27  ;;  %vm971_vm11 = vweird.f32 %v965_v27 }
 0x2e7   : > { %v978_v37 = vor.u32 1.1754944e-38, %v977_v31  ;;  %vm976_vm13 = vcmp.eq.f32.partialorder %v975_v34, 8.507059e+37  ;;  %v2136_v34 = vld [vmem:[%s2431_s0 + $0x20] sm:$0xff] }
 0x2eb   : > { %v2205_v28 = vpop.eup %2204 }
 0x2ec   : > { %v967_v29 = vmul.f32 %v2205_v28, %v965_v27  ;;  %vm972_vm10 = vweird.f32 %v2205_v28 }
 0x2ed   : > { %vm973_vm12 = vmor %vm971_vm11, %vm972_vm10 }
 0x2ee   : > { %v968_v30 = vsub.f32 1.0, %v967_v29 }
 0x2f0   : > { %v969_v32 = vmul.f32 %v2205_v28, %v968_v30 }
 0x2f2   : > { %v970_v36 = vadd.f32 %v2205_v28, %v969_v32  ;;  %v2137_v32 = vld [vmem:[%s2431_s0 + $0x28] sm:$0xff] }
 0x2f4   : > { %v974_v38 = vsel %vm973_vm12, %v2205_v28, %v970_v36  ;;  %v769_v36 = vld [vmem:[%s2706_s9] sm:$0xf] }
 0x2f5   : > { %v979_v39 = vsel %vm976_vm13, %v978_v37, %v974_v38  ;;  %v770_v37 = vunpack.c.l.bf16 %v769_v36 }
 0x2f6   : > { %v980_v40 = vmul.f32 %v2203_v14, %v979_v39  ;;  %v2135_v39 = vld [vmem:[%s2431_s0 + $0x18] sm:$0xff] }
 0x2f7   : > { %v2551_v38 = vpack.c.bf16 %v770_v37, %v770_v37 }
 0x2f8   : > { %v981_v41 = vpack.c.bf16 %v980_v40, %v980_v40  ;;  %v2132_v40 = vld [vmem:[%s2431_s0] sm:$0xff] }
 0x2fa   : > { %1989 = vmatmul.msk.bf16.vlgmr.msrb.gmra.mxu0 %vm956_vm8, %v981_v41  ;;  %v2134_v41 = vld [vmem:[%s2431_s0 + $0x10] sm:$0xff] }
 0x2fb   : > { %1299 = vmatpush.bf16.msrb.mxu0 %v2137_v32 }
 0x2ff   : > { %1300 = vmatpush.bf16.msrb.mxu0 %v2136_v34 }
 0x30a   : > { %2017 = vmatmul.msk.bf16.vlgmr.msra.gmra.mxu0 %vm934_vm6, %v1081_v46 }
 0x30b   : > { %1419 = vmatpush.bf16.msra.mxu0 %v2135_v39 }
 0x30f   : > { %1420 = vmatpush.bf16.msra.mxu0 %v2134_v41 }
 0x31a   : > { %2045 = vmatmul.msk.bf16.vlgmr.msrb.gmra.mxu0 %vm779_vm1, %v2551_v38 }
 0x377   : > { %v999_v49 = vpop.f32.mrf.mxu0 }
 0x37f   : > { %v1001_v50 = vpop.f32.mrf.mxu0 }
 0x387   : > { %v1098_v51 = vpop.f32.mrf.mxu0 }
 0x388   : > { %v1102_v52 = vmul.f32 0.25, %v1098_v51 }
 0x38a   : > { %v1103_v54 = vadd.f32 %v1102_v52, %v2509_v2 }
 0x38c   : > { %v1104_v55 = vsel %vm956_vm8, %v1103_v54, -inf }
 0x38d   : > { %1105 = vmax.xlane.f32.xlu2 %v1104_v55 }
 0x38f   : > { %v1100_v53 = vpop.f32.mrf.mxu0 }
 0x400   : > { %v1106_v60 = vpop.xlane.xlu2 %1105 }
 0x401   : > { %v1107_v62 = vsub.f32 %v1103_v54, %v1106_v60 }
 0x403   : > { %v1108_v12 = vmul.f32 1.442695, %v1107_v62 }
 0x405   : > { %2206 = vpow2.f32 %v1108_v12 }
 0x40b   : > { %v2207_v0 = vpop.eup %2206 }
 0x40c   : > { %v1110_v1 = vsel %vm956_vm8, %v2207_v0, 0.0 }
 0x40d   : > { %1111 = vadd.xlane.f32.xlu2 %v1110_v1  ;;  %v2570_v1 = vld [vmem:[%s2436_s2] sm:$0x3f] }
 0x480   : > { %v1112_v3 = vpop.xlane.xlu2 %1111 }
 0x481   : > { %2208 = vrcp.f32 %v1112_v3  ;;  %v1124_v6 = vand.u32 2147483648, %v1112_v3  ;;  %v1122_v8 = vand.u32 2147483647, %v1112_v3  ;;  %vm1118_vm15 = vweird.f32 %v1112_v3 }
 0x483   : > { %v1125_v10 = vor.u32 1.1754944e-38, %v1124_v6  ;;  %vm1123_vm2 = vcmp.eq.f32.partialorder %v1122_v8, 8.507059e+37 }
 0x487   : > { %v2209_v4 = vpop.eup %2208 }
 0x488   : > { %v1114_v5 = vmul.f32 %v2209_v4, %v1112_v3  ;;  %vm1119_vm14 = vweird.f32 %v2209_v4  ;;  %v1277_v3 = vperm.slane %v2570_v1, 2 }
 0x489   : > { %vm1120_vm0 = vmor %vm1118_vm15, %vm1119_vm14 }
 0x48a   : > { %v1115_v44 = vsub.f32 1.0, %v1114_v5 }
 0x48c   : > { %v1116_v7 = vmul.f32 %v2209_v4, %v1115_v44 }
 0x48e   : > { %v1117_v9 = vadd.f32 %v2209_v4, %v1116_v7 }
 0x490   : > { %v1121_v11 = vsel %vm1120_vm0, %v2209_v4, %v1117_v9  ;;  %v1302_v4 = vpop.f32.mrf.mxu0  ;;  %v1248_v9 = vperm.slane %v2570_v1, 0 }
 0x491   : > { %v1126_v13 = vsel %vm1123_vm2, %v1125_v10, %v1121_v11  ;;  %v1303_v5 = vadd.f32 %v1302_v4, %v1277_v3  ;;  %vm1693_vm2 = vcmask 257024  }
 0x492   : > { %v1127_v14 = vmul.f32 %v2207_v0, %v1126_v13 }
 0x493   : > { %v1333_v44 = vpack.c.bf16 %v1303_v5, %v1303_v5 }
 0x494   : > { %v1128_v15 = vpack.c.bf16 %v1127_v14, %v1127_v14 }
 0x495   : > { %v1338_v6 = vsel %vm934_vm6, %v1333_v44, 0 }
 0x496   : > { %2018 = vmatmul.msk.bf16.vlgmr.msra.gmra.mxu1 %vm956_vm8, %v1128_v15  ;;  %1347 = vmatpush.bf16.xpose.msrb.mxu2 %v1338_v6 }
 0x498   : > { %v1304_v7 = vpop.f32.mrf.mxu0 }
 0x4a6   : > { %2054 = vmatmul.msk.bf16.vlgmr.msrb.gmra.mxu1 %vm779_vm1, %v2551_v38 }
 0x513   : > { %v1145_v19 = vpop.f32.mrf.mxu1 }
 0x514   : > { %1150 = vrot.lane.b32.xlu0 %v1145_v19, %s2264_s8 }
 0x51b   : > { %v1147_v20 = vpop.f32.mrf.mxu1 }
 0x586   : > { %v1151_v21 = vpop.permute.xlu0 %1150 }
 0x587   : > { %v1153_v22 = vsel %vm934_vm6, %v999_v49, %v1151_v21 }
 0x588   : > { %v1154_v23 = vpack.c.bf16 %v1153_v22, %v1153_v22 }
 0x58a   : > { %2027 = vmatmul.msk.bf16.vlgmr.msra.gmra.mxu2 %vm779_vm1, %v1154_v23 }
 0x60d   : > { %v1182_v25 = vpop.f32.mrf.mxu2 }
 0x60e   : > { %v1183_v26 = vadd.f32 %v2196_v24, %v1182_v25  ;;  %v2139_v24 = vld [vmem:[%s2431_s0 + $0x38] sm:$0xff]  ;;  %v2138_v25 = vld [vmem:[%s2431_s0 + $0x30] sm:$0xff] }
 0x60f   : > { %1445 = vmatpush.bf16.msra.mxu1 %v2139_v24 }
 0x610   : > { %v1186_v27 = vadd.f32 %v1183_v26, %v2489_v42  ;;  %v2133_v42 = vld [vmem:[%s2431_s0 + $0x8] sm:$0xff]  ;;  %v1306_v26 = vperm.slane %v2570_v1, 4 }
 0x611   : > { %1270 = vmatpush.bf16.msra.mxu3 %v2133_v42 }
 0x612   : > { %v1187_v28 = vsel %vm779_vm1, %v1186_v27, 0.0  ;;  %v1191_v29 = vmul.f32 %v1186_v27, %v1186_v27 }
 0x613   : > { %1188 = vadd.xlane.f32.xlu1 %v1187_v28  ;;  %1446 = vmatpush.bf16.msra.mxu1 %v2138_v25 }
 0x614   : > { %v1192_v30 = vsel %vm779_vm1, %v1191_v29, 0.0 }
 0x615   : > { %v1184_v31 = vpop.f32.mrf.mxu2  ;;  %1193 = vadd.xlane.f32.xlu2 %v1192_v30  ;;  %1271 = vmatpush.bf16.msra.mxu3 %v2132_v40  ;;  %v1426_v40 = vperm.slane %v2570_v1, 3 }
 0x616   : > { %2074 = vmatmul.msk.bf16.vlgmr.msra.gmra.mxu1 %vm779_vm1, %v2551_v38 }
 0x686   : > { %v1189_v43 = vpop.xlane.xlu1 %1188 }
 0x687   : > { %v1190_v45 = vmul.f32 %v1189_v43, %v2475_v18 }
 0x688   : > { %v1194_v46 = vpop.xlane.xlu2 %1193 }
 0x689   : > { %v1196_v47 = vmul.f32 %v1190_v45, %v1190_v45  ;;  %v1195_v48 = vmul.f32 %v1194_v46, %v2475_v18  ;;  %v1199_v59 = vsub.f32 %v1186_v27, %v1190_v45  ;;  %v1328_v27 = vpop.f32.mrf.mxu1 }
 0x68a   : > { %v1329_v28 = vadd.f32 %v1328_v27, %v1306_v26 }
 0x68b   : > { %v1197_v49 = vsub.f32 %v1195_v48, %v1196_v47 }
 0x68c   : > { %v1380_v29 = vpack.c.bf16 %v1329_v28, %v1329_v28 }
 0x68d   : > { %v1198_v50 = vmax.f32 %v1197_v49, 0.0 }
 0x68e   : > { %v1385_v30 = vsel %vm986_vm9, %v1380_v29, 0 }
 0x68f   : > { %v1200_v51 = vadd.f32 1e-08, %v1198_v50  ;;  %1394 = vmatpush.bf16.msrb.mxu3 %v1385_v30 }
 0x691   : > { %2210 = vrsqrt.f32 %v1200_v51  ;;  %vm1207_vm4 = vweird.f32 %v1200_v51  ;;  %v1330_v31 = vpop.f32.mrf.mxu1 }
 0x697   : > { %v2211_v52 = vpop.eup %2210 }
 0x698   : > { %v1202_v54 = vmul.f32 %v2211_v52, %v1200_v51  ;;  %vm1208_vm3 = vweird.f32 %v2211_v52 }
 0x699   : > { %vm1209_vm5 = vmor %vm1207_vm4, %vm1208_vm3  ;;  %v1448_v39 = vpop.f32.mrf.mxu1 }
 0x69a   : > { %v1203_v55 = vmul.f32 %v2211_v52, %v1202_v54  ;;  %v1449_v41 = vadd.f32 %v1448_v39, %v1426_v40 }
 0x69c   : > { %v1204_v53 = vmul.f32 0.5, %v1203_v55  ;;  %v1479_v43 = vpack.c.bf16 %v1449_v41, %v1449_v41  ;;  %v2197_v41 = vld [vmem:[%s741_s22] ss:$0 sm:$0xff] }
 0x69e   : > { %v1205_v56 = vsub.f32 1.5, %v1204_v53  ;;  %v1484_v45 = vsel %vm934_vm6, %v1479_v43, 0 }
 0x6a0   : > { %v1206_v57 = vmul.f32 %v2211_v52, %v1205_v56 }
 0x6a1   : > { %v1450_v46 = vpop.f32.mrf.mxu1 }
 0x6a2   : > { %v1210_v60 = vsel %vm1209_vm5, %v2211_v52, %v1206_v57 }
 0x6a3   : > { %v1211_v62 = vmul.f32 %v1210_v60, %v1199_v59  ;;  %v1400_v60 = vperm.slane %v2570_v1, 1 }
 0x6a5   : > { %v1213_v12 = vmul.f32 %v1212_v58, %v1211_v62 }
 0x6a7   : > { %v2563_v63 = vadd.f32 %v1214_v61, %v1213_v12  ;;  %v2143_v12 = vld [vmem:[%s2431_s0 + $0x58] sm:$0xff] }
 0x6a8   : > { %1471 = vmatpush.bf16.msra.mxu2 %v2143_v12 }
 0x6a9   : > { %v1246_v0 = vpack.c.bf16 %v2563_v63, %v2563_v63 }
 0x6ab   : > { %2036 = vmatmul.msk.bf16.vlgmr.msra.gmra.mxu3 %vm779_vm1, %v1246_v0  ;;  %2065 = vmatmul.msk.bf16.vlgmr.msra.gmra.mxu0 %vm779_vm1, %v1246_v0  ;;  %v2142_v0 = vld [vmem:[%s2431_s0 + $0x50] sm:$0xff] }
 0x6ac   : > { %1493 = vmatpush.bf16.xpose.msra.mxu3 %v1484_v45  ;;  %1472 = vmatpush.bf16.msra.mxu2 %v2142_v0 }
 0x728   : > { %v2574_v8 = vpop.f32.mrf.mxu0 }
 0x729   : > { %v1423_v61 = vadd.f32 %v2574_v8, %v1400_v60  ;;  %v2148_v60 = vld [vmem:[%s2451_s4 + $0x10] sm:$0xff] }
 0x72b   : > { %v1478_v62 = vpack.c.bf16 %v1423_v61, %v1423_v61 }
 0x72e   : > { %v1273_v10 = vpop.f32.mrf.mxu3 }
 0x72f   : > { %v1274_v11 = vadd.f32 %v1273_v10, %v1248_v9  ;;  %v1452_v9 = vperm.slane %v2570_v1, 5 }
 0x730   : > { %v1424_v13 = vpop.f32.mrf.mxu0 }
 0x731   : > { %v1332_v14 = vpack.c.bf16 %v1274_v11, %v1274_v11 }
 0x733   : > { %2055 = vmatmul.msk.bf16.vlgmr.msrb.gmra.mxu2 %vm934_vm6, %v1332_v14 }
 0x736   : > { %v1275_v15 = vpop.f32.mrf.mxu3 }
 0x743   : > { %2083 = vmatmul.msk.bf16.vlgmr.msra.gmra.mxu2 %vm779_vm1, %v2551_v38 }
 0x7b6   : > { %v1349_v19 = vpop.f32.mrf.mxu2 }
 0x7b7   : > { %v1353_v20 = vmul.f32 0.25, %v1349_v19 }
 0x7b9   : > { %v1354_v21 = vadd.f32 %v1353_v20, %v2509_v2 }
 0x7bb   : > { %v1355_v22 = vsel %vm956_vm8, %v1354_v21, -inf }
 0x7bc   : > { %1356 = vmax.xlane.f32.xlu1 %v1355_v22 }
 0x7be   : > { %v1351_v23 = vpop.f32.mrf.mxu2 }
 0x7c6   : > { %v1474_v10 = vpop.f32.mrf.mxu2 }
 0x7c7   : > { %v1475_v11 = vadd.f32 %v1474_v10, %v1452_v9 }
 0x7c9   : > { %v1526_v13 = vpack.c.bf16 %v1475_v11, %v1475_v11 }
 0x7cb   : > { %v1531_v15 = vsel %vm986_vm9, %v1526_v13, 0  ;;  %v1684_v13 = vld [vmem:[%s2709_s25] sm:$0xff] }
 0x7cc   : > { %1540 = vmatpush.bf16.msrb.mxu0 %v1531_v15  ;;  %v1621_v15 = vld [vmem:[%s2457_s1] sm:$0x3] }
 0x7ce   : > { %v1476_v17 = vpop.f32.mrf.mxu2 }
 0x82f   : > { %v1357_v32 = vpop.xlane.xlu1 %1356 }
 0x830   : > { %v1358_v34 = vsub.f32 %v1354_v21, %v1357_v32  ;;  %v2145_v32 = vld [vmem:[%s2441_s3 + $0x8] sm:$0xff] }
 0x831   : > { %1576 = vmatpush.bf16.msrb.mxu1 %v2145_v32 }
 0x832   : > { %v1359_v36 = vmul.f32 1.442695, %v1358_v34  ;;  %v2144_v34 = vld [vmem:[%s2441_s3] sm:$0xff] }
 0x834   : > { %2212 = vpow2.f32 %v1359_v36 }
 0x835   : > { %1577 = vmatpush.bf16.msrb.mxu1 %v2144_v34 }
 0x83a   : > { %v2213_v37 = vpop.eup %2212 }
 0x83b   : > { %v1361_v42 = vsel %vm956_vm8, %v2213_v37, 0.0 }
 0x83c   : > { %1362 = vadd.xlane.f32.xlu2 %v1361_v42 }
 0x8af   : > { %v1363_v47 = vpop.xlane.xlu2 %1362 }
 0x8b0   : > { %2214 = vrcp.f32 %v1363_v47  ;;  %v1375_v51 = vand.u32 2147483648, %v1363_v47  ;;  %v1373_v54 = vand.u32 2147483647, %v1363_v47  ;;  %vm1369_vm10 = vweird.f32 %v1363_v47 }
 0x8b2   : > { %v1376_v53 = vor.u32 1.1754944e-38, %v1375_v51  ;;  %vm1374_vm12 = vcmp.eq.f32.partialorder %v1373_v54, 8.507059e+37  ;;  %v2147_v51 = vld [vmem:[%s2451_s4 + $0x8] sm:$0xff] }
 0x8b3   : > { %1645 = vmatpush.bf16.msrb.mxu2 %v2147_v51 }
 0x8b6   : > { %v2215_v48 = vpop.eup %2214 }
 0x8b7   : > { %v1365_v49 = vmul.f32 %v2215_v48, %v1363_v47  ;;  %vm1370_vm7 = vweird.f32 %v2215_v48 }
 0x8b8   : > { %vm1371_vm11 = vmor %vm1369_vm10, %vm1370_vm7 }
 0x8b9   : > { %v1366_v50 = vsub.f32 1.0, %v1365_v49 }
 0x8bb   : > { %v1367_v52 = vmul.f32 %v2215_v48, %v1366_v50 }
 0x8bd   : > { %v1368_v55 = vadd.f32 %v2215_v48, %v1367_v52  ;;  %v2146_v52 = vld [vmem:[%s2451_s4] sm:$0xff] }
 0x8be   : > { %1646 = vmatpush.bf16.msrb.mxu2 %v2146_v52 }
 0x8bf   : > { %v1372_v56 = vsel %vm1371_vm11, %v2215_v48, %v1368_v55 }
 0x8c0   : > { %v1377_v57 = vsel %vm1374_vm12, %v1376_v53, %v1372_v56 }
 0x8c1   : > { %v1378_v58 = vmul.f32 %v2213_v37, %v1377_v57 }
 0x8c3   : > { %v1379_v59 = vpack.c.bf16 %v1378_v58, %v1378_v58  ;;  %v2149_v58 = vld [vmem:[%s2451_s4 + $0x18] sm:$0xff] }
 0x8c5   : > { %2056 = vmatmul.msk.bf16.vlgmr.msrb.gmra.mxu3 %vm956_vm8, %v1379_v59 }
 0x8c6   : > { %1676 = vmatpush.bf16.msrb.mxu3 %v2149_v58 }
 0x8ca   : > { %1677 = vmatpush.bf16.msrb.mxu3 %v2148_v60 }
 0x8d5   : > { %2084 = vmatmul.msk.bf16.vlgmr.msra.gmra.mxu3 %vm934_vm6, %v1478_v62 }
 0x948   : > { %v1396_v3 = vpop.f32.mrf.mxu3 }
 0x950   : > { %v1398_v4 = vpop.f32.mrf.mxu3 }
 0x958   : > { %v1495_v5 = vpop.f32.mrf.mxu3 }
 0x959   : > { %v1499_v44 = vmul.f32 0.25, %v1495_v5 }
 0x95b   : > { %v1500_v6 = vadd.f32 %v1499_v44, %v2509_v2 }
 0x95d   : > { %v1501_v7 = vsel %vm956_vm8, %v1500_v6, -inf }
 0x95e   : > { %1502 = vmax.xlane.f32.xlu1 %v1501_v7  ;;  %v1611_v7 = vperm.slane %v2485_v35, 2 }
 0x960   : > { %v1497_v8 = vpop.f32.mrf.mxu3 }
 0x9d1   : > { %v1503_v14 = vpop.xlane.xlu1 %1502 }
 0x9d2   : > { %v1504_v16 = vsub.f32 %v1500_v6, %v1503_v14  ;;  %v2265_v14 = vmov 0  }
 0x9d3   : > { %2195 = vset.pattern.permute.xlu0 %v2265_v14 }
 0x9d4   : > { %v1505_v38 = vmul.f32 1.442695, %v1504_v16  ;;  %v1623_v16 = vperm.slane %v1621_v15, 0 }
 0x9d6   : > { %2216 = vpow2.f32 %v1505_v38 }
 0x9dc   : > { %v2217_v19 = vpop.eup %2216 }
 0x9dd   : > { %v1507_v2 = vsel %vm956_vm8, %v2217_v19, 0.0 }
 0x9de   : > { %1508 = vadd.xlane.f32.xlu2 %v1507_v2  ;;  %v1654_v2 = vperm.slane %v1621_v15, 1 }
 0xa51   : > { %v1509_v20 = vpop.xlane.xlu2 %1508 }
 0xa52   : > { %2218 = vrcp.f32 %v1509_v20  ;;  %v1521_v23 = vand.u32 2147483648, %v1509_v20  ;;  %v1519_v25 = vand.u32 2147483647, %v1509_v20  ;;  %vm1515_vm9 = vweird.f32 %v1509_v20 }
 0xa54   : > { %v1522_v27 = vor.u32 1.1754944e-38, %v1521_v23  ;;  %vm1520_vm15 = vcmp.eq.f32.partialorder %v1519_v25, 8.507059e+37 }
 0xa58   : > { %v2219_v21 = vpop.eup %2218 }
 0xa59   : > { %v1511_v22 = vmul.f32 %v2219_v21, %v1509_v20  ;;  %vm1516_vm13 = vweird.f32 %v2219_v21 }
 0xa5a   : > { %vm1517_vm14 = vmor %vm1515_vm9, %vm1516_vm13 }
 0xa5b   : > { %v1512_v1 = vsub.f32 1.0, %v1511_v22 }
 0xa5d   : > { %v1513_v24 = vmul.f32 %v2219_v21, %v1512_v1 }
 0xa5f   : > { %v1514_v26 = vadd.f32 %v2219_v21, %v1513_v24 }
 0xa61   : > { %v1518_v28 = vsel %vm1517_vm14, %v2219_v21, %v1514_v26 }
 0xa62   : > { %v1523_v29 = vsel %vm1520_vm15, %v1522_v27, %v1518_v28 }
 0xa63   : > { %v1524_v30 = vmul.f32 %v2217_v19, %v1523_v29 }
 0xa65   : > { %v1525_v31 = vpack.c.bf16 %v1524_v30, %v1524_v30 }
 0xa67   : > { %2085 = vmatmul.msk.bf16.vlgmr.msrb.gmra.mxu0 %vm956_vm8, %v1525_v31 }
 0xae4   : > { %v1542_v36 = vpop.f32.mrf.mxu0 }
 0xae5   : > { %1547 = vrot.lane.b32.xlu0 %v1542_v36, %s2264_s8 }
 0xaec   : > { %v1544_v37 = vpop.f32.mrf.mxu0 }
 0xaed   : > { %1687 = vperm.xlu0 %2195, %v1684_v13  }
 0xb57   : > { %v1548_v42 = vpop.permute.xlu0 %1547 }
 0xb58   : > { %v1550_v39 = vsel %vm934_vm6, %v1396_v3, %v1548_v42 }
 0xb59   : > { %v1551_v40 = vpack.c.bf16 %v1550_v39, %v1550_v39 }
 0xb5b   : > { %2094 = vmatmul.msk.bf16.vlgmr.msrb.gmra.mxu1 %vm779_vm1, %v1551_v40 }
 0xb5f   : > { %v1688_v22 = vpop.permute.xlu0 %1687 }
 0xbd8   : > { %v1579_v43 = vpop.f32.mrf.mxu1 }
 0xbd9   : > { %v1580_v45 = vadd.f32 %v2197_v41, %v1579_v43 }
 0xbdb   : > { %v1583_v46 = vadd.f32 %v1580_v45, %v2563_v63 }
 0xbdd   : > { %v1584_v47 = vsel %vm779_vm1, %v1583_v46, 0.0  ;;  %v1588_v48 = vmul.f32 %v1583_v46, %v1583_v46 }
 0xbde   : > { %1585 = vadd.xlane.f32.xlu1 %v1584_v47 }
 0xbdf   : > { %v1589_v49 = vsel %vm779_vm1, %v1588_v48, 0.0 }
 0xbe0   : > { %v1581_v50 = vpop.f32.mrf.mxu1  ;;  %1590 = vadd.xlane.f32.xlu2 %v1589_v49 }
 0xc51   : > { %v1586_v54 = vpop.xlane.xlu1 %1585 }
 0xc52   : > { %v1587_v55 = vmul.f32 %v1586_v54, %v2475_v18 }
 0xc53   : > { %v1591_v53 = vpop.xlane.xlu2 %1590 }
 0xc54   : > { %v1593_v56 = vmul.f32 %v1587_v55, %v1587_v55  ;;  %v1592_v63 = vmul.f32 %v1591_v53, %v2475_v18  ;;  %v1609_v18 = vperm.slane %v2482_v33, 2  ;;  %v1596_v44 = vsub.f32 %v1583_v46, %v1587_v55 }
 0xc56   : > { %v1594_v57 = vsub.f32 %v1592_v63, %v1593_v56 }
 0xc58   : > { %v1595_v59 = vmax.f32 %v1594_v57, 0.0 }
 0xc5a   : > { %v1597_v61 = vadd.f32 1e-08, %v1595_v59 }
 0xc5c   : > { %2220 = vrsqrt.f32 %v1597_v61  ;;  %vm1604_vm8 = vweird.f32 %v1597_v61 }
 0xc62   : > { %v2221_v62 = vpop.eup %2220 }
 0xc63   : > { %v1599_v12 = vmul.f32 %v2221_v62, %v1597_v61  ;;  %vm1605_vm6 = vweird.f32 %v2221_v62 }
 0xc64   : > { %vm1606_vm0 = vmor %vm1604_vm8, %vm1605_vm6 }
 0xc65   : > { %v1600_v0 = vmul.f32 %v2221_v62, %v1599_v12 }
 0xc67   : > { %v1601_v3 = vmul.f32 0.5, %v1600_v0 }
 0xc69   : > { %v1602_v4 = vsub.f32 1.5, %v1601_v3 }
 0xc6b   : > { %v1603_v5 = vmul.f32 %v2221_v62, %v1602_v4 }
 0xc6d   : > { %v1607_v6 = vsel %vm1606_vm0, %v2221_v62, %v1603_v5 }
 0xc6e   : > { %v1608_v8 = vmul.f32 %v1607_v6, %v1596_v44 }
 0xc70   : > { %v1610_v9 = vmul.f32 %v1609_v18, %v1608_v8 }
 0xc72   : > { %v1612_v10 = vadd.f32 %v1611_v7, %v1610_v9 }
 0xc74   : > { %v1622_v11 = vpack.c.bf16 %v1612_v10, %v1612_v10 }
 0xc76   : > { %2103 = vmatmul.msk.bf16.vlgmr.msrb.gmra.mxu2 %vm779_vm1, %v1622_v11 }
 0xcf9   : > { %v1648_v38 = vpop.f32.mrf.mxu2 }
 0xcfa   : > { %v1649_v33 = vadd.f32 %v1648_v38, %v1623_v16 }
 0xcfc   : > { %v1652_v17 = vmax.f32 %v1649_v33, 0.0 }
 0xcfe   : > { %v1653_v19 = vpack.c.bf16 %v1652_v17, %v1652_v17 }
 0xd00   : > { %2112 = vmatmul.msk.bf16.vlgmr.msrb.gmra.mxu3 %vm779_vm1, %v1653_v19 }
 0xd01   : > { %v1650_v35 = vpop.f32.mrf.mxu2 }
 0xd83   : > { %v1679_v20 = vpop.f32.mrf.mxu3 }
 0xd84   : > { %v1680_v21 = vadd.f32 %v1679_v20, %v1654_v2 }
 0xd86   : > { %v1683_v1 = vadd.f32 %v1680_v21, %v1612_v10 }
 0xd88   : > { %v1690_v23 = vmul.f32 %v1688_v22, %v1683_v1 }
 0xd8a   : > { %1691 = vst.msk [vmem:[#allocation2] sm:$0xff] %vm779_vm1, %v1690_v23  ;;  %v1692_v24 = vpack.c.bf16 %v1690_v23, %v1690_v23 }
 0xd8b   : > { %v1681_v25 = vpop.f32.mrf.mxu3 }
 0xd8c   : > { %1694 = vst.msk [vmem:[%s2462_s11] sm:$0xf] %vm1693_vm2, %v1692_v24 }
 0xd8d PF: > { %s2710_s21 = sld [smem:[#allocation6_spill]] }
 0xd8e   : > { %s2711_s18 = sld [smem:[#allocation4_spill]] }
 0xd8f   : > { %s2712_s19 = sld [smem:[#allocation5_spill]] }
 0xd90   : > { %s2713_s20 = sld [smem:[#allocation7_spill]] }
 0xd93   : > { %s25_s22 = sadd.s32 1, %s2710_s21   ;;  %s2714_s21 = sld [smem:[#allocation8_spill]] }
 0xd94   : > { %p22_p8 = scmp.ge.s32.totalorder %s25_s22, 6  }
 0xd96   :  { %24 = sbr.rel (!%p22_p8) target bundleno = 15 (0xf), region = 156 }

</bundles_post_ra>
